<compile_context>
chip_gen: v5e
topology: v5e:2x2
jax: 0.10.0
libtpu: 0.0.40
codegen_flags: <defaults>
</compile_context>

<pallas_src>
import functools

import jax
import jax.numpy as jnp
from jax.experimental import pallas as pl
from jax.experimental.pallas import tpu as pltpu


def _round_up(x, m):
    return ((x + m - 1) // m) * m


# ----------------------------------------------------------------------------
# Kernel 1: fused multi-layer LSTM over the whole (padded) sequence, gridless.
# ----------------------------------------------------------------------------
def _lstm_stack_kernel(x_ref, wih_ref, whh_ref, b_ref, hseq_ref, xp_ref):
    """Fused LSTM stack.

    x_ref:    (T1, Bp, D)  bf16  layer-0 input (features at t=0, embeddings after)
    wih_ref:  (L, D, 4D)   bf16  input->gates weights, pre-transposed, gate-padded
    whh_ref:  (L, D, 4D)   bf16  hidden->gates weights, pre-transposed, gate-padded
    b_ref:    (L, 1, 4D)   f32   combined b_ih + b_hh, gate-padded
    hseq_ref: (T1, Bp, D)  bf16  OUT: last layer's hidden sequence (also serves as the
                                 inter-layer activation buffer, stays in VMEM)
    xp_ref:   (T1, Bp, 4D) f32   scratch: hoisted input projection
    """
    t1, b_pad, d = x_ref.shape
    n = t1 * b_pad
    num_layers = wih_ref.shape[0]
    unroll = t1 if t1 <= 16 else 8   # full unroll only for short sequences

    for l in range(num_layers):
        # --- Hoisted input projection: no recurrent dependency -> one big MXU matmul.
        layer_in = (x_ref if l == 0 else hseq_ref)[...].reshape(n, d)   # bf16
        xp = jnp.dot(layer_in, wih_ref[l], preferred_element_type=jnp.float32)
        xp_ref[...] = (xp + b_ref[l]).reshape(t1, b_pad, 4 * d)

        w_hh = whh_ref[l]                                       # (D, 4D) bf16

        # --- Sequential recurrence: only h @ W_hh left on the critical path.
        def step(t, carry, w_hh=w_hh):
            h, c = carry                                        # h bf16, c f32, (Bp, D)
            gates = xp_ref[t] + jnp.dot(h, w_hh,
                                        preferred_element_type=jnp.float32)
            # PyTorch gate order: i, f, g, o — each slice is lane-aligned (d = 128k).
            i_g = jax.nn.sigmoid(gates[:, 0 * d:1 * d])
            f_g = jax.nn.sigmoid(gates[:, 1 * d:2 * d])
            g_g = jnp.tanh(gates[:, 2 * d:3 * d])
            o_g = jax.nn.sigmoid(gates[:, 3 * d:4 * d])
            c = f_g * c + i_g * g_g
            h = (o_g * jnp.tanh(c)).astype(jnp.bfloat16)
            hseq_ref[t] = h
            return (h, c)

        jax.lax.fori_loop(
            0, t1, step,
            (jnp.zeros((b_pad, d), jnp.bfloat16),
             jnp.zeros((b_pad, d), jnp.float32)),
            unroll=unroll)


def lstm_stack(x, wih, whh, bias):
    t1, b_pad, d = x.shape
    num_layers, _, four_d = wih.shape
    # Actual footprint (no double buffering) + headroom.
    footprint = (x.size * 2 + wih.size * 2 + whh.size * 2 + bias.size * 4
                 + t1 * b_pad * four_d * 4        # xp scratch (f32)
                 + t1 * b_pad * d * 2)            # hseq output (bf16)
    vmem_bytes = min(int(footprint * 1.5) + (2 << 20), 100 * 1024 * 1024)

    vmem_spec = pl.BlockSpec(memory_space=pltpu.MemorySpace.VMEM)
    return pl.pallas_call(
        _lstm_stack_kernel,
        out_shape=jax.ShapeDtypeStruct((t1, b_pad, d), jnp.bfloat16),
        in_specs=[vmem_spec, vmem_spec, vmem_spec, vmem_spec],
        out_specs=vmem_spec,
        scratch_shapes=[pltpu.VMEM((t1, b_pad, four_d), jnp.float32)],
        compiler_params=pltpu.CompilerParams(vmem_limit_bytes=vmem_bytes),
    )(x, wih, whh, bias)


# ----------------------------------------------------------------------------
# Kernel 2: tiled final linear (rows x vocab grid, both axes parallel).
# ----------------------------------------------------------------------------
def _linear_kernel(h_ref, w_ref, b_ref, o_ref):
    o_ref[...] = (jnp.dot(h_ref[...], w_ref[...], preferred_element_type=jnp.float32)
                  + b_ref[...]).astype(o_ref.dtype)


def linear_tiled(h, w, b):
    rows, d = h.shape
    _, v_pad = w.shape
    tm = rows if rows <= 256 else 256      # rows is always a multiple of 8
    tn = v_pad if v_pad <= 512 else 512    # v_pad is always a multiple of 128
    grid = (pl.cdiv(rows, tm), pl.cdiv(v_pad, tn))
    return pl.pallas_call(
        _linear_kernel,
        out_shape=jax.ShapeDtypeStruct((rows, v_pad), jnp.float32),
        grid=grid,
        in_specs=[
            pl.BlockSpec((tm, d), lambda i, j: (i, 0)),
            pl.BlockSpec((d, tn), lambda i, j: (0, j)),
            pl.BlockSpec((1, tn), lambda i, j: (0, j)),
        ],
        out_specs=pl.BlockSpec((tm, tn), lambda i, j: (i, j)),
        compiler_params=pltpu.CompilerParams(
            dimension_semantics=("parallel", "parallel")),
    )(h, w, b)


# ----------------------------------------------------------------------------
# Parameter init (PyTorch-default-like) and one-time prepare (pad/transpose/bf16)
# ----------------------------------------------------------------------------
def init_params(key, embed_size, hidden_size, vocab_size, num_layers):
    params = {}
    k_embed, key = jax.random.split(key)
    params["embed"] = jax.random.normal(k_embed, (vocab_size, embed_size), jnp.float32)

    bound = 1.0 / jnp.sqrt(hidden_size)
    lstm = []
    in_sz = embed_size
    for _ in range(num_layers):
        k1, k2, k3, k4, key = jax.random.split(key, 5)
        lstm.append({
            "w_ih": jax.random.uniform(k1, (4 * hidden_size, in_sz), jnp.float32, -bound, bound),
            "w_hh": jax.random.uniform(k2, (4 * hidden_size, hidden_size), jnp.float32, -bound, bound),
            "b_ih": jax.random.uniform(k3, (4 * hidden_size,), jnp.float32, -bound, bound),
            "b_hh": jax.random.uniform(k4, (4 * hidden_size,), jnp.float32, -bound, bound),
        })
        in_sz = hidden_size
    params["lstm"] = lstm

    k5, k6, key = jax.random.split(key, 3)
    params["lin_w"] = jax.random.uniform(k5, (vocab_size, hidden_size), jnp.float32, -bound, bound)
    params["lin_b"] = jax.random.uniform(k6, (vocab_size,), jnp.float32, -bound, bound)
    return params


def _pad_gate_weight(w, hidden, d):
    """PyTorch (4H, in) gate-stacked weight -> (d, 4d), zero-padded per gate, transposed."""
    _, in_dim = w.shape
    w4 = w.reshape(4, hidden, in_dim)
    w4 = jnp.pad(w4, ((0, 0), (0, d - hidden), (0, d - in_dim)))
    return w4.reshape(4 * d, d).T


def _pad_gate_bias(b, hidden, d):
    return jnp.pad(b.reshape(4, hidden), ((0, 0), (0, d - hidden))).reshape(1, 4 * d)


def prepare_params(params):
    """Pad to (8,128)-friendly shapes, pre-transpose, pre-combine biases, bf16 weights.

    Padding is exact: zero-padded W/b give f=i=o=0.5, g=0, so padded c/h/logit lanes
    stay identically zero (also exact in bf16).
    """
    vocab_size, embed_size = params["embed"].shape
    hidden_size = params["lstm"][0]["w_hh"].shape[1]
    d = max(_round_up(embed_size, 128), _round_up(hidden_size, 128))
    v_pad = _round_up(vocab_size, 128)

    wih, whh, bias = [], [], []
    for layer in params["lstm"]:
        wih.append(_pad_gate_weight(layer["w_ih"], hidden_size, d).astype(jnp.bfloat16))
        whh.append(_pad_gate_weight(layer["w_hh"], hidden_size, d).astype(jnp.bfloat16))
        bias.append(_pad_gate_bias(layer["b_ih"] + layer["b_hh"], hidden_size, d))

    lin_w = jnp.pad(params["lin_w"], ((0, v_pad - vocab_size), (0, d - hidden_size)))
    lin_b = jnp.pad(params["lin_b"], (0, v_pad - vocab_size))

    return {
        # Embedding table stored padded + bf16: halves DMA/VMEM for x, no in-kernel cast.
        "embed": jnp.pad(params["embed"], ((0, 0), (0, d - embed_size))).astype(jnp.bfloat16),
        "wih": jnp.stack(wih),                       # (L, D, 4D) bf16
        "whh": jnp.stack(whh),                       # (L, D, 4D) bf16
        "bias": jnp.stack(bias),                     # (L, 1, 4D) f32
        "lin_w": lin_w.T.astype(jnp.bfloat16),       # (D, Vp)    bf16
        "lin_b": lin_b.reshape(1, v_pad),            # (1, Vp)    f32
    }


# ----------------------------------------------------------------------------
# Forward (glue: embedding gather + padding + two Pallas calls + final slice)
# ----------------------------------------------------------------------------
@functools.partial(jax.jit, static_argnames=("vocab_size",))
def decoder_rnn_forward(prepared, features, captions, *, vocab_size):
    """features: (B, E) f32, captions: (T, B) int32 -> (T+1, B, V) f32."""
    b, e = features.shape
    d = prepared["embed"].shape[1]
    b_pad = _round_up(b, 8)

    feat_p = jnp.pad(features, ((0, b_pad - b), (0, d - e))).astype(jnp.bfloat16)
    cap_p = jnp.pad(captions, ((0, 0), (0, b_pad - b)))             # (T, Bp)

    # Embedding lookup (bf16 table); dropout is eval-mode identity.
    emb = jnp.take(prepared["embed"], cap_p, axis=0)                # (T, Bp, D) bf16
    x = jnp.concatenate([feat_p[None], emb], axis=0)                # (T+1, Bp, D) bf16

    hseq = lstm_stack(x, prepared["wih"], prepared["whh"], prepared["bias"])
    t1 = hseq.shape[0]
    logits = linear_tiled(hseq.reshape(t1 * b_pad, d),
                          prepared["lin_w"], prepared["lin_b"])     # (T1*Bp, Vp) f32
    logits = logits.reshape(t1, b_pad, -1)
    return logits[:, :b, :vocab_size]


# ----------------------------------------------------------------------------
# Pure-JAX reference for correctness
# ----------------------------------------------------------------------------
def decoder_rnn_reference(params, features, captions):
    emb = jnp.take(params["embed"], captions, axis=0)               # (T, B, E)
    x = jnp.concatenate([features[None], emb], axis=0)              # (T+1, B, E)
    hidden = params["lstm"][0]["w_hh"].shape[1]
    batch = x.shape[1]
    for layer in params["lstm"]:
        w_ih, w_hh = layer["w_ih"], layer["w_hh"]
        bias = layer["b_ih"] + layer["b_hh"]

        def step(carry, x_t, w_ih=w_ih, w_hh=w_hh, bias=bias):
            h, c = carry
            gates = x_t @ w_ih.T + h @ w_hh.T + bias
            i_g, f_g, g_g, o_g = jnp.split(gates, 4, axis=-1)
            c = jax.nn.sigmoid(f_g) * c + jax.nn.sigmoid(i_g) * jnp.tanh(g_g)
            h = jax.nn.sigmoid(o_g) * jnp.tanh(c)
            return (h, c), h

        init = (jnp.zeros((batch, hidden), jnp.float32),
                jnp.zeros((batch, hidden), jnp.float32))
        _, x = jax.lax.scan(step, init, x)
    return x @ params["lin_w"].T + params["lin_b"]


if __name__ == "__main__":
    embed_size = 32
    hidden_size = 32
    vocab_size = 64
    num_layers = 2
    seq_len = 8
    batch = 2

    key = jax.random.PRNGKey(0)
    k_params, k_feat, k_cap = jax.random.split(key, 3)

    params = init_params(k_params, embed_size, hidden_size, vocab_size, num_layers)
    prepared = prepare_params(params)

    features = jax.random.normal(k_feat, (batch, embed_size), jnp.float32)
    captions = jax.random.randint(k_cap, (seq_len, batch), 0, vocab_size, jnp.int32)

    out = decoder_rnn_forward(prepared, features, captions, vocab_size=vocab_size)
    out = jax.block_until_ready(out)
    assert out.shape == (seq_len + 1, batch, vocab_size), out.shape
    assert bool(jnp.all(jnp.isfinite(out)))

    ref = decoder_rnn_reference(params, features, captions)
    max_err = float(jnp.max(jnp.abs(out - ref)))
    assert max_err < 5e-2, f"max abs error vs reference: {max_err}"

    print("KERNEL_OK")
</pallas_src>

<mosaic_0001>
module attributes {stable_mosaic.version = 11 : i64} {
  func.func @_lstm_stack_kernel(%arg0: memref<9x8x128xbf16, #tpu.memory_space<vmem>>, %arg1: memref<2x128x512xbf16, #tpu.memory_space<vmem>>, %arg2: memref<2x128x512xbf16, #tpu.memory_space<vmem>>, %arg3: memref<2x1x512xf32, #tpu.memory_space<vmem>>, %arg4: memref<9x8x128xbf16, #tpu.memory_space<vmem>>, %arg5: memref<9x8x512xf32, #tpu.memory_space<vmem>>) attributes {dimension_semantics = [], scalar_prefetch = 0 : i64, scratch_operands = 1 : i64, tpu.core_type = #tpu.core_type<tc>} {
    %c0 = arith.constant 0 : index
    %c0_0 = arith.constant 0 : index
    %c0_1 = arith.constant 0 : index
    %0 = vector.load %arg0[%c0, %c0_0, %c0_1] : memref<9x8x128xbf16, #tpu.memory_space<vmem>>, vector<9x8x128xbf16>
    %1 = vector.shape_cast %0 : vector<9x8x128xbf16> to vector<72x128xbf16>
    %c0_2 = arith.constant 0 : index
    %c0_3 = arith.constant 0 : index
    %c0_4 = arith.constant 0 : index
    %2 = vector.load %arg1[%c0_2, %c0_3, %c0_4] : memref<2x128x512xbf16, #tpu.memory_space<vmem>>, vector<1x128x512xbf16>
    %3 = vector.shape_cast %2 : vector<1x128x512xbf16> to vector<128x512xbf16>
    %cst = arith.constant dense<0.000000e+00> : vector<72x512xf32>
    %4 = tpu.matmul %1, %3, %cst {dimension_numbers = #tpu.dot_dimension_numbers<[1], [0], [0], [1], [0, 0, 1, 1], [], []>} : vector<72x128xbf16>, vector<128x512xbf16>, vector<72x512xf32> -> vector<72x512xf32>
    %c0_5 = arith.constant 0 : index
    %c0_6 = arith.constant 0 : index
    %c0_7 = arith.constant 0 : index
    %5 = vector.load %arg3[%c0_5, %c0_6, %c0_7] : memref<2x1x512xf32, #tpu.memory_space<vmem>>, vector<1x1x512xf32>
    %6 = vector.shape_cast %5 : vector<1x1x512xf32> to vector<1x512xf32>
    %7 = vector.broadcast %6 : vector<1x512xf32> to vector<72x512xf32>
    %8 = arith.addf %4, %7 : vector<72x512xf32>
    %9 = vector.shape_cast %8 : vector<72x512xf32> to vector<9x8x512xf32>
    %c0_8 = arith.constant 0 : index
    %c0_9 = arith.constant 0 : index
    %c0_10 = arith.constant 0 : index
    %10 = vector.load %arg5[%c0_8, %c0_9, %c0_10] : memref<9x8x512xf32, #tpu.memory_space<vmem>>, vector<9x8x512xf32>
    tpu.vector_store %arg5[%c0_8, %c0_9, %c0_10], %9 {strides = array<i32>} : memref<9x8x512xf32, #tpu.memory_space<vmem>>, vector<9x8x512xf32>,
    %c0_11 = arith.constant 0 : index
    %c0_12 = arith.constant 0 : index
    %c0_13 = arith.constant 0 : index
    %11 = vector.load %arg2[%c0_11, %c0_12, %c0_13] : memref<2x128x512xbf16, #tpu.memory_space<vmem>>, vector<1x128x512xbf16>
    %12 = vector.shape_cast %11 : vector<1x128x512xbf16> to vector<128x512xbf16>
    %cst_14 = arith.constant 0.000000e+00 : bf16
    %13 = vector.broadcast %cst_14 : bf16 to vector<8x128xbf16>
    %cst_15 = arith.constant 0.000000e+00 : f32
    %14 = vector.broadcast %cst_15 : f32 to vector<8x128xf32>
    %c0_i32 = arith.constant 0 : i32
    %15 = arith.index_cast %c0_i32 : i32 to index
    %c0_16 = arith.constant 0 : index
    %c0_17 = arith.constant 0 : index
    %16 = vector.load %arg5[%15, %c0_16, %c0_17] : memref<9x8x512xf32, #tpu.memory_space<vmem>>, vector<1x8x512xf32>
    %17 = vector.shape_cast %16 : vector<1x8x512xf32> to vector<8x512xf32>
    %cst_18 = arith.constant dense<0.000000e+00> : vector<8x512xf32>
    %18 = tpu.matmul %13, %12, %cst_18 {dimension_numbers = #tpu.dot_dimension_numbers<[1], [0], [0], [1], [0, 0, 1, 1], [], []>} : vector<8x128xbf16>, vector<128x512xbf16>, vector<8x512xf32> -> vector<8x512xf32>
    %19 = arith.addf %17, %18 : vector<8x512xf32>
    %20 = vector.extract_strided_slice %19 {offsets = [0, 0], sizes = [8, 128], strides = [1, 1]} : vector<8x512xf32> to vector<8x128xf32>
    %21 = arith.negf %20 : vector<8x128xf32>
    %22 = math.exp %21 : vector<8x128xf32>
    %cst_19 = arith.constant 1.000000e+00 : f32
    %23 = vector.broadcast %cst_19 : f32 to vector<8x128xf32>
    %24 = arith.addf %23, %22 : vector<8x128xf32>
    %25 = arith.divf %23, %24 : vector<8x128xf32>
    %26 = vector.extract_strided_slice %19 {offsets = [0, 128], sizes = [8, 128], strides = [1, 1]} : vector<8x512xf32> to vector<8x128xf32>
    %27 = arith.negf %26 : vector<8x128xf32>
    %28 = math.exp %27 : vector<8x128xf32>
    %cst_20 = arith.constant 1.000000e+00 : f32
    %29 = vector.broadcast %cst_20 : f32 to vector<8x128xf32>
    %30 = arith.addf %29, %28 : vector<8x128xf32>
    %31 = arith.divf %29, %30 : vector<8x128xf32>
    %32 = vector.extract_strided_slice %19 {offsets = [0, 256], sizes = [8, 128], strides = [1, 1]} : vector<8x512xf32> to vector<8x128xf32>
    %33 = math.tanh %32 : vector<8x128xf32>
    %34 = vector.extract_strided_slice %19 {offsets = [0, 384], sizes = [8, 128], strides = [1, 1]} : vector<8x512xf32> to vector<8x128xf32>
    %35 = arith.negf %34 : vector<8x128xf32>
    %36 = math.exp %35 : vector<8x128xf32>
    %cst_21 = arith.constant 1.000000e+00 : f32
    %37 = vector.broadcast %cst_21 : f32 to vector<8x128xf32>
    %38 = arith.addf %37, %36 : vector<8x128xf32>
    %39 = arith.divf %37, %38 : vector<8x128xf32>
    %40 = arith.mulf %31, %14 : vector<8x128xf32>
    %41 = arith.mulf %25, %33 : vector<8x128xf32>
    %42 = arith.addf %40, %41 : vector<8x128xf32>
    %43 = math.tanh %42 : vector<8x128xf32>
    %44 = arith.mulf %39, %43 : vector<8x128xf32>
    %45 = arith.truncf %44 : vector<8x128xf32> to vector<8x128xbf16>
    %46 = arith.index_cast %c0_i32 : i32 to index
    %c0_22 = arith.constant 0 : index
    %c0_23 = arith.constant 0 : index
    %47 = vector.load %arg4[%46, %c0_22, %c0_23] : memref<9x8x128xbf16, #tpu.memory_space<vmem>>, vector<1x8x128xbf16>
    %48 = vector.shape_cast %47 : vector<1x8x128xbf16> to vector<8x128xbf16>
    %49 = vector.shape_cast %45 : vector<8x128xbf16> to vector<1x8x128xbf16>
    tpu.vector_store %arg4[%46, %c0_22, %c0_23], %49 {strides = array<i32>} : memref<9x8x128xbf16, #tpu.memory_space<vmem>>, vector<1x8x128xbf16>,
    %c1_i32 = arith.constant 1 : i32
    %50 = arith.index_cast %c1_i32 : i32 to index
    %c0_24 = arith.constant 0 : index
    %c0_25 = arith.constant 0 : index
    %51 = vector.load %arg5[%50, %c0_24, %c0_25] : memref<9x8x512xf32, #tpu.memory_space<vmem>>, vector<1x8x512xf32>
    %52 = vector.shape_cast %51 : vector<1x8x512xf32> to vector<8x512xf32>
    %cst_26 = arith.constant dense<0.000000e+00> : vector<8x512xf32>
    %53 = tpu.matmul %45, %12, %cst_26 {dimension_numbers = #tpu.dot_dimension_numbers<[1], [0], [0], [1], [0, 0, 1, 1], [], []>} : vector<8x128xbf16>, vector<128x512xbf16>, vector<8x512xf32> -> vector<8x512xf32>
    %54 = arith.addf %52, %53 : vector<8x512xf32>
    %55 = vector.extract_strided_slice %54 {offsets = [0, 0], sizes = [8, 128], strides = [1, 1]} : vector<8x512xf32> to vector<8x128xf32>
    %56 = arith.negf %55 : vector<8x128xf32>
    %57 = math.exp %56 : vector<8x128xf32>
    %cst_27 = arith.constant 1.000000e+00 : f32
    %58 = vector.broadcast %cst_27 : f32 to vector<8x128xf32>
    %59 = arith.addf %58, %57 : vector<8x128xf32>
    %60 = arith.divf %58, %59 : vector<8x128xf32>
    %61 = vector.extract_strided_slice %54 {offsets = [0, 128], sizes = [8, 128], strides = [1, 1]} : vector<8x512xf32> to vector<8x128xf32>
    %62 = arith.negf %61 : vector<8x128xf32>
    %63 = math.exp %62 : vector<8x128xf32>
    %cst_28 = arith.constant 1.000000e+00 : f32
    %64 = vector.broadcast %cst_28 : f32 to vector<8x128xf32>
    %65 = arith.addf %64, %63 : vector<8x128xf32>
    %66 = arith.divf %64, %65 : vector<8x128xf32>
    %67 = vector.extract_strided_slice %54 {offsets = [0, 256], sizes = [8, 128], strides = [1, 1]} : vector<8x512xf32> to vector<8x128xf32>
    %68 = math.tanh %67 : vector<8x128xf32>
    %69 = vector.extract_strided_slice %54 {offsets = [0, 384], sizes = [8, 128], strides = [1, 1]} : vector<8x512xf32> to vector<8x128xf32>
    %70 = arith.negf %69 : vector<8x128xf32>
    %71 = math.exp %70 : vector<8x128xf32>
    %cst_29 = arith.constant 1.000000e+00 : f32
    %72 = vector.broadcast %cst_29 : f32 to vector<8x128xf32>
    %73 = arith.addf %72, %71 : vector<8x128xf32>
    %74 = arith.divf %72, %73 : vector<8x128xf32>
    %75 = arith.mulf %66, %42 : vector<8x128xf32>
    %76 = arith.mulf %60, %68 : vector<8x128xf32>
    %77 = arith.addf %75, %76 : vector<8x128xf32>
    %78 = math.tanh %77 : vector<8x128xf32>
    %79 = arith.mulf %74, %78 : vector<8x128xf32>
    %80 = arith.truncf %79 : vector<8x128xf32> to vector<8x128xbf16>
    %81 = arith.index_cast %c1_i32 : i32 to index
    %c0_30 = arith.constant 0 : index
    %c0_31 = arith.constant 0 : index
    %82 = vector.load %arg4[%81, %c0_30, %c0_31] : memref<9x8x128xbf16, #tpu.memory_space<vmem>>, vector<1x8x128xbf16>
    %83 = vector.shape_cast %82 : vector<1x8x128xbf16> to vector<8x128xbf16>
    %84 = vector.shape_cast %80 : vector<8x128xbf16> to vector<1x8x128xbf16>
    tpu.vector_store %arg4[%81, %c0_30, %c0_31], %84 {strides = array<i32>} : memref<9x8x128xbf16, #tpu.memory_space<vmem>>, vector<1x8x128xbf16>,
    %c2_i32 = arith.constant 2 : i32
    %85 = arith.index_cast %c2_i32 : i32 to index
    %c0_32 = arith.constant 0 : index
    %c0_33 = arith.constant 0 : index
    %86 = vector.load %arg5[%85, %c0_32, %c0_33] : memref<9x8x512xf32, #tpu.memory_space<vmem>>, vector<1x8x512xf32>
    %87 = vector.shape_cast %86 : vector<1x8x512xf32> to vector<8x512xf32>
    %cst_34 = arith.constant dense<0.000000e+00> : vector<8x512xf32>
    %88 = tpu.matmul %80, %12, %cst_34 {dimension_numbers = #tpu.dot_dimension_numbers<[1], [0], [0], [1], [0, 0, 1, 1], [], []>} : vector<8x128xbf16>, vector<128x512xbf16>, vector<8x512xf32> -> vector<8x512xf32>
    %89 = arith.addf %87, %88 : vector<8x512xf32>
    %90 = vector.extract_strided_slice %89 {offsets = [0, 0], sizes = [8, 128], strides = [1, 1]} : vector<8x512xf32> to vector<8x128xf32>
    %91 = arith.negf %90 : vector<8x128xf32>
    %92 = math.exp %91 : vector<8x128xf32>
    %cst_35 = arith.constant 1.000000e+00 : f32
    %93 = vector.broadcast %cst_35 : f32 to vector<8x128xf32>
    %94 = arith.addf %93, %92 : vector<8x128xf32>
    %95 = arith.divf %93, %94 : vector<8x128xf32>
    %96 = vector.extract_strided_slice %89 {offsets = [0, 128], sizes = [8, 128], strides = [1, 1]} : vector<8x512xf32> to vector<8x128xf32>
    %97 = arith.negf %96 : vector<8x128xf32>
    %98 = math.exp %97 : vector<8x128xf32>
    %cst_36 = arith.constant 1.000000e+00 : f32
    %99 = vector.broadcast %cst_36 : f32 to vector<8x128xf32>
    %100 = arith.addf %99, %98 : vector<8x128xf32>
    %101 = arith.divf %99, %100 : vector<8x128xf32>
    %102 = vector.extract_strided_slice %89 {offsets = [0, 256], sizes = [8, 128], strides = [1, 1]} : vector<8x512xf32> to vector<8x128xf32>
    %103 = math.tanh %102 : vector<8x128xf32>
    %104 = vector.extract_strided_slice %89 {offsets = [0, 384], sizes = [8, 128], strides = [1, 1]} : vector<8x512xf32> to vector<8x128xf32>
    %105 = arith.negf %104 : vector<8x128xf32>
    %106 = math.exp %105 : vector<8x128xf32>
    %cst_37 = arith.constant 1.000000e+00 : f32
    %107 = vector.broadcast %cst_37 : f32 to vector<8x128xf32>
    %108 = arith.addf %107, %106 : vector<8x128xf32>
    %109 = arith.divf %107, %108 : vector<8x128xf32>
    %110 = arith.mulf %101, %77 : vector<8x128xf32>
    %111 = arith.mulf %95, %103 : vector<8x128xf32>
    %112 = arith.addf %110, %111 : vector<8x128xf32>
    %113 = math.tanh %112 : vector<8x128xf32>
    %114 = arith.mulf %109, %113 : vector<8x128xf32>
    %115 = arith.truncf %114 : vector<8x128xf32> to vector<8x128xbf16>
    %116 = arith.index_cast %c2_i32 : i32 to index
    %c0_38 = arith.constant 0 : index
    %c0_39 = arith.constant 0 : index
    %117 = vector.load %arg4[%116, %c0_38, %c0_39] : memref<9x8x128xbf16, #tpu.memory_space<vmem>>, vector<1x8x128xbf16>
    %118 = vector.shape_cast %117 : vector<1x8x128xbf16> to vector<8x128xbf16>
    %119 = vector.shape_cast %115 : vector<8x128xbf16> to vector<1x8x128xbf16>
    tpu.vector_store %arg4[%116, %c0_38, %c0_39], %119 {strides = array<i32>} : memref<9x8x128xbf16, #tpu.memory_space<vmem>>, vector<1x8x128xbf16>,
    %c3_i32 = arith.constant 3 : i32
    %120 = arith.index_cast %c3_i32 : i32 to index
    %c0_40 = arith.constant 0 : index
    %c0_41 = arith.constant 0 : index
    %121 = vector.load %arg5[%120, %c0_40, %c0_41] : memref<9x8x512xf32, #tpu.memory_space<vmem>>, vector<1x8x512xf32>
    %122 = vector.shape_cast %121 : vector<1x8x512xf32> to vector<8x512xf32>
    %cst_42 = arith.constant dense<0.000000e+00> : vector<8x512xf32>
    %123 = tpu.matmul %115, %12, %cst_42 {dimension_numbers = #tpu.dot_dimension_numbers<[1], [0], [0], [1], [0, 0, 1, 1], [], []>} : vector<8x128xbf16>, vector<128x512xbf16>, vector<8x512xf32> -> vector<8x512xf32>
    %124 = arith.addf %122, %123 : vector<8x512xf32>
    %125 = vector.extract_strided_slice %124 {offsets = [0, 0], sizes = [8, 128], strides = [1, 1]} : vector<8x512xf32> to vector<8x128xf32>
    %126 = arith.negf %125 : vector<8x128xf32>
    %127 = math.exp %126 : vector<8x128xf32>
    %cst_43 = arith.constant 1.000000e+00 : f32
    %128 = vector.broadcast %cst_43 : f32 to vector<8x128xf32>
    %129 = arith.addf %128, %127 : vector<8x128xf32>
    %130 = arith.divf %128, %129 : vector<8x128xf32>
    %131 = vector.extract_strided_slice %124 {offsets = [0, 128], sizes = [8, 128], strides = [1, 1]} : vector<8x512xf32> to vector<8x128xf32>
    %132 = arith.negf %131 : vector<8x128xf32>
    %133 = math.exp %132 : vector<8x128xf32>
    %cst_44 = arith.constant 1.000000e+00 : f32
    %134 = vector.broadcast %cst_44 : f32 to vector<8x128xf32>
    %135 = arith.addf %134, %133 : vector<8x128xf32>
    %136 = arith.divf %134, %135 : vector<8x128xf32>
    %137 = vector.extract_strided_slice %124 {offsets = [0, 256], sizes = [8, 128], strides = [1, 1]} : vector<8x512xf32> to vector<8x128xf32>
    %138 = math.tanh %137 : vector<8x128xf32>
    %139 = vector.extract_strided_slice %124 {offsets = [0, 384], sizes = [8, 128], strides = [1, 1]} : vector<8x512xf32> to vector<8x128xf32>
    %140 = arith.negf %139 : vector<8x128xf32>
    %141 = math.exp %140 : vector<8x128xf32>
    %cst_45 = arith.constant 1.000000e+00 : f32
    %142 = vector.broadcast %cst_45 : f32 to vector<8x128xf32>
    %143 = arith.addf %142, %141 : vector<8x128xf32>
    %144 = arith.divf %142, %143 : vector<8x128xf32>
    %145 = arith.mulf %136, %112 : vector<8x128xf32>
    %146 = arith.mulf %130, %138 : vector<8x128xf32>
    %147 = arith.addf %145, %146 : vector<8x128xf32>
    %148 = math.tanh %147 : vector<8x128xf32>
    %149 = arith.mulf %144, %148 : vector<8x128xf32>
    %150 = arith.truncf %149 : vector<8x128xf32> to vector<8x128xbf16>
    %151 = arith.index_cast %c3_i32 : i32 to index
    %c0_46 = arith.constant 0 : index
    %c0_47 = arith.constant 0 : index
    %152 = vector.load %arg4[%151, %c0_46, %c0_47] : memref<9x8x128xbf16, #tpu.memory_space<vmem>>, vector<1x8x128xbf16>
    %153 = vector.shape_cast %152 : vector<1x8x128xbf16> to vector<8x128xbf16>
    %154 = vector.shape_cast %150 : vector<8x128xbf16> to vector<1x8x128xbf16>
    tpu.vector_store %arg4[%151, %c0_46, %c0_47], %154 {strides = array<i32>} : memref<9x8x128xbf16, #tpu.memory_space<vmem>>, vector<1x8x128xbf16>,
    %c4_i32 = arith.constant 4 : i32
    %155 = arith.index_cast %c4_i32 : i32 to index
    %c0_48 = arith.constant 0 : index
    %c0_49 = arith.constant 0 : index
    %156 = vector.load %arg5[%155, %c0_48, %c0_49] : memref<9x8x512xf32, #tpu.memory_space<vmem>>, vector<1x8x512xf32>
    %157 = vector.shape_cast %156 : vector<1x8x512xf32> to vector<8x512xf32>
    %cst_50 = arith.constant dense<0.000000e+00> : vector<8x512xf32>
    %158 = tpu.matmul %150, %12, %cst_50 {dimension_numbers = #tpu.dot_dimension_numbers<[1], [0], [0], [1], [0, 0, 1, 1], [], []>} : vector<8x128xbf16>, vector<128x512xbf16>, vector<8x512xf32> -> vector<8x512xf32>
    %159 = arith.addf %157, %158 : vector<8x512xf32>
    %160 = vector.extract_strided_slice %159 {offsets = [0, 0], sizes = [8, 128], strides = [1, 1]} : vector<8x512xf32> to vector<8x128xf32>
    %161 = arith.negf %160 : vector<8x128xf32>
    %162 = math.exp %161 : vector<8x128xf32>
    %cst_51 = arith.constant 1.000000e+00 : f32
    %163 = vector.broadcast %cst_51 : f32 to vector<8x128xf32>
    %164 = arith.addf %163, %162 : vector<8x128xf32>
    %165 = arith.divf %163, %164 : vector<8x128xf32>
    %166 = vector.extract_strided_slice %159 {offsets = [0, 128], sizes = [8, 128], strides = [1, 1]} : vector<8x512xf32> to vector<8x128xf32>
    %167 = arith.negf %166 : vector<8x128xf32>
    %168 = math.exp %167 : vector<8x128xf32>
    %cst_52 = arith.constant 1.000000e+00 : f32
    %169 = vector.broadcast %cst_52 : f32 to vector<8x128xf32>
    %170 = arith.addf %169, %168 : vector<8x128xf32>
    %171 = arith.divf %169, %170 : vector<8x128xf32>
    %172 = vector.extract_strided_slice %159 {offsets = [0, 256], sizes = [8, 128], strides = [1, 1]} : vector<8x512xf32> to vector<8x128xf32>
    %173 = math.tanh %172 : vector<8x128xf32>
    %174 = vector.extract_strided_slice %159 {offsets = [0, 384], sizes = [8, 128], strides = [1, 1]} : vector<8x512xf32> to vector<8x128xf32>
    %175 = arith.negf %174 : vector<8x128xf32>
    %176 = math.exp %175 : vector<8x128xf32>
    %cst_53 = arith.constant 1.000000e+00 : f32
    %177 = vector.broadcast %cst_53 : f32 to vector<8x128xf32>
    %178 = arith.addf %177, %176 : vector<8x128xf32>
    %179 = arith.divf %177, %178 : vector<8x128xf32>
    %180 = arith.mulf %171, %147 : vector<8x128xf32>
    %181 = arith.mulf %165, %173 : vector<8x128xf32>
    %182 = arith.addf %180, %181 : vector<8x128xf32>
    %183 = math.tanh %182 : vector<8x128xf32>
    %184 = arith.mulf %179, %183 : vector<8x128xf32>
    %185 = arith.truncf %184 : vector<8x128xf32> to vector<8x128xbf16>
    %186 = arith.index_cast %c4_i32 : i32 to index
    %c0_54 = arith.constant 0 : index
    %c0_55 = arith.constant 0 : index
    %187 = vector.load %arg4[%186, %c0_54, %c0_55] : memref<9x8x128xbf16, #tpu.memory_space<vmem>>, vector<1x8x128xbf16>
    %188 = vector.shape_cast %187 : vector<1x8x128xbf16> to vector<8x128xbf16>
    %189 = vector.shape_cast %185 : vector<8x128xbf16> to vector<1x8x128xbf16>
    tpu.vector_store %arg4[%186, %c0_54, %c0_55], %189 {strides = array<i32>} : memref<9x8x128xbf16, #tpu.memory_space<vmem>>, vector<1x8x128xbf16>,
    %c5_i32 = arith.constant 5 : i32
    %190 = arith.index_cast %c5_i32 : i32 to index
    %c0_56 = arith.constant 0 : index
    %c0_57 = arith.constant 0 : index
    %191 = vector.load %arg5[%190, %c0_56, %c0_57] : memref<9x8x512xf32, #tpu.memory_space<vmem>>, vector<1x8x512xf32>
    %192 = vector.shape_cast %191 : vector<1x8x512xf32> to vector<8x512xf32>
    %cst_58 = arith.constant dense<0.000000e+00> : vector<8x512xf32>
    %193 = tpu.matmul %185, %12, %cst_58 {dimension_numbers = #tpu.dot_dimension_numbers<[1], [0], [0], [1], [0, 0, 1, 1], [], []>} : vector<8x128xbf16>, vector<128x512xbf16>, vector<8x512xf32> -> vector<8x512xf32>
    %194 = arith.addf %192, %193 : vector<8x512xf32>
    %195 = vector.extract_strided_slice %194 {offsets = [0, 0], sizes = [8, 128], strides = [1, 1]} : vector<8x512xf32> to vector<8x128xf32>
    %196 = arith.negf %195 : vector<8x128xf32>
    %197 = math.exp %196 : vector<8x128xf32>
    %cst_59 = arith.constant 1.000000e+00 : f32
    %198 = vector.broadcast %cst_59 : f32 to vector<8x128xf32>
    %199 = arith.addf %198, %197 : vector<8x128xf32>
    %200 = arith.divf %198, %199 : vector<8x128xf32>
    %201 = vector.extract_strided_slice %194 {offsets = [0, 128], sizes = [8, 128], strides = [1, 1]} : vector<8x512xf32> to vector<8x128xf32>
    %202 = arith.negf %201 : vector<8x128xf32>
    %203 = math.exp %202 : vector<8x128xf32>
    %cst_60 = arith.constant 1.000000e+00 : f32
    %204 = vector.broadcast %cst_60 : f32 to vector<8x128xf32>
    %205 = arith.addf %204, %203 : vector<8x128xf32>
    %206 = arith.divf %204, %205 : vector<8x128xf32>
    %207 = vector.extract_strided_slice %194 {offsets = [0, 256], sizes = [8, 128], strides = [1, 1]} : vector<8x512xf32> to vector<8x128xf32>
    %208 = math.tanh %207 : vector<8x128xf32>
    %209 = vector.extract_strided_slice %194 {offsets = [0, 384], sizes = [8, 128], strides = [1, 1]} : vector<8x512xf32> to vector<8x128xf32>
    %210 = arith.negf %209 : vector<8x128xf32>
    %211 = math.exp %210 : vector<8x128xf32>
    %cst_61 = arith.constant 1.000000e+00 : f32
    %212 = vector.broadcast %cst_61 : f32 to vector<8x128xf32>
    %213 = arith.addf %212, %211 : vector<8x128xf32>
    %214 = arith.divf %212, %213 : vector<8x128xf32>
    %215 = arith.mulf %206, %182 : vector<8x128xf32>
    %216 = arith.mulf %200, %208 : vector<8x128xf32>
    %217 = arith.addf %215, %216 : vector<8x128xf32>
    %218 = math.tanh %217 : vector<8x128xf32>
    %219 = arith.mulf %214, %218 : vector<8x128xf32>
    %220 = arith.truncf %219 : vector<8x128xf32> to vector<8x128xbf16>
    %221 = arith.index_cast %c5_i32 : i32 to index
    %c0_62 = arith.constant 0 : index
    %c0_63 = arith.constant 0 : index
    %222 = vector.load %arg4[%221, %c0_62, %c0_63] : memref<9x8x128xbf16, #tpu.memory_space<vmem>>, vector<1x8x128xbf16>
    %223 = vector.shape_cast %222 : vector<1x8x128xbf16> to vector<8x128xbf16>
    %224 = vector.shape_cast %220 : vector<8x128xbf16> to vector<1x8x128xbf16>
    tpu.vector_store %arg4[%221, %c0_62, %c0_63], %224 {strides = array<i32>} : memref<9x8x128xbf16, #tpu.memory_space<vmem>>, vector<1x8x128xbf16>,
    %c6_i32 = arith.constant 6 : i32
    %225 = arith.index_cast %c6_i32 : i32 to index
    %c0_64 = arith.constant 0 : index
    %c0_65 = arith.constant 0 : index
    %226 = vector.load %arg5[%225, %c0_64, %c0_65] : memref<9x8x512xf32, #tpu.memory_space<vmem>>, vector<1x8x512xf32>
    %227 = vector.shape_cast %226 : vector<1x8x512xf32> to vector<8x512xf32>
    %cst_66 = arith.constant dense<0.000000e+00> : vector<8x512xf32>
    %228 = tpu.matmul %220, %12, %cst_66 {dimension_numbers = #tpu.dot_dimension_numbers<[1], [0], [0], [1], [0, 0, 1, 1], [], []>} : vector<8x128xbf16>, vector<128x512xbf16>, vector<8x512xf32> -> vector<8x512xf32>
    %229 = arith.addf %227, %228 : vector<8x512xf32>
    %230 = vector.extract_strided_slice %229 {offsets = [0, 0], sizes = [8, 128], strides = [1, 1]} : vector<8x512xf32> to vector<8x128xf32>
    %231 = arith.negf %230 : vector<8x128xf32>
    %232 = math.exp %231 : vector<8x128xf32>
    %cst_67 = arith.constant 1.000000e+00 : f32
    %233 = vector.broadcast %cst_67 : f32 to vector<8x128xf32>
    %234 = arith.addf %233, %232 : vector<8x128xf32>
    %235 = arith.divf %233, %234 : vector<8x128xf32>
    %236 = vector.extract_strided_slice %229 {offsets = [0, 128], sizes = [8, 128], strides = [1, 1]} : vector<8x512xf32> to vector<8x128xf32>
    %237 = arith.negf %236 : vector<8x128xf32>
    %238 = math.exp %237 : vector<8x128xf32>
    %cst_68 = arith.constant 1.000000e+00 : f32
    %239 = vector.broadcast %cst_68 : f32 to vector<8x128xf32>
    %240 = arith.addf %239, %238 : vector<8x128xf32>
    %241 = arith.divf %239, %240 : vector<8x128xf32>
    %242 = vector.extract_strided_slice %229 {offsets = [0, 256], sizes = [8, 128], strides = [1, 1]} : vector<8x512xf32> to vector<8x128xf32>
    %243 = math.tanh %242 : vector<8x128xf32>
    %244 = vector.extract_strided_slice %229 {offsets = [0, 384], sizes = [8, 128], strides = [1, 1]} : vector<8x512xf32> to vector<8x128xf32>
    %245 = arith.negf %244 : vector<8x128xf32>
    %246 = math.exp %245 : vector<8x128xf32>
    %cst_69 = arith.constant 1.000000e+00 : f32
    %247 = vector.broadcast %cst_69 : f32 to vector<8x128xf32>
    %248 = arith.addf %247, %246 : vector<8x128xf32>
    %249 = arith.divf %247, %248 : vector<8x128xf32>
    %250 = arith.mulf %241, %217 : vector<8x128xf32>
    %251 = arith.mulf %235, %243 : vector<8x128xf32>
    %252 = arith.addf %250, %251 : vector<8x128xf32>
    %253 = math.tanh %252 : vector<8x128xf32>
    %254 = arith.mulf %249, %253 : vector<8x128xf32>
    %255 = arith.truncf %254 : vector<8x128xf32> to vector<8x128xbf16>
    %256 = arith.index_cast %c6_i32 : i32 to index
    %c0_70 = arith.constant 0 : index
    %c0_71 = arith.constant 0 : index
    %257 = vector.load %arg4[%256, %c0_70, %c0_71] : memref<9x8x128xbf16, #tpu.memory_space<vmem>>, vector<1x8x128xbf16>
    %258 = vector.shape_cast %257 : vector<1x8x128xbf16> to vector<8x128xbf16>
    %259 = vector.shape_cast %255 : vector<8x128xbf16> to vector<1x8x128xbf16>
    tpu.vector_store %arg4[%256, %c0_70, %c0_71], %259 {strides = array<i32>} : memref<9x8x128xbf16, #tpu.memory_space<vmem>>, vector<1x8x128xbf16>,
    %c7_i32 = arith.constant 7 : i32
    %260 = arith.index_cast %c7_i32 : i32 to index
    %c0_72 = arith.constant 0 : index
    %c0_73 = arith.constant 0 : index
    %261 = vector.load %arg5[%260, %c0_72, %c0_73] : memref<9x8x512xf32, #tpu.memory_space<vmem>>, vector<1x8x512xf32>
    %262 = vector.shape_cast %261 : vector<1x8x512xf32> to vector<8x512xf32>
    %cst_74 = arith.constant dense<0.000000e+00> : vector<8x512xf32>
    %263 = tpu.matmul %255, %12, %cst_74 {dimension_numbers = #tpu.dot_dimension_numbers<[1], [0], [0], [1], [0, 0, 1, 1], [], []>} : vector<8x128xbf16>, vector<128x512xbf16>, vector<8x512xf32> -> vector<8x512xf32>
    %264 = arith.addf %262, %263 : vector<8x512xf32>
    %265 = vector.extract_strided_slice %264 {offsets = [0, 0], sizes = [8, 128], strides = [1, 1]} : vector<8x512xf32> to vector<8x128xf32>
    %266 = arith.negf %265 : vector<8x128xf32>
    %267 = math.exp %266 : vector<8x128xf32>
    %cst_75 = arith.constant 1.000000e+00 : f32
    %268 = vector.broadcast %cst_75 : f32 to vector<8x128xf32>
    %269 = arith.addf %268, %267 : vector<8x128xf32>
    %270 = arith.divf %268, %269 : vector<8x128xf32>
    %271 = vector.extract_strided_slice %264 {offsets = [0, 128], sizes = [8, 128], strides = [1, 1]} : vector<8x512xf32> to vector<8x128xf32>
    %272 = arith.negf %271 : vector<8x128xf32>
    %273 = math.exp %272 : vector<8x128xf32>
    %cst_76 = arith.constant 1.000000e+00 : f32
    %274 = vector.broadcast %cst_76 : f32 to vector<8x128xf32>
    %275 = arith.addf %274, %273 : vector<8x128xf32>
    %276 = arith.divf %274, %275 : vector<8x128xf32>
    %277 = vector.extract_strided_slice %264 {offsets = [0, 256], sizes = [8, 128], strides = [1, 1]} : vector<8x512xf32> to vector<8x128xf32>
    %278 = math.tanh %277 : vector<8x128xf32>
    %279 = vector.extract_strided_slice %264 {offsets = [0, 384], sizes = [8, 128], strides = [1, 1]} : vector<8x512xf32> to vector<8x128xf32>
    %280 = arith.negf %279 : vector<8x128xf32>
    %281 = math.exp %280 : vector<8x128xf32>
    %cst_77 = arith.constant 1.000000e+00 : f32
    %282 = vector.broadcast %cst_77 : f32 to vector<8x128xf32>
    %283 = arith.addf %282, %281 : vector<8x128xf32>
    %284 = arith.divf %282, %283 : vector<8x128xf32>
    %285 = arith.mulf %276, %252 : vector<8x128xf32>
    %286 = arith.mulf %270, %278 : vector<8x128xf32>
    %287 = arith.addf %285, %286 : vector<8x128xf32>
    %288 = math.tanh %287 : vector<8x128xf32>
    %289 = arith.mulf %284, %288 : vector<8x128xf32>
    %290 = arith.truncf %289 : vector<8x128xf32> to vector<8x128xbf16>
    %291 = arith.index_cast %c7_i32 : i32 to index
    %c0_78 = arith.constant 0 : index
    %c0_79 = arith.constant 0 : index
    %292 = vector.load %arg4[%291, %c0_78, %c0_79] : memref<9x8x128xbf16, #tpu.memory_space<vmem>>, vector<1x8x128xbf16>
    %293 = vector.shape_cast %292 : vector<1x8x128xbf16> to vector<8x128xbf16>
    %294 = vector.shape_cast %290 : vector<8x128xbf16> to vector<1x8x128xbf16>
    tpu.vector_store %arg4[%291, %c0_78, %c0_79], %294 {strides = array<i32>} : memref<9x8x128xbf16, #tpu.memory_space<vmem>>, vector<1x8x128xbf16>,
    %c8_i32 = arith.constant 8 : i32
    %295 = arith.index_cast %c8_i32 : i32 to index
    %c0_80 = arith.constant 0 : index
    %c0_81 = arith.constant 0 : index
    %296 = vector.load %arg5[%295, %c0_80, %c0_81] : memref<9x8x512xf32, #tpu.memory_space<vmem>>, vector<1x8x512xf32>
    %297 = vector.shape_cast %296 : vector<1x8x512xf32> to vector<8x512xf32>
    %cst_82 = arith.constant dense<0.000000e+00> : vector<8x512xf32>
    %298 = tpu.matmul %290, %12, %cst_82 {dimension_numbers = #tpu.dot_dimension_numbers<[1], [0], [0], [1], [0, 0, 1, 1], [], []>} : vector<8x128xbf16>, vector<128x512xbf16>, vector<8x512xf32> -> vector<8x512xf32>
    %299 = arith.addf %297, %298 : vector<8x512xf32>
    %300 = vector.extract_strided_slice %299 {offsets = [0, 0], sizes = [8, 128], strides = [1, 1]} : vector<8x512xf32> to vector<8x128xf32>
    %301 = arith.negf %300 : vector<8x128xf32>
    %302 = math.exp %301 : vector<8x128xf32>
    %cst_83 = arith.constant 1.000000e+00 : f32
    %303 = vector.broadcast %cst_83 : f32 to vector<8x128xf32>
    %304 = arith.addf %303, %302 : vector<8x128xf32>
    %305 = arith.divf %303, %304 : vector<8x128xf32>
    %306 = vector.extract_strided_slice %299 {offsets = [0, 128], sizes = [8, 128], strides = [1, 1]} : vector<8x512xf32> to vector<8x128xf32>
    %307 = arith.negf %306 : vector<8x128xf32>
    %308 = math.exp %307 : vector<8x128xf32>
    %cst_84 = arith.constant 1.000000e+00 : f32
    %309 = vector.broadcast %cst_84 : f32 to vector<8x128xf32>
    %310 = arith.addf %309, %308 : vector<8x128xf32>
    %311 = arith.divf %309, %310 : vector<8x128xf32>
    %312 = vector.extract_strided_slice %299 {offsets = [0, 256], sizes = [8, 128], strides = [1, 1]} : vector<8x512xf32> to vector<8x128xf32>
    %313 = math.tanh %312 : vector<8x128xf32>
    %314 = vector.extract_strided_slice %299 {offsets = [0, 384], sizes = [8, 128], strides = [1, 1]} : vector<8x512xf32> to vector<8x128xf32>
    %315 = arith.negf %314 : vector<8x128xf32>
    %316 = math.exp %315 : vector<8x128xf32>
    %cst_85 = arith.constant 1.000000e+00 : f32
    %317 = vector.broadcast %cst_85 : f32 to vector<8x128xf32>
    %318 = arith.addf %317, %316 : vector<8x128xf32>
    %319 = arith.divf %317, %318 : vector<8x128xf32>
    %320 = arith.mulf %311, %287 : vector<8x128xf32>
    %321 = arith.mulf %305, %313 : vector<8x128xf32>
    %322 = arith.addf %320, %321 : vector<8x128xf32>
    %323 = math.tanh %322 : vector<8x128xf32>
    %324 = arith.mulf %319, %323 : vector<8x128xf32>
    %325 = arith.truncf %324 : vector<8x128xf32> to vector<8x128xbf16>
    %326 = arith.index_cast %c8_i32 : i32 to index
    %c0_86 = arith.constant 0 : index
    %c0_87 = arith.constant 0 : index
    %327 = vector.load %arg4[%326, %c0_86, %c0_87] : memref<9x8x128xbf16, #tpu.memory_space<vmem>>, vector<1x8x128xbf16>
    %328 = vector.shape_cast %327 : vector<1x8x128xbf16> to vector<8x128xbf16>
    %329 = vector.shape_cast %325 : vector<8x128xbf16> to vector<1x8x128xbf16>
    tpu.vector_store %arg4[%326, %c0_86, %c0_87], %329 {strides = array<i32>} : memref<9x8x128xbf16, #tpu.memory_space<vmem>>, vector<1x8x128xbf16>,
    %c9_i32 = arith.constant 9 : i32
    %c0_88 = arith.constant 0 : index
    %c0_89 = arith.constant 0 : index
    %c0_90 = arith.constant 0 : index
    %330 = vector.load %arg4[%c0_88, %c0_89, %c0_90] : memref<9x8x128xbf16, #tpu.memory_space<vmem>>, vector<9x8x128xbf16>
    %331 = vector.shape_cast %330 : vector<9x8x128xbf16> to vector<72x128xbf16>
    %c1 = arith.constant 1 : index
    %c0_91 = arith.constant 0 : index
    %c0_92 = arith.constant 0 : index
    %332 = vector.load %arg1[%c1, %c0_91, %c0_92] : memref<2x128x512xbf16, #tpu.memory_space<vmem>>, vector<1x128x512xbf16>
    %333 = vector.shape_cast %332 : vector<1x128x512xbf16> to vector<128x512xbf16>
    %cst_93 = arith.constant dense<0.000000e+00> : vector<72x512xf32>
    %334 = tpu.matmul %331, %333, %cst_93 {dimension_numbers = #tpu.dot_dimension_numbers<[1], [0], [0], [1], [0, 0, 1, 1], [], []>} : vector<72x128xbf16>, vector<128x512xbf16>, vector<72x512xf32> -> vector<72x512xf32>
    %c1_94 = arith.constant 1 : index
    %c0_95 = arith.constant 0 : index
    %c0_96 = arith.constant 0 : index
    %335 = vector.load %arg3[%c1_94, %c0_95, %c0_96] : memref<2x1x512xf32, #tpu.memory_space<vmem>>, vector<1x1x512xf32>
    %336 = vector.shape_cast %335 : vector<1x1x512xf32> to vector<1x512xf32>
    %337 = vector.broadcast %336 : vector<1x512xf32> to vector<72x512xf32>
    %338 = arith.addf %334, %337 : vector<72x512xf32>
    %339 = vector.shape_cast %338 : vector<72x512xf32> to vector<9x8x512xf32>
    %c0_97 = arith.constant 0 : index
    %c0_98 = arith.constant 0 : index
    %c0_99 = arith.constant 0 : index
    %340 = vector.load %arg5[%c0_97, %c0_98, %c0_99] : memref<9x8x512xf32, #tpu.memory_space<vmem>>, vector<9x8x512xf32>
    tpu.vector_store %arg5[%c0_97, %c0_98, %c0_99], %339 {strides = array<i32>} : memref<9x8x512xf32, #tpu.memory_space<vmem>>, vector<9x8x512xf32>,
    %c1_100 = arith.constant 1 : index
    %c0_101 = arith.constant 0 : index
    %c0_102 = arith.constant 0 : index
    %341 = vector.load %arg2[%c1_100, %c0_101, %c0_102] : memref<2x128x512xbf16, #tpu.memory_space<vmem>>, vector<1x128x512xbf16>
    %342 = vector.shape_cast %341 : vector<1x128x512xbf16> to vector<128x512xbf16>
    %cst_103 = arith.constant 0.000000e+00 : bf16
    %343 = vector.broadcast %cst_103 : bf16 to vector<8x128xbf16>
    %cst_104 = arith.constant 0.000000e+00 : f32
    %344 = vector.broadcast %cst_104 : f32 to vector<8x128xf32>
    %c0_i32_105 = arith.constant 0 : i32
    %345 = arith.index_cast %c0_i32_105 : i32 to index
    %c0_106 = arith.constant 0 : index
    %c0_107 = arith.constant 0 : index
    %346 = vector.load %arg5[%345, %c0_106, %c0_107] : memref<9x8x512xf32, #tpu.memory_space<vmem>>, vector<1x8x512xf32>
    %347 = vector.shape_cast %346 : vector<1x8x512xf32> to vector<8x512xf32>
    %cst_108 = arith.constant dense<0.000000e+00> : vector<8x512xf32>
    %348 = tpu.matmul %343, %342, %cst_108 {dimension_numbers = #tpu.dot_dimension_numbers<[1], [0], [0], [1], [0, 0, 1, 1], [], []>} : vector<8x128xbf16>, vector<128x512xbf16>, vector<8x512xf32> -> vector<8x512xf32>
    %349 = arith.addf %347, %348 : vector<8x512xf32>
    %350 = vector.extract_strided_slice %349 {offsets = [0, 0], sizes = [8, 128], strides = [1, 1]} : vector<8x512xf32> to vector<8x128xf32>
    %351 = arith.negf %350 : vector<8x128xf32>
    %352 = math.exp %351 : vector<8x128xf32>
    %cst_109 = arith.constant 1.000000e+00 : f32
    %353 = vector.broadcast %cst_109 : f32 to vector<8x128xf32>
    %354 = arith.addf %353, %352 : vector<8x128xf32>
    %355 = arith.divf %353, %354 : vector<8x128xf32>
    %356 = vector.extract_strided_slice %349 {offsets = [0, 128], sizes = [8, 128], strides = [1, 1]} : vector<8x512xf32> to vector<8x128xf32>
    %357 = arith.negf %356 : vector<8x128xf32>
    %358 = math.exp %357 : vector<8x128xf32>
    %cst_110 = arith.constant 1.000000e+00 : f32
    %359 = vector.broadcast %cst_110 : f32 to vector<8x128xf32>
    %360 = arith.addf %359, %358 : vector<8x128xf32>
    %361 = arith.divf %359, %360 : vector<8x128xf32>
    %362 = vector.extract_strided_slice %349 {offsets = [0, 256], sizes = [8, 128], strides = [1, 1]} : vector<8x512xf32> to vector<8x128xf32>
    %363 = math.tanh %362 : vector<8x128xf32>
    %364 = vector.extract_strided_slice %349 {offsets = [0, 384], sizes = [8, 128], strides = [1, 1]} : vector<8x512xf32> to vector<8x128xf32>
    %365 = arith.negf %364 : vector<8x128xf32>
    %366 = math.exp %365 : vector<8x128xf32>
    %cst_111 = arith.constant 1.000000e+00 : f32
    %367 = vector.broadcast %cst_111 : f32 to vector<8x128xf32>
    %368 = arith.addf %367, %366 : vector<8x128xf32>
    %369 = arith.divf %367, %368 : vector<8x128xf32>
    %370 = arith.mulf %361, %344 : vector<8x128xf32>
    %371 = arith.mulf %355, %363 : vector<8x128xf32>
    %372 = arith.addf %370, %371 : vector<8x128xf32>
    %373 = math.tanh %372 : vector<8x128xf32>
    %374 = arith.mulf %369, %373 : vector<8x128xf32>
    %375 = arith.truncf %374 : vector<8x128xf32> to vector<8x128xbf16>
    %376 = arith.index_cast %c0_i32_105 : i32 to index
    %c0_112 = arith.constant 0 : index
    %c0_113 = arith.constant 0 : index
    %377 = vector.load %arg4[%376, %c0_112, %c0_113] : memref<9x8x128xbf16, #tpu.memory_space<vmem>>, vector<1x8x128xbf16>
    %378 = vector.shape_cast %377 : vector<1x8x128xbf16> to vector<8x128xbf16>
    %379 = vector.shape_cast %375 : vector<8x128xbf16> to vector<1x8x128xbf16>
    tpu.vector_store %arg4[%376, %c0_112, %c0_113], %379 {strides = array<i32>} : memref<9x8x128xbf16, #tpu.memory_space<vmem>>, vector<1x8x128xbf16>,
    %c1_i32_114 = arith.constant 1 : i32
    %380 = arith.index_cast %c1_i32_114 : i32 to index
    %c0_115 = arith.constant 0 : index
    %c0_116 = arith.constant 0 : index
    %381 = vector.load %arg5[%380, %c0_115, %c0_116] : memref<9x8x512xf32, #tpu.memory_space<vmem>>, vector<1x8x512xf32>
    %382 = vector.shape_cast %381 : vector<1x8x512xf32> to vector<8x512xf32>
    %cst_117 = arith.constant dense<0.000000e+00> : vector<8x512xf32>
    %383 = tpu.matmul %375, %342, %cst_117 {dimension_numbers = #tpu.dot_dimension_numbers<[1], [0], [0], [1], [0, 0, 1, 1], [], []>} : vector<8x128xbf16>, vector<128x512xbf16>, vector<8x512xf32> -> vector<8x512xf32>
    %384 = arith.addf %382, %383 : vector<8x512xf32>
    %385 = vector.extract_strided_slice %384 {offsets = [0, 0], sizes = [8, 128], strides = [1, 1]} : vector<8x512xf32> to vector<8x128xf32>
    %386 = arith.negf %385 : vector<8x128xf32>
    %387 = math.exp %386 : vector<8x128xf32>
    %cst_118 = arith.constant 1.000000e+00 : f32
    %388 = vector.broadcast %cst_118 : f32 to vector<8x128xf32>
    %389 = arith.addf %388, %387 : vector<8x128xf32>
    %390 = arith.divf %388, %389 : vector<8x128xf32>
    %391 = vector.extract_strided_slice %384 {offsets = [0, 128], sizes = [8, 128], strides = [1, 1]} : vector<8x512xf32> to vector<8x128xf32>
    %392 = arith.negf %391 : vector<8x128xf32>
    %393 = math.exp %392 : vector<8x128xf32>
    %cst_119 = arith.constant 1.000000e+00 : f32
    %394 = vector.broadcast %cst_119 : f32 to vector<8x128xf32>
    %395 = arith.addf %394, %393 : vector<8x128xf32>
    %396 = arith.divf %394, %395 : vector<8x128xf32>
    %397 = vector.extract_strided_slice %384 {offsets = [0, 256], sizes = [8, 128], strides = [1, 1]} : vector<8x512xf32> to vector<8x128xf32>
    %398 = math.tanh %397 : vector<8x128xf32>
    %399 = vector.extract_strided_slice %384 {offsets = [0, 384], sizes = [8, 128], strides = [1, 1]} : vector<8x512xf32> to vector<8x128xf32>
    %400 = arith.negf %399 : vector<8x128xf32>
    %401 = math.exp %400 : vector<8x128xf32>
    %cst_120 = arith.constant 1.000000e+00 : f32
    %402 = vector.broadcast %cst_120 : f32 to vector<8x128xf32>
    %403 = arith.addf %402, %401 : vector<8x128xf32>
    %404 = arith.divf %402, %403 : vector<8x128xf32>
    %405 = arith.mulf %396, %372 : vector<8x128xf32>
    %406 = arith.mulf %390, %398 : vector<8x128xf32>
    %407 = arith.addf %405, %406 : vector<8x128xf32>
    %408 = math.tanh %407 : vector<8x128xf32>
    %409 = arith.mulf %404, %408 : vector<8x128xf32>
    %410 = arith.truncf %409 : vector<8x128xf32> to vector<8x128xbf16>
    %411 = arith.index_cast %c1_i32_114 : i32 to index
    %c0_121 = arith.constant 0 : index
    %c0_122 = arith.constant 0 : index
    %412 = vector.load %arg4[%411, %c0_121, %c0_122] : memref<9x8x128xbf16, #tpu.memory_space<vmem>>, vector<1x8x128xbf16>
    %413 = vector.shape_cast %412 : vector<1x8x128xbf16> to vector<8x128xbf16>
    %414 = vector.shape_cast %410 : vector<8x128xbf16> to vector<1x8x128xbf16>
    tpu.vector_store %arg4[%411, %c0_121, %c0_122], %414 {strides = array<i32>} : memref<9x8x128xbf16, #tpu.memory_space<vmem>>, vector<1x8x128xbf16>,
    %c2_i32_123 = arith.constant 2 : i32
    %415 = arith.index_cast %c2_i32_123 : i32 to index
    %c0_124 = arith.constant 0 : index
    %c0_125 = arith.constant 0 : index
    %416 = vector.load %arg5[%415, %c0_124, %c0_125] : memref<9x8x512xf32, #tpu.memory_space<vmem>>, vector<1x8x512xf32>
    %417 = vector.shape_cast %416 : vector<1x8x512xf32> to vector<8x512xf32>
    %cst_126 = arith.constant dense<0.000000e+00> : vector<8x512xf32>
    %418 = tpu.matmul %410, %342, %cst_126 {dimension_numbers = #tpu.dot_dimension_numbers<[1], [0], [0], [1], [0, 0, 1, 1], [], []>} : vector<8x128xbf16>, vector<128x512xbf16>, vector<8x512xf32> -> vector<8x512xf32>
    %419 = arith.addf %417, %418 : vector<8x512xf32>
    %420 = vector.extract_strided_slice %419 {offsets = [0, 0], sizes = [8, 128], strides = [1, 1]} : vector<8x512xf32> to vector<8x128xf32>
    %421 = arith.negf %420 : vector<8x128xf32>
    %422 = math.exp %421 : vector<8x128xf32>
    %cst_127 = arith.constant 1.000000e+00 : f32
    %423 = vector.broadcast %cst_127 : f32 to vector<8x128xf32>
    %424 = arith.addf %423, %422 : vector<8x128xf32>
    %425 = arith.divf %423, %424 : vector<8x128xf32>
    %426 = vector.extract_strided_slice %419 {offsets = [0, 128], sizes = [8, 128], strides = [1, 1]} : vector<8x512xf32> to vector<8x128xf32>
    %427 = arith.negf %426 : vector<8x128xf32>
    %428 = math.exp %427 : vector<8x128xf32>
    %cst_128 = arith.constant 1.000000e+00 : f32
    %429 = vector.broadcast %cst_128 : f32 to vector<8x128xf32>
    %430 = arith.addf %429, %428 : vector<8x128xf32>
    %431 = arith.divf %429, %430 : vector<8x128xf32>
    %432 = vector.extract_strided_slice %419 {offsets = [0, 256], sizes = [8, 128], strides = [1, 1]} : vector<8x512xf32> to vector<8x128xf32>
    %433 = math.tanh %432 : vector<8x128xf32>
    %434 = vector.extract_strided_slice %419 {offsets = [0, 384], sizes = [8, 128], strides = [1, 1]} : vector<8x512xf32> to vector<8x128xf32>
    %435 = arith.negf %434 : vector<8x128xf32>
    %436 = math.exp %435 : vector<8x128xf32>
    %cst_129 = arith.constant 1.000000e+00 : f32
    %437 = vector.broadcast %cst_129 : f32 to vector<8x128xf32>
    %438 = arith.addf %437, %436 : vector<8x128xf32>
    %439 = arith.divf %437, %438 : vector<8x128xf32>
    %440 = arith.mulf %431, %407 : vector<8x128xf32>
    %441 = arith.mulf %425, %433 : vector<8x128xf32>
    %442 = arith.addf %440, %441 : vector<8x128xf32>
    %443 = math.tanh %442 : vector<8x128xf32>
    %444 = arith.mulf %439, %443 : vector<8x128xf32>
    %445 = arith.truncf %444 : vector<8x128xf32> to vector<8x128xbf16>
    %446 = arith.index_cast %c2_i32_123 : i32 to index
    %c0_130 = arith.constant 0 : index
    %c0_131 = arith.constant 0 : index
    %447 = vector.load %arg4[%446, %c0_130, %c0_131] : memref<9x8x128xbf16, #tpu.memory_space<vmem>>, vector<1x8x128xbf16>
    %448 = vector.shape_cast %447 : vector<1x8x128xbf16> to vector<8x128xbf16>
    %449 = vector.shape_cast %445 : vector<8x128xbf16> to vector<1x8x128xbf16>
    tpu.vector_store %arg4[%446, %c0_130, %c0_131], %449 {strides = array<i32>} : memref<9x8x128xbf16, #tpu.memory_space<vmem>>, vector<1x8x128xbf16>,
    %c3_i32_132 = arith.constant 3 : i32
    %450 = arith.index_cast %c3_i32_132 : i32 to index
    %c0_133 = arith.constant 0 : index
    %c0_134 = arith.constant 0 : index
    %451 = vector.load %arg5[%450, %c0_133, %c0_134] : memref<9x8x512xf32, #tpu.memory_space<vmem>>, vector<1x8x512xf32>
    %452 = vector.shape_cast %451 : vector<1x8x512xf32> to vector<8x512xf32>
    %cst_135 = arith.constant dense<0.000000e+00> : vector<8x512xf32>
    %453 = tpu.matmul %445, %342, %cst_135 {dimension_numbers = #tpu.dot_dimension_numbers<[1], [0], [0], [1], [0, 0, 1, 1], [], []>} : vector<8x128xbf16>, vector<128x512xbf16>, vector<8x512xf32> -> vector<8x512xf32>
    %454 = arith.addf %452, %453 : vector<8x512xf32>
    %455 = vector.extract_strided_slice %454 {offsets = [0, 0], sizes = [8, 128], strides = [1, 1]} : vector<8x512xf32> to vector<8x128xf32>
    %456 = arith.negf %455 : vector<8x128xf32>
    %457 = math.exp %456 : vector<8x128xf32>
    %cst_136 = arith.constant 1.000000e+00 : f32
    %458 = vector.broadcast %cst_136 : f32 to vector<8x128xf32>
    %459 = arith.addf %458, %457 : vector<8x128xf32>
    %460 = arith.divf %458, %459 : vector<8x128xf32>
    %461 = vector.extract_strided_slice %454 {offsets = [0, 128], sizes = [8, 128], strides = [1, 1]} : vector<8x512xf32> to vector<8x128xf32>
    %462 = arith.negf %461 : vector<8x128xf32>
    %463 = math.exp %462 : vector<8x128xf32>
    %cst_137 = arith.constant 1.000000e+00 : f32
    %464 = vector.broadcast %cst_137 : f32 to vector<8x128xf32>
    %465 = arith.addf %464, %463 : vector<8x128xf32>
    %466 = arith.divf %464, %465 : vector<8x128xf32>
    %467 = vector.extract_strided_slice %454 {offsets = [0, 256], sizes = [8, 128], strides = [1, 1]} : vector<8x512xf32> to vector<8x128xf32>
    %468 = math.tanh %467 : vector<8x128xf32>
    %469 = vector.extract_strided_slice %454 {offsets = [0, 384], sizes = [8, 128], strides = [1, 1]} : vector<8x512xf32> to vector<8x128xf32>
    %470 = arith.negf %469 : vector<8x128xf32>
    %471 = math.exp %470 : vector<8x128xf32>
    %cst_138 = arith.constant 1.000000e+00 : f32
    %472 = vector.broadcast %cst_138 : f32 to vector<8x128xf32>
    %473 = arith.addf %472, %471 : vector<8x128xf32>
    %474 = arith.divf %472, %473 : vector<8x128xf32>
    %475 = arith.mulf %466, %442 : vector<8x128xf32>
    %476 = arith.mulf %460, %468 : vector<8x128xf32>
    %477 = arith.addf %475, %476 : vector<8x128xf32>
    %478 = math.tanh %477 : vector<8x128xf32>
    %479 = arith.mulf %474, %478 : vector<8x128xf32>
    %480 = arith.truncf %479 : vector<8x128xf32> to vector<8x128xbf16>
    %481 = arith.index_cast %c3_i32_132 : i32 to index
    %c0_139 = arith.constant 0 : index
    %c0_140 = arith.constant 0 : index
    %482 = vector.load %arg4[%481, %c0_139, %c0_140] : memref<9x8x128xbf16, #tpu.memory_space<vmem>>, vector<1x8x128xbf16>
    %483 = vector.shape_cast %482 : vector<1x8x128xbf16> to vector<8x128xbf16>
    %484 = vector.shape_cast %480 : vector<8x128xbf16> to vector<1x8x128xbf16>
    tpu.vector_store %arg4[%481, %c0_139, %c0_140], %484 {strides = array<i32>} : memref<9x8x128xbf16, #tpu.memory_space<vmem>>, vector<1x8x128xbf16>,
    %c4_i32_141 = arith.constant 4 : i32
    %485 = arith.index_cast %c4_i32_141 : i32 to index
    %c0_142 = arith.constant 0 : index
    %c0_143 = arith.constant 0 : index
    %486 = vector.load %arg5[%485, %c0_142, %c0_143] : memref<9x8x512xf32, #tpu.memory_space<vmem>>, vector<1x8x512xf32>
    %487 = vector.shape_cast %486 : vector<1x8x512xf32> to vector<8x512xf32>
    %cst_144 = arith.constant dense<0.000000e+00> : vector<8x512xf32>
    %488 = tpu.matmul %480, %342, %cst_144 {dimension_numbers = #tpu.dot_dimension_numbers<[1], [0], [0], [1], [0, 0, 1, 1], [], []>} : vector<8x128xbf16>, vector<128x512xbf16>, vector<8x512xf32> -> vector<8x512xf32>
    %489 = arith.addf %487, %488 : vector<8x512xf32>
    %490 = vector.extract_strided_slice %489 {offsets = [0, 0], sizes = [8, 128], strides = [1, 1]} : vector<8x512xf32> to vector<8x128xf32>
    %491 = arith.negf %490 : vector<8x128xf32>
    %492 = math.exp %491 : vector<8x128xf32>
    %cst_145 = arith.constant 1.000000e+00 : f32
    %493 = vector.broadcast %cst_145 : f32 to vector<8x128xf32>
    %494 = arith.addf %493, %492 : vector<8x128xf32>
    %495 = arith.divf %493, %494 : vector<8x128xf32>
    %496 = vector.extract_strided_slice %489 {offsets = [0, 128], sizes = [8, 128], strides = [1, 1]} : vector<8x512xf32> to vector<8x128xf32>
    %497 = arith.negf %496 : vector<8x128xf32>
    %498 = math.exp %497 : vector<8x128xf32>
    %cst_146 = arith.constant 1.000000e+00 : f32
    %499 = vector.broadcast %cst_146 : f32 to vector<8x128xf32>
    %500 = arith.addf %499, %498 : vector<8x128xf32>
    %501 = arith.divf %499, %500 : vector<8x128xf32>
    %502 = vector.extract_strided_slice %489 {offsets = [0, 256], sizes = [8, 128], strides = [1, 1]} : vector<8x512xf32> to vector<8x128xf32>
    %503 = math.tanh %502 : vector<8x128xf32>
    %504 = vector.extract_strided_slice %489 {offsets = [0, 384], sizes = [8, 128], strides = [1, 1]} : vector<8x512xf32> to vector<8x128xf32>
    %505 = arith.negf %504 : vector<8x128xf32>
    %506 = math.exp %505 : vector<8x128xf32>
    %cst_147 = arith.constant 1.000000e+00 : f32
    %507 = vector.broadcast %cst_147 : f32 to vector<8x128xf32>
    %508 = arith.addf %507, %506 : vector<8x128xf32>
    %509 = arith.divf %507, %508 : vector<8x128xf32>
    %510 = arith.mulf %501, %477 : vector<8x128xf32>
    %511 = arith.mulf %495, %503 : vector<8x128xf32>
    %512 = arith.addf %510, %511 : vector<8x128xf32>
    %513 = math.tanh %512 : vector<8x128xf32>
    %514 = arith.mulf %509, %513 : vector<8x128xf32>
    %515 = arith.truncf %514 : vector<8x128xf32> to vector<8x128xbf16>
    %516 = arith.index_cast %c4_i32_141 : i32 to index
    %c0_148 = arith.constant 0 : index
    %c0_149 = arith.constant 0 : index
    %517 = vector.load %arg4[%516, %c0_148, %c0_149] : memref<9x8x128xbf16, #tpu.memory_space<vmem>>, vector<1x8x128xbf16>
    %518 = vector.shape_cast %517 : vector<1x8x128xbf16> to vector<8x128xbf16>
    %519 = vector.shape_cast %515 : vector<8x128xbf16> to vector<1x8x128xbf16>
    tpu.vector_store %arg4[%516, %c0_148, %c0_149], %519 {strides = array<i32>} : memref<9x8x128xbf16, #tpu.memory_space<vmem>>, vector<1x8x128xbf16>,
    %c5_i32_150 = arith.constant 5 : i32
    %520 = arith.index_cast %c5_i32_150 : i32 to index
    %c0_151 = arith.constant 0 : index
    %c0_152 = arith.constant 0 : index
    %521 = vector.load %arg5[%520, %c0_151, %c0_152] : memref<9x8x512xf32, #tpu.memory_space<vmem>>, vector<1x8x512xf32>
    %522 = vector.shape_cast %521 : vector<1x8x512xf32> to vector<8x512xf32>
    %cst_153 = arith.constant dense<0.000000e+00> : vector<8x512xf32>
    %523 = tpu.matmul %515, %342, %cst_153 {dimension_numbers = #tpu.dot_dimension_numbers<[1], [0], [0], [1], [0, 0, 1, 1], [], []>} : vector<8x128xbf16>, vector<128x512xbf16>, vector<8x512xf32> -> vector<8x512xf32>
    %524 = arith.addf %522, %523 : vector<8x512xf32>
    %525 = vector.extract_strided_slice %524 {offsets = [0, 0], sizes = [8, 128], strides = [1, 1]} : vector<8x512xf32> to vector<8x128xf32>
    %526 = arith.negf %525 : vector<8x128xf32>
    %527 = math.exp %526 : vector<8x128xf32>
    %cst_154 = arith.constant 1.000000e+00 : f32
    %528 = vector.broadcast %cst_154 : f32 to vector<8x128xf32>
    %529 = arith.addf %528, %527 : vector<8x128xf32>
    %530 = arith.divf %528, %529 : vector<8x128xf32>
    %531 = vector.extract_strided_slice %524 {offsets = [0, 128], sizes = [8, 128], strides = [1, 1]} : vector<8x512xf32> to vector<8x128xf32>
    %532 = arith.negf %531 : vector<8x128xf32>
    %533 = math.exp %532 : vector<8x128xf32>
    %cst_155 = arith.constant 1.000000e+00 : f32
    %534 = vector.broadcast %cst_155 : f32 to vector<8x128xf32>
    %535 = arith.addf %534, %533 : vector<8x128xf32>
    %536 = arith.divf %534, %535 : vector<8x128xf32>
    %537 = vector.extract_strided_slice %524 {offsets = [0, 256], sizes = [8, 128], strides = [1, 1]} : vector<8x512xf32> to vector<8x128xf32>
    %538 = math.tanh %537 : vector<8x128xf32>
    %539 = vector.extract_strided_slice %524 {offsets = [0, 384], sizes = [8, 128], strides = [1, 1]} : vector<8x512xf32> to vector<8x128xf32>
    %540 = arith.negf %539 : vector<8x128xf32>
    %541 = math.exp %540 : vector<8x128xf32>
    %cst_156 = arith.constant 1.000000e+00 : f32
    %542 = vector.broadcast %cst_156 : f32 to vector<8x128xf32>
    %543 = arith.addf %542, %541 : vector<8x128xf32>
    %544 = arith.divf %542, %543 : vector<8x128xf32>
    %545 = arith.mulf %536, %512 : vector<8x128xf32>
    %546 = arith.mulf %530, %538 : vector<8x128xf32>
    %547 = arith.addf %545, %546 : vector<8x128xf32>
    %548 = math.tanh %547 : vector<8x128xf32>
    %549 = arith.mulf %544, %548 : vector<8x128xf32>
    %550 = arith.truncf %549 : vector<8x128xf32> to vector<8x128xbf16>
    %551 = arith.index_cast %c5_i32_150 : i32 to index
    %c0_157 = arith.constant 0 : index
    %c0_158 = arith.constant 0 : index
    %552 = vector.load %arg4[%551, %c0_157, %c0_158] : memref<9x8x128xbf16, #tpu.memory_space<vmem>>, vector<1x8x128xbf16>
    %553 = vector.shape_cast %552 : vector<1x8x128xbf16> to vector<8x128xbf16>
    %554 = vector.shape_cast %550 : vector<8x128xbf16> to vector<1x8x128xbf16>
    tpu.vector_store %arg4[%551, %c0_157, %c0_158], %554 {strides = array<i32>} : memref<9x8x128xbf16, #tpu.memory_space<vmem>>, vector<1x8x128xbf16>,
    %c6_i32_159 = arith.constant 6 : i32
    %555 = arith.index_cast %c6_i32_159 : i32 to index
    %c0_160 = arith.constant 0 : index
    %c0_161 = arith.constant 0 : index
    %556 = vector.load %arg5[%555, %c0_160, %c0_161] : memref<9x8x512xf32, #tpu.memory_space<vmem>>, vector<1x8x512xf32>
    %557 = vector.shape_cast %556 : vector<1x8x512xf32> to vector<8x512xf32>
    %cst_162 = arith.constant dense<0.000000e+00> : vector<8x512xf32>
    %558 = tpu.matmul %550, %342, %cst_162 {dimension_numbers = #tpu.dot_dimension_numbers<[1], [0], [0], [1], [0, 0, 1, 1], [], []>} : vector<8x128xbf16>, vector<128x512xbf16>, vector<8x512xf32> -> vector<8x512xf32>
    %559 = arith.addf %557, %558 : vector<8x512xf32>
    %560 = vector.extract_strided_slice %559 {offsets = [0, 0], sizes = [8, 128], strides = [1, 1]} : vector<8x512xf32> to vector<8x128xf32>
    %561 = arith.negf %560 : vector<8x128xf32>
    %562 = math.exp %561 : vector<8x128xf32>
    %cst_163 = arith.constant 1.000000e+00 : f32
    %563 = vector.broadcast %cst_163 : f32 to vector<8x128xf32>
    %564 = arith.addf %563, %562 : vector<8x128xf32>
    %565 = arith.divf %563, %564 : vector<8x128xf32>
    %566 = vector.extract_strided_slice %559 {offsets = [0, 128], sizes = [8, 128], strides = [1, 1]} : vector<8x512xf32> to vector<8x128xf32>
    %567 = arith.negf %566 : vector<8x128xf32>
    %568 = math.exp %567 : vector<8x128xf32>
    %cst_164 = arith.constant 1.000000e+00 : f32
    %569 = vector.broadcast %cst_164 : f32 to vector<8x128xf32>
    %570 = arith.addf %569, %568 : vector<8x128xf32>
    %571 = arith.divf %569, %570 : vector<8x128xf32>
    %572 = vector.extract_strided_slice %559 {offsets = [0, 256], sizes = [8, 128], strides = [1, 1]} : vector<8x512xf32> to vector<8x128xf32>
    %573 = math.tanh %572 : vector<8x128xf32>
    %574 = vector.extract_strided_slice %559 {offsets = [0, 384], sizes = [8, 128], strides = [1, 1]} : vector<8x512xf32> to vector<8x128xf32>
    %575 = arith.negf %574 : vector<8x128xf32>
    %576 = math.exp %575 : vector<8x128xf32>
    %cst_165 = arith.constant 1.000000e+00 : f32
    %577 = vector.broadcast %cst_165 : f32 to vector<8x128xf32>
    %578 = arith.addf %577, %576 : vector<8x128xf32>
    %579 = arith.divf %577, %578 : vector<8x128xf32>
    %580 = arith.mulf %571, %547 : vector<8x128xf32>
    %581 = arith.mulf %565, %573 : vector<8x128xf32>
    %582 = arith.addf %580, %581 : vector<8x128xf32>
    %583 = math.tanh %582 : vector<8x128xf32>
    %584 = arith.mulf %579, %583 : vector<8x128xf32>
    %585 = arith.truncf %584 : vector<8x128xf32> to vector<8x128xbf16>
    %586 = arith.index_cast %c6_i32_159 : i32 to index
    %c0_166 = arith.constant 0 : index
    %c0_167 = arith.constant 0 : index
    %587 = vector.load %arg4[%586, %c0_166, %c0_167] : memref<9x8x128xbf16, #tpu.memory_space<vmem>>, vector<1x8x128xbf16>
    %588 = vector.shape_cast %587 : vector<1x8x128xbf16> to vector<8x128xbf16>
    %589 = vector.shape_cast %585 : vector<8x128xbf16> to vector<1x8x128xbf16>
    tpu.vector_store %arg4[%586, %c0_166, %c0_167], %589 {strides = array<i32>} : memref<9x8x128xbf16, #tpu.memory_space<vmem>>, vector<1x8x128xbf16>,
    %c7_i32_168 = arith.constant 7 : i32
    %590 = arith.index_cast %c7_i32_168 : i32 to index
    %c0_169 = arith.constant 0 : index
    %c0_170 = arith.constant 0 : index
    %591 = vector.load %arg5[%590, %c0_169, %c0_170] : memref<9x8x512xf32, #tpu.memory_space<vmem>>, vector<1x8x512xf32>
    %592 = vector.shape_cast %591 : vector<1x8x512xf32> to vector<8x512xf32>
    %cst_171 = arith.constant dense<0.000000e+00> : vector<8x512xf32>
    %593 = tpu.matmul %585, %342, %cst_171 {dimension_numbers = #tpu.dot_dimension_numbers<[1], [0], [0], [1], [0, 0, 1, 1], [], []>} : vector<8x128xbf16>, vector<128x512xbf16>, vector<8x512xf32> -> vector<8x512xf32>
    %594 = arith.addf %592, %593 : vector<8x512xf32>
    %595 = vector.extract_strided_slice %594 {offsets = [0, 0], sizes = [8, 128], strides = [1, 1]} : vector<8x512xf32> to vector<8x128xf32>
    %596 = arith.negf %595 : vector<8x128xf32>
    %597 = math.exp %596 : vector<8x128xf32>
    %cst_172 = arith.constant 1.000000e+00 : f32
    %598 = vector.broadcast %cst_172 : f32 to vector<8x128xf32>
    %599 = arith.addf %598, %597 : vector<8x128xf32>
    %600 = arith.divf %598, %599 : vector<8x128xf32>
    %601 = vector.extract_strided_slice %594 {offsets = [0, 128], sizes = [8, 128], strides = [1, 1]} : vector<8x512xf32> to vector<8x128xf32>
    %602 = arith.negf %601 : vector<8x128xf32>
    %603 = math.exp %602 : vector<8x128xf32>
    %cst_173 = arith.constant 1.000000e+00 : f32
    %604 = vector.broadcast %cst_173 : f32 to vector<8x128xf32>
    %605 = arith.addf %604, %603 : vector<8x128xf32>
    %606 = arith.divf %604, %605 : vector<8x128xf32>
    %607 = vector.extract_strided_slice %594 {offsets = [0, 256], sizes = [8, 128], strides = [1, 1]} : vector<8x512xf32> to vector<8x128xf32>
    %608 = math.tanh %607 : vector<8x128xf32>
    %609 = vector.extract_strided_slice %594 {offsets = [0, 384], sizes = [8, 128], strides = [1, 1]} : vector<8x512xf32> to vector<8x128xf32>
    %610 = arith.negf %609 : vector<8x128xf32>
    %611 = math.exp %610 : vector<8x128xf32>
    %cst_174 = arith.constant 1.000000e+00 : f32
    %612 = vector.broadcast %cst_174 : f32 to vector<8x128xf32>
    %613 = arith.addf %612, %611 : vector<8x128xf32>
    %614 = arith.divf %612, %613 : vector<8x128xf32>
    %615 = arith.mulf %606, %582 : vector<8x128xf32>
    %616 = arith.mulf %600, %608 : vector<8x128xf32>
    %617 = arith.addf %615, %616 : vector<8x128xf32>
    %618 = math.tanh %617 : vector<8x128xf32>
    %619 = arith.mulf %614, %618 : vector<8x128xf32>
    %620 = arith.truncf %619 : vector<8x128xf32> to vector<8x128xbf16>
    %621 = arith.index_cast %c7_i32_168 : i32 to index
    %c0_175 = arith.constant 0 : index
    %c0_176 = arith.constant 0 : index
    %622 = vector.load %arg4[%621, %c0_175, %c0_176] : memref<9x8x128xbf16, #tpu.memory_space<vmem>>, vector<1x8x128xbf16>
    %623 = vector.shape_cast %622 : vector<1x8x128xbf16> to vector<8x128xbf16>
    %624 = vector.shape_cast %620 : vector<8x128xbf16> to vector<1x8x128xbf16>
    tpu.vector_store %arg4[%621, %c0_175, %c0_176], %624 {strides = array<i32>} : memref<9x8x128xbf16, #tpu.memory_space<vmem>>, vector<1x8x128xbf16>,
    %c8_i32_177 = arith.constant 8 : i32
    %625 = arith.index_cast %c8_i32_177 : i32 to index
    %c0_178 = arith.constant 0 : index
    %c0_179 = arith.constant 0 : index
    %626 = vector.load %arg5[%625, %c0_178, %c0_179] : memref<9x8x512xf32, #tpu.memory_space<vmem>>, vector<1x8x512xf32>
    %627 = vector.shape_cast %626 : vector<1x8x512xf32> to vector<8x512xf32>
    %cst_180 = arith.constant dense<0.000000e+00> : vector<8x512xf32>
    %628 = tpu.matmul %620, %342, %cst_180 {dimension_numbers = #tpu.dot_dimension_numbers<[1], [0], [0], [1], [0, 0, 1, 1], [], []>} : vector<8x128xbf16>, vector<128x512xbf16>, vector<8x512xf32> -> vector<8x512xf32>
    %629 = arith.addf %627, %628 : vector<8x512xf32>
    %630 = vector.extract_strided_slice %629 {offsets = [0, 0], sizes = [8, 128], strides = [1, 1]} : vector<8x512xf32> to vector<8x128xf32>
    %631 = arith.negf %630 : vector<8x128xf32>
    %632 = math.exp %631 : vector<8x128xf32>
    %cst_181 = arith.constant 1.000000e+00 : f32
    %633 = vector.broadcast %cst_181 : f32 to vector<8x128xf32>
    %634 = arith.addf %633, %632 : vector<8x128xf32>
    %635 = arith.divf %633, %634 : vector<8x128xf32>
    %636 = vector.extract_strided_slice %629 {offsets = [0, 128], sizes = [8, 128], strides = [1, 1]} : vector<8x512xf32> to vector<8x128xf32>
    %637 = arith.negf %636 : vector<8x128xf32>
    %638 = math.exp %637 : vector<8x128xf32>
    %cst_182 = arith.constant 1.000000e+00 : f32
    %639 = vector.broadcast %cst_182 : f32 to vector<8x128xf32>
    %640 = arith.addf %639, %638 : vector<8x128xf32>
    %641 = arith.divf %639, %640 : vector<8x128xf32>
    %642 = vector.extract_strided_slice %629 {offsets = [0, 256], sizes = [8, 128], strides = [1, 1]} : vector<8x512xf32> to vector<8x128xf32>
    %643 = math.tanh %642 : vector<8x128xf32>
    %644 = vector.extract_strided_slice %629 {offsets = [0, 384], sizes = [8, 128], strides = [1, 1]} : vector<8x512xf32> to vector<8x128xf32>
    %645 = arith.negf %644 : vector<8x128xf32>
    %646 = math.exp %645 : vector<8x128xf32>
    %cst_183 = arith.constant 1.000000e+00 : f32
    %647 = vector.broadcast %cst_183 : f32 to vector<8x128xf32>
    %648 = arith.addf %647, %646 : vector<8x128xf32>
    %649 = arith.divf %647, %648 : vector<8x128xf32>
    %650 = arith.mulf %641, %617 : vector<8x128xf32>
    %651 = arith.mulf %635, %643 : vector<8x128xf32>
    %652 = arith.addf %650, %651 : vector<8x128xf32>
    %653 = math.tanh %652 : vector<8x128xf32>
    %654 = arith.mulf %649, %653 : vector<8x128xf32>
    %655 = arith.truncf %654 : vector<8x128xf32> to vector<8x128xbf16>
    %656 = arith.index_cast %c8_i32_177 : i32 to index
    %c0_184 = arith.constant 0 : index
    %c0_185 = arith.constant 0 : index
    %657 = vector.load %arg4[%656, %c0_184, %c0_185] : memref<9x8x128xbf16, #tpu.memory_space<vmem>>, vector<1x8x128xbf16>
    %658 = vector.shape_cast %657 : vector<1x8x128xbf16> to vector<8x128xbf16>
    %659 = vector.shape_cast %655 : vector<8x128xbf16> to vector<1x8x128xbf16>
    tpu.vector_store %arg4[%656, %c0_184, %c0_185], %659 {strides = array<i32>} : memref<9x8x128xbf16, #tpu.memory_space<vmem>>, vector<1x8x128xbf16>,
    %c9_i32_186 = arith.constant 9 : i32
    return
  }
}

module attributes {stable_mosaic.version = 11 : i64} {
  func.func @_linear_kernel(%arg0: i32, %arg1: i32, %arg2: memref<72x128xbf16, #tpu.memory_space<vmem>>, %arg3: memref<128x128xbf16, #tpu.memory_space<vmem>>, %arg4: memref<1x128xf32, #tpu.memory_space<vmem>>, %arg5: memref<72x128xf32, #tpu.memory_space<vmem>>) attributes {dimension_semantics = [#tpu.dimension_semantics<parallel>, #tpu.dimension_semantics<parallel>], iteration_bounds = array<i64: 1, 1>, scalar_prefetch = 0 : i64, scratch_operands = 0 : i64, tpu.core_type = #tpu.core_type<tc>, window_params = [{transform_indices = @transform_0, window_bounds = array<i64: 72, 128>}, {transform_indices = @transform_1, window_bounds = array<i64: 128, 128>}, {transform_indices = @transform_2, window_bounds = array<i64: 1, 128>}, {transform_indices = @transform_3, window_bounds = array<i64: 72, 128>}]} {
    %c0 = arith.constant 0 : index
    %c0_0 = arith.constant 0 : index
    %0 = vector.load %arg2[%c0, %c0_0] : memref<72x128xbf16, #tpu.memory_space<vmem>>, vector<72x128xbf16>
    %c0_1 = arith.constant 0 : index
    %c0_2 = arith.constant 0 : index
    %1 = vector.load %arg3[%c0_1, %c0_2] : memref<128x128xbf16, #tpu.memory_space<vmem>>, vector<128x128xbf16>
    %cst = arith.constant dense<0.000000e+00> : vector<72x128xf32>
    %2 = tpu.matmul %0, %1, %cst {dimension_numbers = #tpu.dot_dimension_numbers<[1], [0], [0], [1], [0, 0, 1, 1], [], []>} : vector<72x128xbf16>, vector<128x128xbf16>, vector<72x128xf32> -> vector<72x128xf32>
    %c0_3 = arith.constant 0 : index
    %c0_4 = arith.constant 0 : index
    %3 = vector.load %arg4[%c0_3, %c0_4] : memref<1x128xf32, #tpu.memory_space<vmem>>, vector<1x128xf32>
    %4 = vector.broadcast %3 : vector<1x128xf32> to vector<72x128xf32>
    %5 = arith.addf %2, %4 : vector<72x128xf32>
    %c0_5 = arith.constant 0 : index
    %c0_6 = arith.constant 0 : index
    %6 = vector.load %arg5[%c0_5, %c0_6] : memref<72x128xf32, #tpu.memory_space<vmem>>, vector<72x128xf32>
    tpu.vector_store %arg5[%c0_5, %c0_6], %5 {strides = array<i32>} : memref<72x128xf32, #tpu.memory_space<vmem>>, vector<72x128xf32>,
    return
  }
  func.func @transform_0(%arg0: i32, %arg1: i32) -> (i32, i32) {
    %c0_i32 = arith.constant 0 : i32
    %c0_i32_0 = arith.constant 0 : i32
    return %arg0, %c0_i32 : i32, i32
  }
  func.func @transform_1(%arg0: i32, %arg1: i32) -> (i32, i32) {
    %c0_i32 = arith.constant 0 : i32
    %c0_i32_0 = arith.constant 0 : i32
    return %c0_i32, %arg1 : i32, i32
  }
  func.func @transform_2(%arg0: i32, %arg1: i32) -> (i32, i32) {
    %c0_i32 = arith.constant 0 : i32
    %c0_i32_0 = arith.constant 0 : i32
    return %c0_i32, %arg1 : i32, i32
  }
  func.func @transform_3(%arg0: i32, %arg1: i32) -> (i32, i32) {
    %c0_i32 = arith.constant 0 : i32
    return %arg0, %arg1 : i32, i32
  }
}

</mosaic_0001>

<bundles_post_ra>
// kernel: decoder_rnn_forward.3
= control target key start
LH: loop header
LB: loop body
LE: loop exit
PB: predicated region body
PF: predicated region fallthrough
CT: control target
= control target key end

     0   :  { %s339_s1 = inlined_call_operand.vmem [shape: bf16[128,128], index: 1, kind: input, shape index: {}]   ;;  %s340_s2 = inlined_call_operand.vmem [shape: f32[1,128], index: 2, kind: input, shape index: {}]   ;;  %s341_s0 = inlined_call_operand.vmem [shape: bf16[72,128], index: 0, kind: input, shape index: {}]   ;;  %s342_s3 = inlined_call_operand.vmem [shape: f32[72,128], index: 3, kind: output, shape index: {}]  }
   0x1   :  { %v224_v0 = vld [vmem:[%s339_s1 + $0x38] sm:$0xff]  ;;  %v223_v1 = vld [vmem:[%s339_s1 + $0x30] sm:$0xff]  ;;  %v222_v2 = vld [vmem:[%s339_s1 + $0x28] sm:$0xff] }
   0x2   :  { %227 = vmatpush.bf16.msra.mxu3 %v224_v0  ;;  %226 = vmatpush.bf16.msra.mxu2 %v224_v0  ;;  %v221_v3 = vld [vmem:[%s339_s1 + $0x20] sm:$0xff]  ;;  %v220_v4 = vld [vmem:[%s339_s1 + $0x18] sm:$0xff]  ;;  %v219_v5 = vld [vmem:[%s339_s1 + $0x10] sm:$0xff] }
   0x3   :  { %119 = vmatpush.bf16.msra.mxu0 %v224_v0  ;;  %225 = vmatpush.bf16.msra.mxu1 %v224_v0  ;;  %v218_v6 = vld [vmem:[%s339_s1 + $0x8] sm:$0xff]  ;;  %v217_v7 = vld [vmem:[%s339_s1] sm:$0xff]  ;;  %v216_v8 = vld [vmem:[%s341_s0 + $0x18] sm:$0xff] }
   0x4   :  { %v215_v9 = vld [vmem:[%s341_s0 + $0x10] sm:$0xff]  ;;  %v213_v10 = vld [vmem:[%s341_s0] sm:$0xff]  ;;  %v214_v11 = vld [vmem:[%s341_s0 + $0x8] sm:$0xff] }
   0x5   :  { %v22_v12 = vld [vmem:[%s341_s0 + $0x20] sm:$0xf] }
   0x6   :  { %230 = vmatpush.bf16.msra.mxu3 %v223_v1  ;;  %229 = vmatpush.bf16.msra.mxu2 %v223_v1  ;;  %v60_v13 = vunpack.c.l.b16 %v22_v12  ;;  %v249_v15 = vld [vmem:[%s340_s2] ss:$0 sm:$0xff] }
   0x7   :  { %120 = vmatpush.bf16.msra.mxu0 %v223_v1  ;;  %228 = vmatpush.bf16.msra.mxu1 %v223_v1 }
   0x8   :  { %v65_v14 = vpack.c.b16 %v60_v13, %v60_v13 }
   0xa   :  { %233 = vmatpush.bf16.msra.mxu3 %v222_v2  ;;  %232 = vmatpush.bf16.msra.mxu2 %v222_v2 }
   0xb   :  { %121 = vmatpush.bf16.msra.mxu0 %v222_v2  ;;  %231 = vmatpush.bf16.msra.mxu1 %v222_v2 }
   0xe   :  { %236 = vmatpush.bf16.msra.mxu3 %v221_v3  ;;  %235 = vmatpush.bf16.msra.mxu2 %v221_v3 }
   0xf   :  { %122 = vmatpush.bf16.msra.mxu0 %v221_v3  ;;  %234 = vmatpush.bf16.msra.mxu1 %v221_v3 }
  0x12   :  { %239 = vmatpush.bf16.msra.mxu3 %v220_v4  ;;  %238 = vmatpush.bf16.msra.mxu2 %v220_v4 }
  0x13   :  { %123 = vmatpush.bf16.msra.mxu0 %v220_v4  ;;  %237 = vmatpush.bf16.msra.mxu1 %v220_v4 }
  0x16   :  { %242 = vmatpush.bf16.msra.mxu3 %v219_v5  ;;  %241 = vmatpush.bf16.msra.mxu2 %v219_v5 }
  0x17   :  { %124 = vmatpush.bf16.msra.mxu0 %v219_v5  ;;  %240 = vmatpush.bf16.msra.mxu1 %v219_v5 }
  0x1a   :  { %245 = vmatpush.bf16.msra.mxu3 %v218_v6  ;;  %244 = vmatpush.bf16.msra.mxu2 %v218_v6 }
  0x1b   :  { %125 = vmatpush.bf16.msra.mxu0 %v218_v6  ;;  %243 = vmatpush.bf16.msra.mxu1 %v218_v6 }
  0x1e   :  { %248 = vmatpush.bf16.msra.mxu3 %v217_v7  ;;  %247 = vmatpush.bf16.msra.mxu2 %v217_v7 }
  0x1f   :  { %126 = vmatpush.bf16.msra.mxu0 %v217_v7  ;;  %246 = vmatpush.bf16.msra.mxu1 %v217_v7 }
  0x21   :  { %142 = vmatmul.bf16.vlgmr.msra.gmra.mxu3 %v216_v8  ;;  %137 = vmatmul.bf16.vlgmr.msra.gmra.mxu2 %v215_v9 }
  0x22   :  { %127 = vmatmul.bf16.vlgmr.msra.gmra.mxu0 %v213_v10  ;;  %132 = vmatmul.bf16.vlgmr.msra.gmra.mxu1 %v214_v11 }
  0x31   :  { %147 = vmatmul.bf16.gmra.mxu3 %v65_v14 }
  0x9f   :  { %v128_v16 = vpop.f32.mrf.mxu0  ;;  %v133_v17 = vpop.f32.mrf.mxu1 }
  0xa0   :  { %v129_v18 = vadd.f32 %v249_v15, %v128_v16  ;;  %v134_v19 = vadd.f32 %v249_v15, %v133_v17 }
  0xa2   :  { %152 = vst [vmem:[%s342_s3] sm:$0xff] %v129_v18 }
  0xa3   :  { %154 = vst [vmem:[%s342_s3 + $0x10] sm:$0xff] %v134_v19 }
  0xa4   :  { %v143_v20 = vpop.f32.mrf.mxu3  ;;  %v138_v21 = vpop.f32.mrf.mxu2 }
  0xa5   :  { %v144_v22 = vadd.f32 %v249_v15, %v143_v20  ;;  %v139_v23 = vadd.f32 %v249_v15, %v138_v21 }
  0xa7   :  { %158 = vst [vmem:[%s342_s3 + $0x30] sm:$0xff] %v144_v22  ;;  %v130_v24 = vpop.f32.mrf.mxu0  ;;  %v135_v25 = vpop.f32.mrf.mxu1 }
  0xa8   :  { %156 = vst [vmem:[%s342_s3 + $0x20] sm:$0xff] %v139_v23  ;;  %v131_v26 = vadd.f32 %v249_v15, %v130_v24  ;;  %v136_v27 = vadd.f32 %v249_v15, %v135_v25 }
  0xaa   :  { %153 = vst [vmem:[%s342_s3 + $0x8] sm:$0xff] %v131_v26 }
  0xab   :  { %155 = vst [vmem:[%s342_s3 + $0x18] sm:$0xff] %v136_v27 }
  0xac   :  { %v145_v28 = vpop.f32.mrf.mxu3  ;;  %v140_v29 = vpop.f32.mrf.mxu2 }
  0xad   :  { %v146_v30 = vadd.f32 %v249_v15, %v145_v28  ;;  %v141_v31 = vadd.f32 %v249_v15, %v140_v29 }
  0xaf   :  { %159 = vst [vmem:[%s342_s3 + $0x38] sm:$0xff] %v146_v30 }
  0xb0   :  { %157 = vst [vmem:[%s342_s3 + $0x28] sm:$0xff] %v141_v31 }
  0xb4   :  { %v148_v32 = vpop.f32.mrf.mxu3 }
  0xb5   :  { %v149_v33 = vadd.f32 %v249_v15, %v148_v32 }
  0xb7   :  { %160 = vst [vmem:[%s342_s3 + $0x40] sm:$0xff] %v149_v33 }
  0xbc   :  { %v150_v34 = vpop.f32.mrf.mxu3 }

// kernel: decoder_rnn_forward.2
= control target key start
LH: loop header
LB: loop body
LE: loop exit
PB: predicated region body
PF: predicated region fallthrough
CT: control target
= control target key end

     0   :  { %9 = vsyncpa [#allocation4], 0  ;;  %s5920_s0 = inlined_call_operand.vmem [shape: bf16[9,8,128], index: 0, kind: input, shape index: {}]   ;;  %s5921_s1 = inlined_call_operand.hbm [shape: bf16[2,128,512], index: 1, kind: input, shape index: {}]   ;;  %s5922_s2 = inlined_call_operand.hbm [shape: bf16[2,128,512], index: 2, kind: input, shape index: {}]   ;;  %s5923_s3 = inlined_call_operand.vmem [shape: f32[2,1,512], index: 3, kind: input, shape index: {}]   ;;  %s5924_s4 = inlined_call_operand.vmem [shape: bf16[9,8,128], index: 4, kind: output, shape index: {}]  }
   0x1   :  { %s17_s17 = sshll.u32 %s5921_s1, 4  ;;  %s18_s17 = int_to_ptr.hbm [resolvable:$true] %s17_s17 }
   0x2   :  { %10 = vsyncpa [#allocation6], 0  ;;  %s4619_s18 = smov [#allocation3]   ;;  %s30_s22 = sshll.u32 %s5922_s2, 4  ;;  %s31_s22 = int_to_ptr.hbm [resolvable:$true] %s30_s22 }
   0x3   :  { %s19_s19 = sshll.u32 %s4619_s18, 4  ;;  %s4620_s23 = smov 256   ;;  %s20_s19 = int_to_ptr.vmem [resolvable:$true] %s19_s19 }
   0x4   :  { %s4621_s24 = smov 16   ;;  %s4622_s25 = smov [#allocation5]  }
   0x5   :  { %25 = dma.hbm_to_vmem [thread:$0]  %s18_s17, 8192, %s20_s19, [#allocation4], %s4620_s23, %s4620_s23, %s4621_s24  }
   0x6   :  { %s32_s26 = sshll.u32 %s4622_s25, 4  ;;  %s33_s26 = int_to_ptr.vmem [resolvable:$true] %s32_s26 }
   0x7   :  { %38 = dma.hbm_to_vmem [thread:$0]  %s31_s22, 8192, %s33_s26, [#allocation6], %s4620_s23, %s4620_s23, %s4621_s24  }
   0x8   :  { %4615 = dma.done.wait [#allocation4], 8192  }
   0x9   :  { %4616 = vsyncadd [#allocation4], 4294959104 }
   0xa   :  { %4617 = dma.done.wait [#allocation6], 8192  }
   0xb   :  { %4618 = vsyncadd [#allocation6], 4294959104  ;;  %v3653_v0 = vld [vmem:[#allocation3 + $0xe0] sm:$0xf]  ;;  %v4172_v1 = vld [vmem:[#allocation3 + $0xec] sm:$0xf0] }
   0xc   :  { %v4170_v2 = vld [vmem:[#allocation3 + $0xe4] sm:$0xf]  ;;  %v3654_v3 = vor.u32 %v4172_v1, %v3653_v0  ;;  %v3655_v4 = vld [vmem:[#allocation3 + $0xf0] sm:$0xf0]  ;;  %v3661_v5 = vld [vmem:[#allocation3 + $0xe8] sm:$0xf] }
   0xd   :  { %v4173_v6 = vld [vmem:[#allocation3 + $0xf4] sm:$0xf0]  ;;  %v3658_v7 = vor.u32 %v4170_v2, %v3655_v4  ;;  %v4171_v9 = vld [vmem:[#allocation3 + $0xec] sm:$0xf]  ;;  %v3663_v10 = vld [vmem:[#allocation3 + $0xf8] sm:$0xf0] }
   0xe   :  { %v3662_v8 = vor.u32 %v4173_v6, %v3661_v5  ;;  %v3637_v11 = vld [vmem:[#allocation3 + $0xc0] sm:$0xf]  ;;  %289 = vmatpush.bf16.msra.mxu0 %v3654_v3  ;;  %v3666_v12 = vor.u32 %v4171_v9, %v3663_v10  ;;  %v4168_v13 = vld [vmem:[#allocation3 + $0xcc] sm:$0xf0]  ;;  %v4166_v14 = vld [vmem:[#allocation3 + $0xc4] sm:$0xf] }
   0xf   :  { %v3639_v15 = vld [vmem:[#allocation3 + $0xd0] sm:$0xf0]  ;;  %322 = vmatpush.bf16.msra.mxu1 %v3658_v7  ;;  %v3638_v16 = vor.u32 %v4168_v13, %v3637_v11  ;;  %v3645_v18 = vld [vmem:[#allocation3 + $0xc8] sm:$0xf]  ;;  %v4169_v19 = vld [vmem:[#allocation3 + $0xd4] sm:$0xf0] }
  0x10   :  { %355 = vmatpush.bf16.msra.mxu2 %v3662_v8  ;;  %v3642_v17 = vor.u32 %v4166_v14, %v3639_v15  ;;  %v4167_v20 = vld [vmem:[#allocation3 + $0xcc] sm:$0xf]  ;;  %388 = vmatpush.bf16.msra.mxu3 %v3666_v12  ;;  %v3646_v21 = vor.u32 %v4169_v19, %v3645_v18  ;;  %v3647_v22 = vld [vmem:[#allocation3 + $0xd8] sm:$0xf0]  ;;  %v3621_v23 = vld [vmem:[#allocation3 + $0xa0] sm:$0xf] }
  0x11   :  { %v4164_v24 = vld [vmem:[#allocation3 + $0xac] sm:$0xf0]  ;;  %v3650_v25 = vor.u32 %v4167_v20, %v3647_v22  ;;  %v4162_v26 = vld [vmem:[#allocation3 + $0xa4] sm:$0xf]  ;;  %v3623_v27 = vld [vmem:[#allocation3 + $0xb0] sm:$0xf0] }
  0x12   :  { %v3629_v28 = vld [vmem:[#allocation3 + $0xa8] sm:$0xf]  ;;  %290 = vmatpush.bf16.msra.mxu0 %v3638_v16  ;;  %v3622_v29 = vor.u32 %v4164_v24, %v3621_v23  ;;  %v4165_v30 = vld [vmem:[#allocation3 + $0xb4] sm:$0xf0]  ;;  %v4163_v31 = vld [vmem:[#allocation3 + $0xac] sm:$0xf]  ;;  %v3626_v33 = vor.u32 %v4162_v26, %v3623_v27 }
  0x13   :  { %v3631_v32 = vld [vmem:[#allocation3 + $0xb8] sm:$0xf0]  ;;  %323 = vmatpush.bf16.msra.mxu1 %v3642_v17  ;;  %v3630_v34 = vor.u32 %v4165_v30, %v3629_v28  ;;  %v3605_v35 = vld [vmem:[#allocation3 + $0x80] sm:$0xf]  ;;  %v4160_v36 = vld [vmem:[#allocation3 + $0x8c] sm:$0xf0] }
  0x14   :  { %356 = vmatpush.bf16.msra.mxu2 %v3646_v21  ;;  %v4158_v37 = vld [vmem:[#allocation3 + $0x84] sm:$0xf]  ;;  %389 = vmatpush.bf16.msra.mxu3 %v3650_v25  ;;  %v3634_v38 = vor.u32 %v4163_v31, %v3631_v32  ;;  %v3607_v39 = vld [vmem:[#allocation3 + $0x90] sm:$0xf0]  ;;  %v3613_v40 = vld [vmem:[#allocation3 + $0x88] sm:$0xf]  ;;  %v3606_v44 = vor.u32 %v4160_v36, %v3605_v35 }
  0x15   :  { %v4161_v41 = vld [vmem:[#allocation3 + $0x94] sm:$0xf0]  ;;  %v4159_v42 = vld [vmem:[#allocation3 + $0x8c] sm:$0xf]  ;;  %v3615_v43 = vld [vmem:[#allocation3 + $0x98] sm:$0xf0]  ;;  %v3610_v45 = vor.u32 %v4158_v37, %v3607_v39 }
  0x16   :  { %291 = vmatpush.bf16.msra.mxu0 %v3622_v29  ;;  %v3614_v46 = vor.u32 %v4161_v41, %v3613_v40  ;;  %v3589_v47 = vld [vmem:[#allocation3 + $0x60] sm:$0xf]  ;;  %v4156_v48 = vld [vmem:[#allocation3 + $0x6c] sm:$0xf0]  ;;  %v4154_v49 = vld [vmem:[#allocation3 + $0x64] sm:$0xf]  ;;  %v3618_v50 = vor.u32 %v4159_v42, %v3615_v43 }
  0x17   :  { %324 = vmatpush.bf16.msra.mxu1 %v3626_v33  ;;  %v3591_v51 = vld [vmem:[#allocation3 + $0x70] sm:$0xf0]  ;;  %v3597_v52 = vld [vmem:[#allocation3 + $0x68] sm:$0xf]  ;;  %v4157_v53 = vld [vmem:[#allocation3 + $0x74] sm:$0xf0]  ;;  %v3590_v56 = vor.u32 %v4156_v48, %v3589_v47 }
  0x18   :  { %357 = vmatpush.bf16.msra.mxu2 %v3630_v34  ;;  %390 = vmatpush.bf16.msra.mxu3 %v3634_v38  ;;  %v4155_v54 = vld [vmem:[#allocation3 + $0x6c] sm:$0xf]  ;;  %v3599_v55 = vld [vmem:[#allocation3 + $0x78] sm:$0xf0]  ;;  %v3594_v57 = vor.u32 %v4154_v49, %v3591_v51  ;;  %v3598_v58 = vor.u32 %v4157_v53, %v3597_v52  ;;  %v3573_v59 = vld [vmem:[#allocation3 + $0x40] sm:$0xf] }
  0x19   :  { %v4152_v60 = vld [vmem:[#allocation3 + $0x4c] sm:$0xf0]  ;;  %v4150_v61 = vld [vmem:[#allocation3 + $0x44] sm:$0xf]  ;;  %v3602_v62 = vor.u32 %v4155_v54, %v3599_v55  ;;  %v3575_v63 = vld [vmem:[#allocation3 + $0x50] sm:$0xf0] }
  0x1a   :  { %292 = vmatpush.bf16.msra.mxu0 %v3606_v44  ;;  %v3581_v0 = vld [vmem:[#allocation3 + $0x48] sm:$0xf]  ;;  %v4153_v1 = vld [vmem:[#allocation3 + $0x54] sm:$0xf0]  ;;  %v4151_v2 = vld [vmem:[#allocation3 + $0x4c] sm:$0xf]  ;;  %v3574_v4 = vor.u32 %v4152_v60, %v3573_v59  ;;  %v3578_v5 = vor.u32 %v4150_v61, %v3575_v63 }
  0x1b   :  { %325 = vmatpush.bf16.msra.mxu1 %v3610_v45  ;;  %v3583_v3 = vld [vmem:[#allocation3 + $0x58] sm:$0xf0]  ;;  %v3582_v6 = vor.u32 %v4153_v1, %v3581_v0  ;;  %v3557_v7 = vld [vmem:[#allocation3 + $0x20] sm:$0xf]  ;;  %v4148_v8 = vld [vmem:[#allocation3 + $0x2c] sm:$0xf0] }
  0x1c   :  { %358 = vmatpush.bf16.msra.mxu2 %v3614_v46  ;;  %391 = vmatpush.bf16.msra.mxu3 %v3618_v50  ;;  %v4146_v9 = vld [vmem:[#allocation3 + $0x24] sm:$0xf]  ;;  %v3586_v10 = vor.u32 %v4151_v2, %v3583_v3  ;;  %v3559_v11 = vld [vmem:[#allocation3 + $0x30] sm:$0xf0]  ;;  %v3565_v12 = vld [vmem:[#allocation3 + $0x28] sm:$0xf]  ;;  %v3558_v16 = vor.u32 %v4148_v8, %v3557_v7 }
  0x1d   :  { %v4149_v13 = vld [vmem:[#allocation3 + $0x34] sm:$0xf0]  ;;  %v4147_v14 = vld [vmem:[#allocation3 + $0x2c] sm:$0xf]  ;;  %v3567_v15 = vld [vmem:[#allocation3 + $0x38] sm:$0xf0]  ;;  %v3562_v18 = vor.u32 %v4146_v9, %v3559_v11 }
  0x1e   :  { %293 = vmatpush.bf16.msra.mxu0 %v3590_v56  ;;  %v3541_v17 = vld [vmem:[#allocation3] sm:$0xf]  ;;  %v3566_v19 = vor.u32 %v4149_v13, %v3565_v12  ;;  %v4144_v20 = vld [vmem:[#allocation3 + $0xc] sm:$0xf0]  ;;  %v4142_v21 = vld [vmem:[#allocation3 + $0x4] sm:$0xf]  ;;  %v3570_v23 = vor.u32 %v4147_v14, %v3567_v15 }
  0x1f   :  { %326 = vmatpush.bf16.msra.mxu1 %v3594_v57  ;;  %v3543_v22 = vld [vmem:[#allocation3 + $0x10] sm:$0xf0]  ;;  %v3549_v24 = vld [vmem:[#allocation3 + $0x8] sm:$0xf]  ;;  %v4145_v25 = vld [vmem:[#allocation3 + $0x14] sm:$0xf0]  ;;  %v3542_v30 = vor.u32 %v4144_v20, %v3541_v17 }
  0x20   :  { %359 = vmatpush.bf16.msra.mxu2 %v3598_v58  ;;  %392 = vmatpush.bf16.msra.mxu3 %v3602_v62  ;;  %v4143_v26 = vld [vmem:[#allocation3 + $0xc] sm:$0xf]  ;;  %v3551_v27 = vld [vmem:[#allocation3 + $0x18] sm:$0xf0]  ;;  %v3781_v28 = vld [vmem:[#allocation5 + $0xe0] sm:$0xf]  ;;  %v3546_v33 = vor.u32 %v4142_v21, %v3543_v22  ;;  %v3550_v34 = vor.u32 %v4145_v25, %v3549_v24 }
  0x21   :  { %v4204_v29 = vld [vmem:[#allocation5 + $0xec] sm:$0xf0]  ;;  %v4202_v31 = vld [vmem:[#allocation5 + $0xe4] sm:$0xf]  ;;  %v3783_v32 = vld [vmem:[#allocation5 + $0xf0] sm:$0xf0]  ;;  %v3554_v36 = vor.u32 %v4143_v26, %v3551_v27 }
  0x22   :  { %294 = vmatpush.bf16.msra.mxu0 %v3574_v4  ;;  %v4138_v35 = vld [vmem:[%s5920_s0] sm:$0xff]  ;;  %v4658_v37 = vor.u32 %v4204_v29, %v3781_v28  ;;  %v4203_v38 = vld [vmem:[#allocation5 + $0xec] sm:$0xf]  ;;  %v3789_v39 = vld [vmem:[#allocation5 + $0xe8] sm:$0xf]  ;;  %v4660_v41 = vor.u32 %v4202_v31, %v3783_v32 }
  0x23   :  { %327 = vmatpush.bf16.msra.mxu1 %v3578_v5  ;;  %v4205_v40 = vld [vmem:[#allocation5 + $0xf4] sm:$0xf0]  ;;  %v3791_v42 = vld [vmem:[#allocation5 + $0xf8] sm:$0xf0]  ;;  %v3765_v43 = vld [vmem:[#allocation5 + $0xc0] sm:$0xf] }
  0x24   :  { %360 = vmatpush.bf16.msra.mxu2 %v3582_v6  ;;  %393 = vmatpush.bf16.msra.mxu3 %v3586_v10  ;;  %v4200_v44 = vld [vmem:[#allocation5 + $0xcc] sm:$0xf0]  ;;  %v4198_v45 = vld [vmem:[#allocation5 + $0xc4] sm:$0xf]  ;;  %v3767_v46 = vld [vmem:[#allocation5 + $0xd0] sm:$0xf0]  ;;  %v4662_v47 = vor.u32 %v4205_v40, %v3789_v39  ;;  %v4665_v48 = vor.u32 %v4203_v38, %v3791_v42 }
  0x25   :  { %v4667_v49 = vor.u32 %v4200_v44, %v3765_v43  ;;  %v4199_v50 = vld [vmem:[#allocation5 + $0xcc] sm:$0xf]  ;;  %v3773_v51 = vld [vmem:[#allocation5 + $0xc8] sm:$0xf]  ;;  %v4201_v52 = vld [vmem:[#allocation5 + $0xd4] sm:$0xf0]  ;;  %v4670_v53 = vor.u32 %v4198_v45, %v3767_v46 }
  0x26   :  { %295 = vmatpush.bf16.msra.mxu0 %v3558_v16  ;;  %v3775_v54 = vld [vmem:[#allocation5 + $0xd8] sm:$0xf0]  ;;  %v3749_v55 = vld [vmem:[#allocation5 + $0xa0] sm:$0xf]  ;;  %v4196_v56 = vld [vmem:[#allocation5 + $0xac] sm:$0xf0]  ;;  %v4673_v59 = vor.u32 %v4201_v52, %v3773_v51 }
  0x27   :  { %328 = vmatpush.bf16.msra.mxu1 %v3562_v18  ;;  %v4194_v57 = vld [vmem:[#allocation5 + $0xa4] sm:$0xf]  ;;  %v3751_v58 = vld [vmem:[#allocation5 + $0xb0] sm:$0xf0]  ;;  %v4677_v60 = vor.u32 %v4199_v50, %v3775_v54  ;;  %v4679_v61 = vor.u32 %v4196_v56, %v3749_v55  ;;  %v4195_v62 = vld [vmem:[#allocation5 + $0xac] sm:$0xf] }
  0x28   :  { %361 = vmatpush.bf16.msra.mxu2 %v3566_v19  ;;  %394 = vmatpush.bf16.msra.mxu3 %v3570_v23  ;;  %v3757_v63 = vld [vmem:[#allocation5 + $0xa8] sm:$0xf]  ;;  %v4197_v0 = vld [vmem:[#allocation5 + $0xb4] sm:$0xf0]  ;;  %v4682_v1 = vor.u32 %v4194_v57, %v3751_v58  ;;  %v3759_v2 = vld [vmem:[#allocation5 + $0xb8] sm:$0xf0] }
  0x29   :  { %v3733_v3 = vld [vmem:[#allocation5 + $0x80] sm:$0xf]  ;;  %v4192_v4 = vld [vmem:[#allocation5 + $0x8c] sm:$0xf0]  ;;  %v4190_v5 = vld [vmem:[#allocation5 + $0x84] sm:$0xf]  ;;  %v4685_v7 = vor.u32 %v4197_v0, %v3757_v63  ;;  %v4689_v8 = vor.u32 %v4195_v62, %v3759_v2 }
  0x2a   :  { %296 = vmatpush.bf16.msra.mxu0 %v3542_v30  ;;  %v3735_v6 = vld [vmem:[#allocation5 + $0x90] sm:$0xf0]  ;;  %v4691_v9 = vor.u32 %v4192_v4, %v3733_v3  ;;  %v4191_v10 = vld [vmem:[#allocation5 + $0x8c] sm:$0xf]  ;;  %v3741_v11 = vld [vmem:[#allocation5 + $0x88] sm:$0xf] }
  0x2b   :  { %329 = vmatpush.bf16.msra.mxu1 %v3546_v33  ;;  %v4193_v12 = vld [vmem:[#allocation5 + $0x94] sm:$0xf0]  ;;  %v4694_v13 = vor.u32 %v4190_v5, %v3735_v6  ;;  %v3743_v14 = vld [vmem:[#allocation5 + $0x98] sm:$0xf0]  ;;  %v3717_v15 = vld [vmem:[#allocation5 + $0x60] sm:$0xf] }
  0x2c   :  { %362 = vmatpush.bf16.msra.mxu2 %v3550_v34  ;;  %395 = vmatpush.bf16.msra.mxu3 %v3554_v36  ;;  %v4188_v16 = vld [vmem:[#allocation5 + $0x6c] sm:$0xf0]  ;;  %v4186_v17 = vld [vmem:[#allocation5 + $0x64] sm:$0xf]  ;;  %v3719_v18 = vld [vmem:[#allocation5 + $0x70] sm:$0xf0]  ;;  %v4697_v19 = vor.u32 %v4193_v12, %v3741_v11  ;;  %v4701_v20 = vor.u32 %v4191_v10, %v3743_v14 }
  0x2d   :  { %297 = vmatmul.bf16.vlgmr.msra.gmra.mxu0 %v4138_v35  ;;  %v4703_v21 = vor.u32 %v4188_v16, %v3717_v15  ;;  %v4139_v22 = vld [vmem:[%s5920_s0 + $0x8] sm:$0xff]  ;;  %v4709_v23 = vor.u32 %v4186_v17, %v3719_v18  ;;  %v3727_v25 = vld [vmem:[#allocation5 + $0x78] sm:$0xf0]  ;;  %v3701_v27 = vld [vmem:[#allocation5 + $0x40] sm:$0xf] }
  0x2e   :  { %653 = vmatpush.bf16.msrb.mxu0 %v4658_v37  ;;  %330 = vmatmul.bf16.vlgmr.msra.gmra.mxu1 %v4138_v35  ;;  %v4187_v24 = vld [vmem:[#allocation5 + $0x6c] sm:$0xf]  ;;  %v4184_v28 = vld [vmem:[#allocation5 + $0x4c] sm:$0xf0]  ;;  %v4182_v29 = vld [vmem:[#allocation5 + $0x44] sm:$0xf] }
  0x2f   :  { %666 = vmatpush.bf16.msrb.mxu1 %v4660_v41  ;;  %363 = vmatmul.bf16.vlgmr.msra.gmra.mxu2 %v4138_v35  ;;  %v4714_v26 = vor.u32 %v4187_v24, %v3727_v25  ;;  %v4718_v30 = vor.u32 %v4184_v28, %v3701_v27  ;;  %v3703_v31 = vld [vmem:[#allocation5 + $0x50] sm:$0xf0]  ;;  %v3725_v32 = vld [vmem:[#allocation5 + $0x68] sm:$0xf]  ;;  %v4189_v33 = vld [vmem:[#allocation5 + $0x74] sm:$0xf0] }
  0x30   :  { %396 = vmatmul.bf16.vlgmr.msra.gmra.mxu3 %v4138_v35  ;;  %679 = vmatpush.bf16.msrb.mxu2 %v4662_v47  ;;  %v4720_v34 = vor.u32 %v4182_v29, %v3703_v31  ;;  %v4722_v35 = vor.u32 %v4189_v33, %v3725_v32  ;;  %v4183_v36 = vld [vmem:[#allocation5 + $0x4c] sm:$0xf]  ;;  %v3711_v38 = vld [vmem:[#allocation5 + $0x58] sm:$0xf0]  ;;  %v3685_v39 = vld [vmem:[#allocation5 + $0x20] sm:$0xf] }
  0x31   :  { %692 = vmatpush.bf16.msrb.mxu3 %v4665_v48  ;;  %v4725_v40 = vor.u32 %v4183_v36, %v3711_v38  ;;  %v4180_v42 = vld [vmem:[#allocation5 + $0x2c] sm:$0xf0]  ;;  %v4178_v43 = vld [vmem:[#allocation5 + $0x24] sm:$0xf]  ;;  %v3687_v44 = vld [vmem:[#allocation5 + $0x30] sm:$0xf0] }
  0x32   :  { %654 = vmatpush.bf16.msrb.mxu0 %v4667_v49  ;;  %v4729_v45 = vor.u32 %v4180_v42, %v3685_v39  ;;  %v4731_v46 = vor.u32 %v4178_v43, %v3687_v44  ;;  %v4140_v50 = vld [vmem:[%s5920_s0 + $0x10] sm:$0xff]  ;;  %v3709_v51 = vld [vmem:[#allocation5 + $0x48] sm:$0xf]  ;;  %v4185_v52 = vld [vmem:[#allocation5 + $0x54] sm:$0xf0]  ;;  %v5925_v25 = vmov 0  }
  0x33   :  { %667 = vmatpush.bf16.msrb.mxu1 %v4670_v53  ;;  %v4179_v54 = vld [vmem:[#allocation5 + $0x2c] sm:$0xf]  ;;  %v4739_v55 = vor.u32 %v4185_v52, %v3709_v51  ;;  %v3695_v56 = vld [vmem:[#allocation5 + $0x38] sm:$0xf0]  ;;  %v3669_v57 = vld [vmem:[#allocation5] sm:$0xf] }
  0x34   :  { %680 = vmatpush.bf16.msrb.mxu2 %v4673_v59  ;;  %v4176_v58 = vld [vmem:[#allocation5 + $0xc] sm:$0xf0]  ;;  %v4741_v62 = vor.u32 %v4179_v54, %v3695_v56  ;;  %v4174_v0 = vld [vmem:[#allocation5 + $0x4] sm:$0xf]  ;;  %v3671_v2 = vld [vmem:[#allocation5 + $0x10] sm:$0xf0] }
  0x35   :  { %693 = vmatpush.bf16.msrb.mxu3 %v4677_v60  ;;  %v4743_v63 = vor.u32 %v4176_v58, %v3669_v57  ;;  %v3693_v3 = vld [vmem:[#allocation5 + $0x28] sm:$0xf]  ;;  %v4746_v4 = vor.u32 %v4174_v0, %v3671_v2  ;;  %v4181_v5 = vld [vmem:[#allocation5 + $0x34] sm:$0xf0]  ;;  %v4175_v6 = vld [vmem:[#allocation5 + $0xc] sm:$0xf] }
  0x36   :  { %655 = vmatpush.bf16.msrb.mxu0 %v4679_v61  ;;  %v3679_v10 = vld [vmem:[#allocation5 + $0x18] sm:$0xf0]  ;;  %v4750_v11 = vor.u32 %v4181_v5, %v3693_v3  ;;  %v3677_v14 = vld [vmem:[#allocation5 + $0x8] sm:$0xf]  ;;  %v4177_v15 = vld [vmem:[#allocation5 + $0x14] sm:$0xf0] }
  0x37   :  { %668 = vmatpush.bf16.msrb.mxu1 %v4682_v1  ;;  %v4752_v12 = vor.u32 %v4175_v6, %v3679_v10  ;;  %v4758_v16 = vor.u32 %v4177_v15, %v3677_v14  ;;  %v4141_v17 = vld [vmem:[%s5920_s0 + $0x18] sm:$0xff]  ;;  %v58_v18 = vld [vmem:[%s5920_s0 + $0x20] sm:$0xf] }
  0x38   :  { %681 = vmatpush.bf16.msrb.mxu2 %v4685_v7  ;;  %v91_v36 = vld [vmem:[%s5923_s3] sm:$0xf] }
  0x39   :  { %694 = vmatpush.bf16.msrb.mxu3 %v4689_v8  ;;  %v4845_v38 = vperm.slane %v91_v36, 0  ;;  %v4849_v42 = vperm.slane %v91_v36, 1  ;;  %v4859_v54 = vperm.slane %v91_v36, 2  ;;  %v4861_v56 = vperm.slane %v91_v36, 3 }
  0x3a   :  { %656 = vmatpush.bf16.msrb.mxu0 %v4691_v9 }
  0x3b   :  { %669 = vmatpush.bf16.msrb.mxu1 %v4694_v13 }
  0x3c   :  { %682 = vmatpush.bf16.msrb.mxu2 %v4697_v19 }
  0x3d   :  { %695 = vmatpush.bf16.msrb.mxu3 %v4701_v20  ;;  %302 = vmatmul.bf16.gmra.mxu0 %v4139_v22 }
  0x3e   :  { %657 = vmatpush.bf16.msrb.mxu0 %v4703_v21  ;;  %335 = vmatmul.bf16.gmra.mxu1 %v4139_v22 }
  0x3f   :  { %670 = vmatpush.bf16.msrb.mxu1 %v4709_v23  ;;  %368 = vmatmul.bf16.gmra.mxu2 %v4139_v22 }
  0x40   :  { %401 = vmatmul.bf16.gmra.mxu3 %v4139_v22  ;;  %683 = vmatpush.bf16.msrb.mxu2 %v4722_v35  ;;  %v118_v22 = vunpack.c.l.b16 %v58_v18 }
  0x41   :  { %696 = vmatpush.bf16.msrb.mxu3 %v4714_v26 }
  0x42   :  { %658 = vmatpush.bf16.msrb.mxu0 %v4718_v30  ;;  %v123_v24 = vpack.c.b16 %v118_v22, %v118_v22 }
  0x43   :  { %671 = vmatpush.bf16.msrb.mxu1 %v4720_v34 }
  0x44   :  { %684 = vmatpush.bf16.msrb.mxu2 %v4739_v55 }
  0x45   :  { %697 = vmatpush.bf16.msrb.mxu3 %v4725_v40 }
  0x46   :  { %659 = vmatpush.bf16.msrb.mxu0 %v4729_v45 }
  0x47   :  { %672 = vmatpush.bf16.msrb.mxu1 %v4731_v46 }
  0x48   :  { %685 = vmatpush.bf16.msrb.mxu2 %v4750_v11 }
  0x49   :  { %698 = vmatpush.bf16.msrb.mxu3 %v4741_v62 }
  0x4a   :  { %660 = vmatpush.bf16.msrb.mxu0 %v4743_v63 }
  0x4b   :  { %673 = vmatpush.bf16.msrb.mxu1 %v4746_v4 }
  0x4c   :  { %686 = vmatpush.bf16.msrb.mxu2 %v4758_v16 }
  0x4d   :  { %307 = vmatmul.bf16.gmra.mxu0 %v4140_v50  ;;  %699 = vmatpush.bf16.msrb.mxu3 %v4752_v12 }
  0x4e   :  { %340 = vmatmul.bf16.gmra.mxu1 %v4140_v50  ;;  %779 = vmatpush.bf16.msra.mxu0 %v4658_v37 }
  0x4f   :  { %373 = vmatmul.bf16.gmra.mxu2 %v4140_v50  ;;  %792 = vmatpush.bf16.msra.mxu1 %v4660_v41 }
  0x50   :  { %406 = vmatmul.bf16.gmra.mxu3 %v4140_v50  ;;  %805 = vmatpush.bf16.msra.mxu2 %v4662_v47 }
  0x51   :  { %818 = vmatpush.bf16.msra.mxu3 %v4665_v48 }
  0x52   :  { %780 = vmatpush.bf16.msra.mxu0 %v4667_v49 }
  0x53   :  { %793 = vmatpush.bf16.msra.mxu1 %v4670_v53 }
  0x54   :  { %806 = vmatpush.bf16.msra.mxu2 %v4673_v59 }
  0x55   :  { %819 = vmatpush.bf16.msra.mxu3 %v4677_v60 }
  0x56   :  { %781 = vmatpush.bf16.msra.mxu0 %v4679_v61 }
  0x57   :  { %794 = vmatpush.bf16.msra.mxu1 %v4682_v1 }
  0x58   :  { %807 = vmatpush.bf16.msra.mxu2 %v4685_v7 }
  0x59   :  { %820 = vmatpush.bf16.msra.mxu3 %v4689_v8 }
  0x5a   :  { %782 = vmatpush.bf16.msra.mxu0 %v4691_v9 }
  0x5b   :  { %795 = vmatpush.bf16.msra.mxu1 %v4694_v13 }
  0x5c   :  { %808 = vmatpush.bf16.msra.mxu2 %v4697_v19 }
  0x5d   :  { %312 = vmatmul.bf16.gmra.mxu0 %v4141_v17  ;;  %821 = vmatpush.bf16.msra.mxu3 %v4701_v20 }
  0x5e   :  { %345 = vmatmul.bf16.gmra.mxu1 %v4141_v17  ;;  %783 = vmatpush.bf16.msra.mxu0 %v4703_v21 }
  0x5f   :  { %378 = vmatmul.bf16.gmra.mxu2 %v4141_v17  ;;  %796 = vmatpush.bf16.msra.mxu1 %v4709_v23 }
  0x60   :  { %411 = vmatmul.bf16.gmra.mxu3 %v4141_v17  ;;  %809 = vmatpush.bf16.msra.mxu2 %v4722_v35 }
  0x61   :  { %822 = vmatpush.bf16.msra.mxu3 %v4714_v26 }
  0x62   :  { %784 = vmatpush.bf16.msra.mxu0 %v4718_v30 }
  0x63   :  { %797 = vmatpush.bf16.msra.mxu1 %v4720_v34 }
  0x64   :  { %810 = vmatpush.bf16.msra.mxu2 %v4739_v55 }
  0x65   :  { %823 = vmatpush.bf16.msra.mxu3 %v4725_v40 }
  0x66   :  { %785 = vmatpush.bf16.msra.mxu0 %v4729_v45 }
  0x67   :  { %798 = vmatpush.bf16.msra.mxu1 %v4731_v46 }
  0x68   :  { %811 = vmatpush.bf16.msra.mxu2 %v4750_v11 }
  0x69   :  { %824 = vmatpush.bf16.msra.mxu3 %v4741_v62 }
  0x6a   :  { %786 = vmatpush.bf16.msra.mxu0 %v4743_v63 }
  0x6b   :  { %799 = vmatpush.bf16.msra.mxu1 %v4746_v4 }
  0x6c   :  { %812 = vmatpush.bf16.msra.mxu2 %v4758_v16 }
  0x6d   :  { %317 = vmatmul.bf16.gmra.mxu0 %v123_v24  ;;  %825 = vmatpush.bf16.msra.mxu3 %v4752_v12 }
  0x6e   :  { %350 = vmatmul.bf16.gmra.mxu1 %v123_v24 }
  0x6f   :  { %383 = vmatmul.bf16.gmra.mxu2 %v123_v24 }
  0x70   :  { %416 = vmatmul.bf16.gmra.mxu3 %v123_v24 }
  0x7d   :  { %661 = vmatmul.bf16.vlgmr.msrb.gmra.mxu0 %v5925_v25 }
  0x7e   :  { %674 = vmatmul.bf16.vlgmr.msrb.gmra.mxu1 %v5925_v25  ;;  %906 = vmatpush.bf16.msrb.mxu0 %v4658_v37 }
  0x7f   :  { %687 = vmatmul.bf16.vlgmr.msrb.gmra.mxu2 %v5925_v25  ;;  %919 = vmatpush.bf16.msrb.mxu1 %v4660_v41 }
  0x80   :  { %700 = vmatmul.bf16.vlgmr.msrb.gmra.mxu3 %v5925_v25  ;;  %932 = vmatpush.bf16.msrb.mxu2 %v4662_v47 }
  0x81   :  { %945 = vmatpush.bf16.msrb.mxu3 %v4665_v48 }
  0x82   :  { %907 = vmatpush.bf16.msrb.mxu0 %v4667_v49 }
  0x83   :  { %920 = vmatpush.bf16.msrb.mxu1 %v4670_v53 }
  0x84   :  { %933 = vmatpush.bf16.msrb.mxu2 %v4673_v59 }
  0x85   :  { %946 = vmatpush.bf16.msrb.mxu3 %v4677_v60 }
  0x86   :  { %908 = vmatpush.bf16.msrb.mxu0 %v4679_v61 }
  0x87   :  { %921 = vmatpush.bf16.msrb.mxu1 %v4682_v1 }
  0x88   :  { %934 = vmatpush.bf16.msrb.mxu2 %v4685_v7 }
  0x89   :  { %947 = vmatpush.bf16.msrb.mxu3 %v4689_v8 }
  0x8a   :  { %909 = vmatpush.bf16.msrb.mxu0 %v4691_v9 }
  0x8b   :  { %922 = vmatpush.bf16.msrb.mxu1 %v4694_v13 }
  0x8c   :  { %935 = vmatpush.bf16.msrb.mxu2 %v4697_v19 }
  0x8d   :  { %948 = vmatpush.bf16.msrb.mxu3 %v4701_v20 }
  0x8e   :  { %910 = vmatpush.bf16.msrb.mxu0 %v4703_v21 }
  0x8f   :  { %923 = vmatpush.bf16.msrb.mxu1 %v4709_v23 }
  0x90   :  { %936 = vmatpush.bf16.msrb.mxu2 %v4722_v35 }
  0x91   :  { %949 = vmatpush.bf16.msrb.mxu3 %v4714_v26 }
  0x92   :  { %911 = vmatpush.bf16.msrb.mxu0 %v4718_v30 }
  0x93   :  { %924 = vmatpush.bf16.msrb.mxu1 %v4720_v34 }
  0x94   :  { %937 = vmatpush.bf16.msrb.mxu2 %v4739_v55 }
  0x95   :  { %950 = vmatpush.bf16.msrb.mxu3 %v4725_v40 }
  0x96   :  { %912 = vmatpush.bf16.msrb.mxu0 %v4729_v45 }
  0x97   :  { %925 = vmatpush.bf16.msrb.mxu1 %v4731_v46 }
  0x98   :  { %938 = vmatpush.bf16.msrb.mxu2 %v4750_v11 }
  0x99   :  { %951 = vmatpush.bf16.msrb.mxu3 %v4741_v62 }
  0x9a   :  { %913 = vmatpush.bf16.msrb.mxu0 %v4743_v63 }
  0x9b   :  { %926 = vmatpush.bf16.msrb.mxu1 %v4746_v4 }
  0x9c   :  { %939 = vmatpush.bf16.msrb.mxu2 %v4758_v16 }
  0x9d   :  { %952 = vmatpush.bf16.msrb.mxu3 %v4752_v12 }
  0xaa   :  { %v298_v27 = vpop.f32.mrf.mxu0 }
  0xab   :  { %v331_v28 = vpop.f32.mrf.mxu1 }
  0xb2   :  { %v4834_v29 = vpop.f32.mrf.mxu2  ;;  %v4838_v32 = vpop.f32.mrf.mxu0 }
  0xb3   :  { %v4836_v31 = vpop.f32.mrf.mxu3  ;;  %v4840_v33 = vpop.f32.mrf.mxu1 }
  0xba   :  { %v4847_v39 = vpop.f32.mrf.mxu2  ;;  %v303_v44 = vpop.f32.mrf.mxu0 }
  0xbb   :  { %5929 = vst [vmem:[#allocation9_spill] sm:$0xff] %v4847_v39  ;;  %v4851_v43 = vpop.f32.mrf.mxu3  ;;  %v4854_v50 = vadd.f32 %v303_v44, %v4845_v38  ;;  %v336_v51 = vpop.f32.mrf.mxu1 }
  0xbc   :  { %v4857_v52 = vadd.f32 %v336_v51, %v4849_v42 }
  0xbd   :  { %5930 = vst [vmem:[#allocation10_spill] sm:$0xff] %v4854_v50 }
  0xbe   :  { %5931 = vst [vmem:[#allocation11_spill] sm:$0xff] %v4857_v52 }
  0xc2   :  { %v369_v57 = vpop.f32.mrf.mxu2  ;;  %v4866_v2 = vpop.f32.mrf.mxu0 }
  0xc3   :  { %v4864_v58 = vadd.f32 %v369_v57, %v4859_v54  ;;  %v402_v0 = vpop.f32.mrf.mxu3  ;;  %5933 = vst [vmem:[#allocation13_spill] sm:$0xff] %v4866_v2  ;;  %v4871_v5 = vpop.f32.mrf.mxu1 }
  0xc4   :  { %v4869_v3 = vadd.f32 %v402_v0, %v4861_v56  ;;  %5935 = vst [vmem:[#allocation15_spill] sm:$0xff] %v4871_v5 }
  0xc5   :  { %5932 = vst [vmem:[#allocation12_spill] sm:$0xff] %v4864_v58 }
  0xc6   :  { %5934 = vst [vmem:[#allocation14_spill] sm:$0xff] %v4869_v3 }
  0xca   :  { %v4873_v6 = vpop.f32.mrf.mxu2  ;;  %v308_v14 = vpop.f32.mrf.mxu0 }
  0xcb   :  { %5936 = vst [vmem:[#allocation16_spill] sm:$0xff] %v4873_v6  ;;  %v4875_v10 = vpop.f32.mrf.mxu3  ;;  %v4878_v15 = vadd.f32 %v308_v14, %v4845_v38  ;;  %v341_v17 = vpop.f32.mrf.mxu1 }
  0xcc   :  { %5937 = vst [vmem:[#allocation17_spill] sm:$0xff] %v4875_v10  ;;  %v4881_v18 = vadd.f32 %v341_v17, %v4849_v42 }
  0xcd   :  { %5938 = vst [vmem:[#allocation18_spill] sm:$0xff] %v4878_v15 }
  0xce   :  { %5939 = vst [vmem:[#allocation19_spill] sm:$0xff] %v4881_v18 }
  0xd2   :  { %v374_v22 = vpop.f32.mrf.mxu2  ;;  %v4886_v44 = vpop.f32.mrf.mxu0 }
  0xd3   :  { %v4884_v24 = vadd.f32 %v374_v22, %v4859_v54  ;;  %v407_v36 = vpop.f32.mrf.mxu3  ;;  %5941 = vst [vmem:[#allocation21_spill] sm:$0xff] %v4886_v44  ;;  %v4891_v57 = vpop.f32.mrf.mxu1 }
  0xd4   :  { %v4889_v51 = vadd.f32 %v407_v36, %v4861_v56  ;;  %5943 = vst [vmem:[#allocation23_spill] sm:$0xff] %v4891_v57 }
  0xd5   :  { %5940 = vst [vmem:[#allocation20_spill] sm:$0xff] %v4884_v24 }
  0xd6   :  { %5942 = vst [vmem:[#allocation22_spill] sm:$0xff] %v4889_v51 }
  0xda   :  { %v4893_v0 = vpop.f32.mrf.mxu2  ;;  %v313_v25 = vpop.f32.mrf.mxu0 }
  0xdb   :  { %5944 = vst [vmem:[#allocation24_spill] sm:$0xff] %v4893_v0  ;;  %v4895_v14 = vpop.f32.mrf.mxu3  ;;  %v4898_v17 = vadd.f32 %v313_v25, %v4845_v38  ;;  %v346_v18 = vpop.f32.mrf.mxu1 }
  0xdc   :  { %5945 = vst [vmem:[#allocation25_spill] sm:$0xff] %v4895_v14  ;;  %v4901_v22 = vadd.f32 %v346_v18, %v4849_v42 }
  0xdd   :  { %5946 = vst [vmem:[#allocation26_spill] sm:$0xff] %v4898_v17 }
  0xde   :  { %5947 = vst [vmem:[#allocation27_spill] sm:$0xff] %v4901_v22 }
  0xe2   :  { %v379_v24 = vpop.f32.mrf.mxu2  ;;  %v4906_v51 = vpop.f32.mrf.mxu0 }
  0xe3   :  { %v4904_v44 = vadd.f32 %v379_v24, %v4859_v54  ;;  %v412_v36 = vpop.f32.mrf.mxu3  ;;  %5949 = vst [vmem:[#allocation29_spill] sm:$0xff] %v4906_v51  ;;  %v4911_v0 = vpop.f32.mrf.mxu1 }
  0xe4   :  { %v4909_v57 = vadd.f32 %v412_v36, %v4861_v56  ;;  %5951 = vst [vmem:[#allocation31_spill] sm:$0xff] %v4911_v0 }
  0xe5   :  { %5948 = vst [vmem:[#allocation28_spill] sm:$0xff] %v4904_v44 }
  0xe6   :  { %5950 = vst [vmem:[#allocation30_spill] sm:$0xff] %v4909_v57 }
  0xea   :  { %v4913_v14 = vpop.f32.mrf.mxu2  ;;  %v318_v17 = vpop.f32.mrf.mxu0 }
  0xeb   :  { %5952 = vst [vmem:[#allocation32_spill] sm:$0xff] %v4913_v14  ;;  %v4915_v25 = vpop.f32.mrf.mxu3  ;;  %v4918_v18 = vadd.f32 %v318_v17, %v4845_v38  ;;  %v351_v22 = vpop.f32.mrf.mxu1  ;;  %v332_v17 = vadd.f32 %v331_v28, %v4849_v42 }
  0xec   :  { %5953 = vst [vmem:[#allocation33_spill] sm:$0xff] %v4915_v25  ;;  %v4921_v24 = vadd.f32 %v351_v22, %v4849_v42  ;;  %v299_v25 = vadd.f32 %v298_v27, %v4845_v38 }
  0xed   :  { %5954 = vst [vmem:[#allocation34_spill] sm:$0xff] %v4918_v18 }
  0xee   :  { %5955 = vst [vmem:[#allocation35_spill] sm:$0xff] %v4921_v24 }
  0xf2   :  { %v384_v44 = vpop.f32.mrf.mxu2  ;;  %v320_v57 = vpop.f32.mrf.mxu0 }
  0xf3   :  { %v4924_v51 = vadd.f32 %v384_v44, %v4859_v54  ;;  %v417_v36 = vpop.f32.mrf.mxu3  ;;  %v353_v14 = vpop.f32.mrf.mxu1  ;;  %v398_v44 = vadd.f32 %v4836_v31, %v4861_v56 }
  0xf4   :  { %v4927_v0 = vadd.f32 %v417_v36, %v4861_v56 }
  0xf5   :  { %5956 = vst [vmem:[#allocation36_spill] sm:$0xff] %v4924_v51 }
  0xf6   :  { %5957 = vst [vmem:[#allocation37_spill] sm:$0xff] %v4927_v0 }
  0xfa   :  { %v386_v15 = vpop.f32.mrf.mxu2  ;;  %v662_v6 = vpop.f32.mrf.mxu0 }
  0xfb   :  { %v419_v18 = vpop.f32.mrf.mxu3  ;;  %v705_v10 = vadd.f32 %v662_v6, %v299_v25  ;;  %v675_v22 = vpop.f32.mrf.mxu1 }
  0xfc   :  { %v706_v24 = vadd.f32 %v675_v22, %v332_v17 }
  0xfd   :  { %v3795_v5 = vmul.f32 -1.442695, %v705_v10 }
  0xfe   :  { %v3796_v2 = vmul.f32 -1.442695, %v706_v24 }
  0xff   :  { %4279 = vpow2.f32 %v3795_v5 }
 0x100   :  { %4281 = vpow2.f32 %v3796_v2  ;;  %v365_v2 = vadd.f32 %v4834_v29, %v4859_v54 }
 0x102   :  { %v688_v57 = vpop.f32.mrf.mxu2  ;;  %v664_v14 = vpop.f32.mrf.mxu0 }
 0x103   :  { %v701_v36 = vpop.f32.mrf.mxu3  ;;  %v677_v27 = vpop.f32.mrf.mxu1  ;;  %v707_v25 = vadd.f32 %v688_v57, %v365_v2 }
 0x104   :  { %v708_v51 = vadd.f32 %v701_v36, %v398_v44 }
 0x105   :  { %v4280_v15 = vpop.eup %4279 }
 0x106   :  { %v3797_v0 = vmul.f32 -1.442695, %v708_v51  ;;  %v4282_v28 = vpop.eup %4281  ;;  %v712_v18 = vadd.f32 1.0, %v4280_v15 }
 0x107   :  { %v731_v58 = vadd.f32 1.0, %v4282_v28 }
 0x108   :  { %4283 = vpow2.f32 %v3797_v0  ;;  %v724_v14 = vand.u32 2147483648, %v712_v18  ;;  %v722_v15 = vand.u32 2147483647, %v712_v18  ;;  %vm718_vm2 = vweird.f32 %v712_v18 }
 0x109   :  { %4285 = vrcp.f32 %v712_v18  ;;  %v743_v0 = vand.u32 2147483648, %v731_v58  ;;  %vm737_vm3 = vweird.f32 %v731_v58 }
 0x10a   :  { %4287 = vrcp.f32 %v731_v58  ;;  %v690_v6 = vpop.f32.mrf.mxu2  ;;  %v725_v57 = vor.u32 1.1754944e-38, %v724_v14  ;;  %vm723_vm5 = vcmp.eq.f32.partialorder %v722_v15, 8.507059e+37 }
 0x10b   :  { %v703_v10 = vpop.f32.mrf.mxu3  ;;  %v741_v6 = vand.u32 2147483647, %v731_v58 }
 0x10d   :  { %vm742_vm7 = vcmp.eq.f32.partialorder %v741_v6, 8.507059e+37 }
 0x10e   :  { %v4284_v5 = vpop.eup %4283 }
 0x10f   :  { %v4286_v31 = vpop.eup %4285  ;;  %v751_v24 = vadd.f32 1.0, %v4284_v5  ;;  %v744_v5 = vor.u32 1.1754944e-38, %v743_v0 }
 0x110   :  { %v4288_v17 = vpop.eup %4287  ;;  %v714_v22 = vmul.f32 %v4286_v31, %v712_v18  ;;  %vm719_vm0 = vweird.f32 %v4286_v31 }
 0x111   :  { %v733_v44 = vmul.f32 %v4288_v17, %v731_v58  ;;  %4289 = vrcp.f32 %v751_v24  ;;  %vm738_vm1 = vweird.f32 %v4288_v17  ;;  %vm720_vm4 = vmor %vm718_vm2, %vm719_vm0  ;;  %v763_v14 = vand.u32 2147483648, %v751_v24 }
 0x112   :  { %v715_v51 = vsub.f32 1.0, %v714_v22  ;;  %4291 = vtanh.f32 %v707_v25  ;;  %vm739_vm6 = vmor %vm737_vm3, %vm738_vm1  ;;  %vm757_vm9 = vweird.f32 %v751_v24 }
 0x113   :  { %v734_v36 = vsub.f32 1.0, %v733_v44  ;;  %v764_v15 = vor.u32 1.1754944e-38, %v763_v14 }
 0x114   :  { %v716_v27 = vmul.f32 %v4286_v31, %v715_v51 }
 0x115   :  { %v735_v28 = vmul.f32 %v4288_v17, %v734_v36 }
 0x116   :  { %v717_v29 = vadd.f32 %v4286_v31, %v716_v27 }
 0x117   :  { %v4290_v10 = vpop.eup %4289  ;;  %v736_v2 = vadd.f32 %v4288_v17, %v735_v28 }
 0x118   :  { %v721_v3 = vsel %vm720_vm4, %v4286_v31, %v717_v29  ;;  %v753_v22 = vmul.f32 %v4290_v10, %v751_v24  ;;  %v4292_v25 = vpop.eup %4291  ;;  %vm758_vm8 = vweird.f32 %v4290_v10  ;;  %v761_v31 = vand.u32 2147483647, %v751_v24 }
 0x119   :  { %v726_v44 = vsel %vm723_vm5, %v725_v57, %v721_v3  ;;  %v740_v51 = vsel %vm739_vm6, %v4288_v17, %v736_v2  ;;  %vm759_vm10 = vmor %vm757_vm9, %vm758_vm8 }
 0x11a   :  { %v745_v52 = vsel %vm742_vm7, %v744_v5, %v740_v51  ;;  %v768_v36 = vmul.f32 %v4292_v25, %v726_v44  ;;  %v754_v50 = vsub.f32 1.0, %v753_v22  ;;  %vm762_vm11 = vcmp.eq.f32.partialorder %v761_v31, 8.507059e+37 }
 0x11b   :  { %v767_v39 = vmul.f32 0.0, %v745_v52  ;;  %v400_v5 = vadd.f32 %v4851_v43, %v4861_v56 }
 0x11c   :  { %v755_v27 = vmul.f32 %v4290_v10, %v754_v50  ;;  %v334_v50 = vadd.f32 %v4840_v33, %v4849_v42 }
 0x11d   :  { %v4935_v18 = vadd.f32 %v768_v36, %v767_v39  ;;  %v301_v39 = vadd.f32 %v4838_v32, %v4845_v38 }
 0x11e   :  { %v756_v58 = vadd.f32 %v4290_v10, %v755_v27 }
 0x11f   :  { %4293 = vtanh.f32 %v4935_v18 }
 0x120   :  { %v760_v0 = vsel %vm759_vm10, %v4290_v10, %v756_v58 }
 0x121   :  { %v765_v17 = vsel %vm762_vm11, %v764_v15, %v760_v0 }
 0x125   :  { %v4294_v3 = vpop.eup %4293 }
 0x126   :  { %v771_v28 = vmul.f32 %v4294_v3, %v765_v17  ;;  %v5958_v3 = vld [vmem:[#allocation9_spill] sm:$0xff] }
 0x127   :  { %v367_v43 = vadd.f32 %v5958_v3, %v4859_v54 }
 0x128   :  { %v772_v6 = vpack.c.bf16 %v771_v28, %v771_v28 }
 0x12a   :  { %773 = vst [vmem:[%s5924_s4] sm:$0xf] %v772_v6  ;;  %787 = vmatmul.bf16.vlgmr.msra.gmra.mxu0 %v772_v6  ;;  %800 = vmatmul.bf16.vlgmr.msra.gmra.mxu1 %v772_v6 }
 0x12b   :  { %813 = vmatmul.bf16.vlgmr.msra.gmra.mxu2 %v772_v6  ;;  %826 = vmatmul.bf16.vlgmr.msra.gmra.mxu3 %v772_v6 }
 0x12c   :  { %1033 = vmatpush.bf16.msra.mxu0 %v4658_v37  ;;  %1046 = vmatpush.bf16.msra.mxu1 %v4660_v41 }
 0x12d   :  { %1059 = vmatpush.bf16.msra.mxu2 %v4662_v47  ;;  %1072 = vmatpush.bf16.msra.mxu3 %v4665_v48 }
 0x130   :  { %1034 = vmatpush.bf16.msra.mxu0 %v4667_v49  ;;  %1047 = vmatpush.bf16.msra.mxu1 %v4670_v53 }
 0x131   :  { %1060 = vmatpush.bf16.msra.mxu2 %v4673_v59  ;;  %1073 = vmatpush.bf16.msra.mxu3 %v4677_v60 }
 0x134   :  { %1035 = vmatpush.bf16.msra.mxu0 %v4679_v61  ;;  %1048 = vmatpush.bf16.msra.mxu1 %v4682_v1 }
 0x135   :  { %1061 = vmatpush.bf16.msra.mxu2 %v4685_v7  ;;  %1074 = vmatpush.bf16.msra.mxu3 %v4689_v8 }
 0x138   :  { %1036 = vmatpush.bf16.msra.mxu0 %v4691_v9  ;;  %1049 = vmatpush.bf16.msra.mxu1 %v4694_v13 }
 0x139   :  { %1062 = vmatpush.bf16.msra.mxu2 %v4697_v19  ;;  %1075 = vmatpush.bf16.msra.mxu3 %v4701_v20 }
 0x13c   :  { %1037 = vmatpush.bf16.msra.mxu0 %v4703_v21  ;;  %1050 = vmatpush.bf16.msra.mxu1 %v4709_v23 }
 0x13d   :  { %1063 = vmatpush.bf16.msra.mxu2 %v4722_v35  ;;  %1076 = vmatpush.bf16.msra.mxu3 %v4714_v26 }
 0x140   :  { %1038 = vmatpush.bf16.msra.mxu0 %v4718_v30  ;;  %1051 = vmatpush.bf16.msra.mxu1 %v4720_v34 }
 0x141   :  { %1064 = vmatpush.bf16.msra.mxu2 %v4739_v55  ;;  %1077 = vmatpush.bf16.msra.mxu3 %v4725_v40 }
 0x144   :  { %1039 = vmatpush.bf16.msra.mxu0 %v4729_v45  ;;  %1052 = vmatpush.bf16.msra.mxu1 %v4731_v46 }
 0x145   :  { %1065 = vmatpush.bf16.msra.mxu2 %v4750_v11  ;;  %1078 = vmatpush.bf16.msra.mxu3 %v4741_v62 }
 0x148   :  { %1040 = vmatpush.bf16.msra.mxu0 %v4743_v63  ;;  %1053 = vmatpush.bf16.msra.mxu1 %v4746_v4 }
 0x149   :  { %1066 = vmatpush.bf16.msra.mxu2 %v4758_v16  ;;  %1079 = vmatpush.bf16.msra.mxu3 %v4752_v12 }
 0x1a7   :  { %v788_v52 = vpop.f32.mrf.mxu0  ;;  %v801_v24 = vpop.f32.mrf.mxu1 }
 0x1a8   :  { %v831_v29 = vadd.f32 %v788_v52, %v301_v39  ;;  %v832_v10 = vadd.f32 %v801_v24, %v334_v50 }
 0x1aa   :  { %v3798_v57 = vmul.f32 -1.442695, %v831_v29  ;;  %v3799_v2 = vmul.f32 -1.442695, %v832_v10 }
 0x1ac   :  { %4295 = vpow2.f32 %v3798_v57 }
 0x1ad   :  { %4297 = vpow2.f32 %v3799_v2 }
 0x1ae   :  { %v814_v22 = vpop.f32.mrf.mxu2  ;;  %v827_v25 = vpop.f32.mrf.mxu3 }
 0x1af   :  { %v834_v44 = vadd.f32 %v827_v25, %v400_v5  ;;  %v790_v51 = vpop.f32.mrf.mxu0  ;;  %v803_v36 = vpop.f32.mrf.mxu1  ;;  %v833_v6 = vadd.f32 %v814_v22, %v367_v43 }
 0x1b1   :  { %v3800_v32 = vmul.f32 -1.442695, %v834_v44 }
 0x1b2   :  { %v4296_v27 = vpop.eup %4295 }
 0x1b3   :  { %v4298_v58 = vpop.eup %4297  ;;  %v838_v33 = vadd.f32 1.0, %v4296_v27  ;;  %4299 = vpow2.f32 %v3800_v32 }
 0x1b4   :  { %v857_v14 = vadd.f32 1.0, %v4298_v58 }
 0x1b5   :  { %4301 = vrcp.f32 %v838_v33  ;;  %v850_v10 = vand.u32 2147483648, %v838_v33  ;;  %v848_v5 = vand.u32 2147483647, %v838_v33  ;;  %vm844_vm14 = vweird.f32 %v838_v33 }
 0x1b6   :  { %4303 = vrcp.f32 %v857_v14  ;;  %v816_v31 = vpop.f32.mrf.mxu2  ;;  %v829_v0 = vpop.f32.mrf.mxu3  ;;  %v869_v57 = vand.u32 2147483648, %v857_v14  ;;  %v867_v44 = vand.u32 2147483647, %v857_v14  ;;  %vm863_vm15 = vweird.f32 %v857_v14 }
 0x1b7   :  { %v851_v22 = vor.u32 1.1754944e-38, %v850_v10  ;;  %vm849_vm2 = vcmp.eq.f32.partialorder %v848_v5, 8.507059e+37 }
 0x1b8   :  { %v870_v58 = vor.u32 1.1754944e-38, %v869_v57  ;;  %vm868_vm3 = vcmp.eq.f32.partialorder %v867_v44, 8.507059e+37  ;;  %v5959_v44 = vld [vmem:[#allocation10_spill] sm:$0xff] }
 0x1b9   :  { %v4300_v15 = vpop.eup %4299 }
 0x1ba   :  { %v877_v17 = vadd.f32 1.0, %v4300_v15 }
 0x1bb   :  { %v4302_v28 = vpop.eup %4301 }
 0x1bc   :  { %v4304_v39 = vpop.eup %4303  ;;  %v840_v50 = vmul.f32 %v4302_v28, %v838_v33  ;;  %4305 = vrcp.f32 %v877_v17  ;;  %vm845_vm12 = vweird.f32 %v4302_v28  ;;  %vm883_vm5 = vweird.f32 %v877_v17 }
 0x1bd   :  { %v859_v52 = vmul.f32 %v4304_v39, %v857_v14  ;;  %4307 = vtanh.f32 %v833_v6  ;;  %vm864_vm13 = vweird.f32 %v4304_v39  ;;  %vm846_vm0 = vmor %vm844_vm14, %vm845_vm12 }
 0x1be   :  { %v841_v24 = vsub.f32 1.0, %v840_v50  ;;  %vm865_vm1 = vmor %vm863_vm15, %vm864_vm13 }
 0x1bf   :  { %v860_v29 = vsub.f32 1.0, %v859_v52 }
 0x1c0   :  { %v842_v2 = vmul.f32 %v4302_v28, %v841_v24 }
 0x1c1   :  { %v861_v25 = vmul.f32 %v4304_v39, %v860_v29  ;;  %v889_v29 = vand.u32 2147483648, %v877_v17 }
 0x1c2   :  { %v4306_v51 = vpop.eup %4305  ;;  %v843_v36 = vadd.f32 %v4302_v28, %v842_v2 }
 0x1c3   :  { %v862_v32 = vadd.f32 %v4304_v39, %v861_v25  ;;  %v879_v27 = vmul.f32 %v4306_v51, %v877_v17  ;;  %v4308_v0 = vpop.eup %4307  ;;  %vm884_vm4 = vweird.f32 %v4306_v51  ;;  %v890_v57 = vor.u32 1.1754944e-38, %v889_v29 }
 0x1c4   :  { %v847_v31 = vsel %vm846_vm0, %v4302_v28, %v843_v36  ;;  %v887_v28 = vand.u32 2147483647, %v877_v17  ;;  %vm885_vm6 = vmor %vm883_vm5, %vm884_vm4  ;;  %v5960_v36 = vld [vmem:[#allocation11_spill] sm:$0xff] }
 0x1c5   :  { %v852_v15 = vsel %vm849_vm2, %v851_v22, %v847_v31  ;;  %v866_v3 = vsel %vm865_vm1, %v4304_v39, %v862_v32  ;;  %v880_v43 = vsub.f32 1.0, %v879_v27 }
 0x1c6   :  { %v871_v6 = vsel %vm868_vm3, %v870_v58, %v866_v3  ;;  %v894_v50 = vmul.f32 %v4308_v0, %v852_v15  ;;  %vm888_vm7 = vcmp.eq.f32.partialorder %v887_v28, 8.507059e+37  ;;  %v5961_v0 = vld [vmem:[#allocation14_spill] sm:$0xff] }
 0x1c7   :  { %v893_v52 = vmul.f32 %v871_v6, %v4935_v18  ;;  %v881_v24 = vmul.f32 %v4306_v51, %v880_v43 }
 0x1c9   :  { %v4982_v33 = vadd.f32 %v894_v50, %v893_v52  ;;  %v882_v14 = vadd.f32 %v4306_v51, %v881_v24 }
 0x1cb   :  { %4309 = vtanh.f32 %v4982_v33  ;;  %v886_v10 = vsel %vm885_vm6, %v4306_v51, %v882_v14 }
 0x1cc   :  { %v891_v2 = vsel %vm888_vm7, %v890_v57, %v886_v10 }
 0x1d1   :  { %v4310_v39 = vpop.eup %4309 }
 0x1d2   :  { %v897_v5 = vmul.f32 %v4310_v39, %v891_v2  ;;  %v5962_v2 = vld [vmem:[#allocation12_spill] sm:$0xff] }
 0x1d4   :  { %v898_v25 = vpack.c.bf16 %v897_v5, %v897_v5 }
 0x1d6   :  { %3801 = vst [vmem:[%s5924_s4 + $0x4] sm:$0xf] %v898_v25  ;;  %914 = vmatmul.bf16.vlgmr.msrb.gmra.mxu0 %v898_v25  ;;  %927 = vmatmul.bf16.vlgmr.msrb.gmra.mxu1 %v898_v25 }
 0x1d7   :  { %940 = vmatmul.bf16.vlgmr.msrb.gmra.mxu2 %v898_v25  ;;  %953 = vmatmul.bf16.vlgmr.msrb.gmra.mxu3 %v898_v25 }
 0x1d8   :  { %1160 = vmatpush.bf16.msrb.mxu0 %v4658_v37  ;;  %1173 = vmatpush.bf16.msrb.mxu1 %v4660_v41 }
 0x1d9   :  { %1186 = vmatpush.bf16.msrb.mxu2 %v4662_v47  ;;  %1199 = vmatpush.bf16.msrb.mxu3 %v4665_v48 }
 0x1dc   :  { %1161 = vmatpush.bf16.msrb.mxu0 %v4667_v49  ;;  %1174 = vmatpush.bf16.msrb.mxu1 %v4670_v53 }
 0x1dd   :  { %1187 = vmatpush.bf16.msrb.mxu2 %v4673_v59  ;;  %1200 = vmatpush.bf16.msrb.mxu3 %v4677_v60 }
 0x1e0   :  { %1162 = vmatpush.bf16.msrb.mxu0 %v4679_v61  ;;  %1175 = vmatpush.bf16.msrb.mxu1 %v4682_v1 }
 0x1e1   :  { %1188 = vmatpush.bf16.msrb.mxu2 %v4685_v7  ;;  %1201 = vmatpush.bf16.msrb.mxu3 %v4689_v8 }
 0x1e4   :  { %1163 = vmatpush.bf16.msrb.mxu0 %v4691_v9  ;;  %1176 = vmatpush.bf16.msrb.mxu1 %v4694_v13 }
 0x1e5   :  { %1189 = vmatpush.bf16.msrb.mxu2 %v4697_v19  ;;  %1202 = vmatpush.bf16.msrb.mxu3 %v4701_v20 }
 0x1e8   :  { %1164 = vmatpush.bf16.msrb.mxu0 %v4703_v21  ;;  %1177 = vmatpush.bf16.msrb.mxu1 %v4709_v23 }
 0x1e9   :  { %1190 = vmatpush.bf16.msrb.mxu2 %v4722_v35  ;;  %1203 = vmatpush.bf16.msrb.mxu3 %v4714_v26 }
 0x1ec   :  { %1165 = vmatpush.bf16.msrb.mxu0 %v4718_v30  ;;  %1178 = vmatpush.bf16.msrb.mxu1 %v4720_v34 }
 0x1ed   :  { %1191 = vmatpush.bf16.msrb.mxu2 %v4739_v55  ;;  %1204 = vmatpush.bf16.msrb.mxu3 %v4725_v40 }
 0x1f0   :  { %1166 = vmatpush.bf16.msrb.mxu0 %v4729_v45  ;;  %1179 = vmatpush.bf16.msrb.mxu1 %v4731_v46 }
 0x1f1   :  { %1192 = vmatpush.bf16.msrb.mxu2 %v4750_v11  ;;  %1205 = vmatpush.bf16.msrb.mxu3 %v4741_v62 }
 0x1f4   :  { %1167 = vmatpush.bf16.msrb.mxu0 %v4743_v63  ;;  %1180 = vmatpush.bf16.msrb.mxu1 %v4746_v4 }
 0x1f5   :  { %1193 = vmatpush.bf16.msrb.mxu2 %v4758_v16  ;;  %1206 = vmatpush.bf16.msrb.mxu3 %v4752_v12 }
 0x253   :  { %v915_v18 = vpop.f32.mrf.mxu0  ;;  %v928_v17 = vpop.f32.mrf.mxu1 }
 0x254   :  { %v958_v51 = vadd.f32 %v915_v18, %v5959_v44  ;;  %v959_v22 = vadd.f32 %v928_v17, %v5960_v36 }
 0x256   :  { %v3802_v32 = vmul.f32 -1.442695, %v958_v51  ;;  %v3803_v27 = vmul.f32 -1.442695, %v959_v22 }
 0x258   :  { %4311 = vpow2.f32 %v3802_v32 }
 0x259   :  { %4313 = vpow2.f32 %v3803_v27 }
 0x25a   :  { %v941_v58 = vpop.f32.mrf.mxu2  ;;  %v954_v31 = vpop.f32.mrf.mxu3 }
 0x25b   :  { %v961_v15 = vadd.f32 %v954_v31, %v5961_v0  ;;  %v917_v3 = vpop.f32.mrf.mxu0  ;;  %v930_v43 = vpop.f32.mrf.mxu1  ;;  %v960_v5 = vadd.f32 %v941_v58, %v5962_v2 }
 0x25d   :  { %v3804_v6 = vmul.f32 -1.442695, %v961_v15 }
 0x25e   :  { %v4312_v50 = vpop.eup %4311 }
 0x25f   :  { %v4314_v52 = vpop.eup %4313  ;;  %v965_v24 = vadd.f32 1.0, %v4312_v50  ;;  %4315 = vpow2.f32 %v3804_v6 }
 0x260   :  { %v984_v14 = vadd.f32 1.0, %v4314_v52 }
 0x261   :  { %4317 = vrcp.f32 %v965_v24  ;;  %v977_v36 = vand.u32 2147483648, %v965_v24  ;;  %v975_v27 = vand.u32 2147483647, %v965_v24  ;;  %vm971_vm10 = vweird.f32 %v965_v24 }
 0x262   :  { %4319 = vrcp.f32 %v984_v14  ;;  %v943_v29 = vpop.f32.mrf.mxu2  ;;  %v956_v28 = vpop.f32.mrf.mxu3  ;;  %v996_v22 = vand.u32 2147483648, %v984_v14  ;;  %v994_v0 = vand.u32 2147483647, %v984_v14  ;;  %vm990_vm11 = vweird.f32 %v984_v14 }
 0x263   :  { %v978_v58 = vor.u32 1.1754944e-38, %v977_v36  ;;  %vm976_vm14 = vcmp.eq.f32.partialorder %v975_v27, 8.507059e+37 }
 0x264   :  { %v997_v50 = vor.u32 1.1754944e-38, %v996_v22  ;;  %vm995_vm15 = vcmp.eq.f32.partialorder %v994_v0, 8.507059e+37  ;;  %v5964_v0 = vld [vmem:[#allocation15_spill] sm:$0xff] }
 0x265   :  { %v4316_v10 = vpop.eup %4315 }
 0x266   :  { %v1004_v57 = vadd.f32 1.0, %v4316_v10 }
 0x267   :  { %v4318_v39 = vpop.eup %4317 }
 0x268   :  { %v4320_v25 = vpop.eup %4319  ;;  %v967_v18 = vmul.f32 %v4318_v39, %v965_v24  ;;  %4321 = vrcp.f32 %v1004_v57  ;;  %vm972_vm8 = vweird.f32 %v4318_v39  ;;  %vm1010_vm1 = vweird.f32 %v1004_v57 }
 0x269   :  { %v986_v17 = vmul.f32 %v4320_v25, %v984_v14  ;;  %4323 = vtanh.f32 %v960_v5  ;;  %vm991_vm9 = vweird.f32 %v4320_v25  ;;  %vm973_vm12 = vmor %vm971_vm10, %vm972_vm8 }
 0x26a   :  { %v968_v44 = vsub.f32 1.0, %v967_v18  ;;  %vm992_vm13 = vmor %vm990_vm11, %vm991_vm9 }
 0x26b   :  { %v987_v51 = vsub.f32 1.0, %v986_v17 }
 0x26c   :  { %v969_v32 = vmul.f32 %v4318_v39, %v968_v44 }
 0x26d   :  { %v988_v31 = vmul.f32 %v4320_v25, %v987_v51  ;;  %v1016_v51 = vand.u32 2147483648, %v1004_v57 }
 0x26e   :  { %v4322_v15 = vpop.eup %4321  ;;  %v970_v3 = vadd.f32 %v4318_v39, %v969_v32 }
 0x26f   :  { %v989_v43 = vadd.f32 %v4320_v25, %v988_v31  ;;  %v1006_v6 = vmul.f32 %v4322_v15, %v1004_v57  ;;  %v4324_v29 = vpop.eup %4323  ;;  %vm1011_vm0 = vweird.f32 %v4322_v15  ;;  %v1017_v22 = vor.u32 1.1754944e-38, %v1016_v51 }
 0x270   :  { %v974_v52 = vsel %vm973_vm12, %v4318_v39, %v970_v3  ;;  %v1014_v39 = vand.u32 2147483647, %v1004_v57  ;;  %vm1012_vm2 = vmor %vm1010_vm1, %vm1011_vm0 }
 0x271   :  { %v979_v28 = vsel %vm976_vm14, %v978_v58, %v974_v52  ;;  %v993_v10 = vsel %vm992_vm13, %v4320_v25, %v989_v43  ;;  %v1007_v2 = vsub.f32 1.0, %v1006_v6 }
 0x272   :  { %v998_v5 = vsel %vm995_vm15, %v997_v50, %v993_v10  ;;  %v1021_v18 = vmul.f32 %v4324_v29, %v979_v28  ;;  %vm1015_vm3 = vcmp.eq.f32.partialorder %v1014_v39, 8.507059e+37  ;;  %v5965_v29 = vld [vmem:[#allocation17_spill] sm:$0xff] }
 0x273   :  { %v1020_v17 = vmul.f32 %v998_v5, %v4982_v33  ;;  %v1008_v44 = vmul.f32 %v4322_v15, %v1007_v2  ;;  %v5963_v33 = vld [vmem:[#allocation13_spill] sm:$0xff]  ;;  %v405_v28 = vadd.f32 %v5965_v29, %v4861_v56 }
 0x274   :  { %v306_v57 = vadd.f32 %v5963_v33, %v4845_v38 }
 0x275   :  { %v5025_v24 = vadd.f32 %v1021_v18, %v1020_v17  ;;  %v1009_v14 = vadd.f32 %v4322_v15, %v1008_v44 }
 0x277   :  { %4325 = vtanh.f32 %v5025_v24  ;;  %v1013_v36 = vsel %vm1012_vm2, %v4322_v15, %v1009_v14  ;;  %v339_v15 = vadd.f32 %v5964_v0, %v4849_v42 }
 0x278   :  { %v1018_v32 = vsel %vm1015_vm3, %v1017_v22, %v1013_v36 }
 0x27d   :  { %v4326_v25 = vpop.eup %4325 }
 0x27e   :  { %v1024_v27 = vmul.f32 %v4326_v25, %v1018_v32 }
 0x280   :  { %v1025_v31 = vpack.c.bf16 %v1024_v27, %v1024_v27  ;;  %v5966_v27 = vld [vmem:[#allocation16_spill] sm:$0xff] }
 0x282   :  { %3805 = vst [vmem:[%s5924_s4 + $0x8] sm:$0xf] %v1025_v31  ;;  %1041 = vmatmul.bf16.vlgmr.msra.gmra.mxu0 %v1025_v31  ;;  %1054 = vmatmul.bf16.vlgmr.msra.gmra.mxu1 %v1025_v31 }
 0x283   :  { %1067 = vmatmul.bf16.vlgmr.msra.gmra.mxu2 %v1025_v31  ;;  %1080 = vmatmul.bf16.vlgmr.msra.gmra.mxu3 %v1025_v31  ;;  %v372_v31 = vadd.f32 %v5966_v27, %v4859_v54 }
 0x284   :  { %1287 = vmatpush.bf16.msra.mxu0 %v4658_v37  ;;  %1300 = vmatpush.bf16.msra.mxu1 %v4660_v41 }
 0x285   :  { %1313 = vmatpush.bf16.msra.mxu2 %v4662_v47  ;;  %1326 = vmatpush.bf16.msra.mxu3 %v4665_v48 }
 0x288   :  { %1288 = vmatpush.bf16.msra.mxu0 %v4667_v49  ;;  %1301 = vmatpush.bf16.msra.mxu1 %v4670_v53 }
 0x289   :  { %1314 = vmatpush.bf16.msra.mxu2 %v4673_v59  ;;  %1327 = vmatpush.bf16.msra.mxu3 %v4677_v60 }
 0x28c   :  { %1289 = vmatpush.bf16.msra.mxu0 %v4679_v61  ;;  %1302 = vmatpush.bf16.msra.mxu1 %v4682_v1 }
 0x28d   :  { %1315 = vmatpush.bf16.msra.mxu2 %v4685_v7  ;;  %1328 = vmatpush.bf16.msra.mxu3 %v4689_v8 }
 0x290   :  { %1290 = vmatpush.bf16.msra.mxu0 %v4691_v9  ;;  %1303 = vmatpush.bf16.msra.mxu1 %v4694_v13 }
 0x291   :  { %1316 = vmatpush.bf16.msra.mxu2 %v4697_v19  ;;  %1329 = vmatpush.bf16.msra.mxu3 %v4701_v20 }
 0x294   :  { %1291 = vmatpush.bf16.msra.mxu0 %v4703_v21  ;;  %1304 = vmatpush.bf16.msra.mxu1 %v4709_v23 }
 0x295   :  { %1317 = vmatpush.bf16.msra.mxu2 %v4722_v35  ;;  %1330 = vmatpush.bf16.msra.mxu3 %v4714_v26 }
 0x298   :  { %1292 = vmatpush.bf16.msra.mxu0 %v4718_v30  ;;  %1305 = vmatpush.bf16.msra.mxu1 %v4720_v34 }
 0x299   :  { %1318 = vmatpush.bf16.msra.mxu2 %v4739_v55  ;;  %1331 = vmatpush.bf16.msra.mxu3 %v4725_v40 }
 0x29c   :  { %1293 = vmatpush.bf16.msra.mxu0 %v4729_v45  ;;  %1306 = vmatpush.bf16.msra.mxu1 %v4731_v46 }
 0x29d   :  { %1319 = vmatpush.bf16.msra.mxu2 %v4750_v11  ;;  %1332 = vmatpush.bf16.msra.mxu3 %v4741_v62 }
 0x2a0   :  { %1294 = vmatpush.bf16.msra.mxu0 %v4743_v63  ;;  %1307 = vmatpush.bf16.msra.mxu1 %v4746_v4 }
 0x2a1   :  { %1320 = vmatpush.bf16.msra.mxu2 %v4758_v16  ;;  %1333 = vmatpush.bf16.msra.mxu3 %v4752_v12 }
 0x2ff   :  { %v1042_v3 = vpop.f32.mrf.mxu0  ;;  %v1055_v58 = vpop.f32.mrf.mxu1 }
 0x300   :  { %v1085_v43 = vadd.f32 %v1042_v3, %v306_v57  ;;  %v1086_v6 = vadd.f32 %v1055_v58, %v339_v15 }
 0x302   :  { %v3806_v50 = vmul.f32 -1.442695, %v1085_v43  ;;  %v3807_v52 = vmul.f32 -1.442695, %v1086_v6 }
 0x304   :  { %4327 = vpow2.f32 %v3806_v50 }
 0x305   :  { %4329 = vpow2.f32 %v3807_v52 }
 0x306   :  { %v1068_v10 = vpop.f32.mrf.mxu2  ;;  %v1081_v2 = vpop.f32.mrf.mxu3 }
 0x307   :  { %v1088_v5 = vadd.f32 %v1081_v2, %v405_v28  ;;  %v1044_v18 = vpop.f32.mrf.mxu0  ;;  %v1057_v17 = vpop.f32.mrf.mxu1  ;;  %v1087_v0 = vadd.f32 %v1068_v10, %v372_v31 }
 0x309   :  { %v3808_v44 = vmul.f32 -1.442695, %v1088_v5 }
 0x30a   :  { %v4328_v14 = vpop.eup %4327 }
 0x30b   :  { %v4330_v51 = vpop.eup %4329  ;;  %v1092_v39 = vadd.f32 1.0, %v4328_v14  ;;  %4331 = vpow2.f32 %v3808_v44 }
 0x30c   :  { %v1111_v36 = vadd.f32 1.0, %v4330_v51 }
 0x30d   :  { %4333 = vrcp.f32 %v1092_v39  ;;  %v1104_v50 = vand.u32 2147483648, %v1092_v39  ;;  %v1102_v28 = vand.u32 2147483647, %v1092_v39  ;;  %vm1098_vm6 = vweird.f32 %v1092_v39 }
 0x30e   :  { %4335 = vrcp.f32 %v1111_v36  ;;  %v1070_v22 = vpop.f32.mrf.mxu2  ;;  %v1083_v25 = vpop.f32.mrf.mxu3  ;;  %v1123_v52 = vand.u32 2147483648, %v1111_v36  ;;  %v1121_v5 = vand.u32 2147483647, %v1111_v36  ;;  %vm1117_vm7 = vweird.f32 %v1111_v36 }
 0x30f   :  { %v1105_v10 = vor.u32 1.1754944e-38, %v1104_v50  ;;  %vm1103_vm10 = vcmp.eq.f32.partialorder %v1102_v28, 8.507059e+37 }
 0x310   :  { %v1124_v51 = vor.u32 1.1754944e-38, %v1123_v52  ;;  %vm1122_vm11 = vcmp.eq.f32.partialorder %v1121_v5, 8.507059e+37  ;;  %v5967_v5 = vld [vmem:[#allocation18_spill] sm:$0xff] }
 0x311   :  { %v4332_v32 = vpop.eup %4331 }
 0x312   :  { %v1131_v33 = vadd.f32 1.0, %v4332_v32 }
 0x313   :  { %v4334_v57 = vpop.eup %4333 }
 0x314   :  { %v4336_v15 = vpop.eup %4335  ;;  %v1094_v3 = vmul.f32 %v4334_v57, %v1092_v39  ;;  %4337 = vrcp.f32 %v1131_v33  ;;  %vm1099_vm4 = vweird.f32 %v4334_v57  ;;  %vm1137_vm13 = vweird.f32 %v1131_v33 }
 0x315   :  { %v1113_v58 = vmul.f32 %v4336_v15, %v1111_v36  ;;  %4339 = vtanh.f32 %v1087_v0  ;;  %vm1118_vm5 = vweird.f32 %v4336_v15  ;;  %vm1100_vm8 = vmor %vm1098_vm6, %vm1099_vm4 }
 0x316   :  { %v1095_v43 = vsub.f32 1.0, %v1094_v3  ;;  %vm1119_vm9 = vmor %vm1117_vm7, %vm1118_vm5 }
 0x317   :  { %v1114_v6 = vsub.f32 1.0, %v1113_v58 }
 0x318   :  { %v1096_v29 = vmul.f32 %v4334_v57, %v1095_v43 }
 0x319   :  { %v1115_v2 = vmul.f32 %v4336_v15, %v1114_v6  ;;  %v1143_v6 = vand.u32 2147483648, %v1131_v33 }
 0x31a   :  { %v4338_v18 = vpop.eup %4337  ;;  %v1097_v17 = vadd.f32 %v4334_v57, %v1096_v29 }
 0x31b   :  { %v1116_v44 = vadd.f32 %v4336_v15, %v1115_v2  ;;  %v1133_v14 = vmul.f32 %v4338_v18, %v1131_v33  ;;  %v4340_v25 = vpop.eup %4339  ;;  %vm1138_vm12 = vweird.f32 %v4338_v18  ;;  %v1144_v52 = vor.u32 1.1754944e-38, %v1143_v6 }
 0x31c   :  { %v1101_v22 = vsel %vm1100_vm8, %v4334_v57, %v1097_v17  ;;  %v1141_v57 = vand.u32 2147483647, %v1131_v33  ;;  %vm1139_vm14 = vmor %vm1137_vm13, %vm1138_vm12  ;;  %v5968_v17 = vld [vmem:[#allocation19_spill] sm:$0xff] }
 0x31d   :  { %v1106_v32 = vsel %vm1103_vm10, %v1105_v10, %v1101_v22  ;;  %v1120_v27 = vsel %vm1119_vm9, %v4336_v15, %v1116_v44  ;;  %v1134_v31 = vsub.f32 1.0, %v1133_v14 }
 0x31e   :  { %v1125_v0 = vsel %vm1122_vm11, %v1124_v51, %v1120_v27  ;;  %v1148_v3 = vmul.f32 %v4340_v25, %v1106_v32  ;;  %vm1142_vm15 = vcmp.eq.f32.partialorder %v1141_v57, 8.507059e+37  ;;  %v5969_v25 = vld [vmem:[#allocation22_spill] sm:$0xff] }
 0x31f   :  { %v1147_v58 = vmul.f32 %v1125_v0, %v5025_v24  ;;  %v1135_v43 = vmul.f32 %v4338_v18, %v1134_v31 }
 0x321   :  { %v5072_v39 = vadd.f32 %v1148_v3, %v1147_v58  ;;  %v1136_v36 = vadd.f32 %v4338_v18, %v1135_v43 }
 0x323   :  { %4341 = vtanh.f32 %v5072_v39  ;;  %v1140_v50 = vsel %vm1139_vm14, %v4338_v18, %v1136_v36 }
 0x324   :  { %v1145_v29 = vsel %vm1142_vm15, %v1144_v52, %v1140_v50 }
 0x329   :  { %v4342_v15 = vpop.eup %4341 }
 0x32a   :  { %v1151_v28 = vmul.f32 %v4342_v15, %v1145_v29  ;;  %v5970_v29 = vld [vmem:[#allocation20_spill] sm:$0xff] }
 0x32c   :  { %v1152_v2 = vpack.c.bf16 %v1151_v28, %v1151_v28 }
 0x32e   :  { %3809 = vst [vmem:[%s5924_s4 + $0xc] sm:$0xf] %v1152_v2  ;;  %1168 = vmatmul.bf16.vlgmr.msrb.gmra.mxu0 %v1152_v2  ;;  %1181 = vmatmul.bf16.vlgmr.msrb.gmra.mxu1 %v1152_v2 }
 0x32f   :  { %1194 = vmatmul.bf16.vlgmr.msrb.gmra.mxu2 %v1152_v2  ;;  %1207 = vmatmul.bf16.vlgmr.msrb.gmra.mxu3 %v1152_v2 }
 0x330   :  { %1414 = vmatpush.bf16.msrb.mxu0 %v4658_v37  ;;  %1427 = vmatpush.bf16.msrb.mxu1 %v4660_v41 }
 0x331   :  { %1440 = vmatpush.bf16.msrb.mxu2 %v4662_v47  ;;  %1453 = vmatpush.bf16.msrb.mxu3 %v4665_v48 }
 0x334   :  { %1415 = vmatpush.bf16.msrb.mxu0 %v4667_v49  ;;  %1428 = vmatpush.bf16.msrb.mxu1 %v4670_v53 }
 0x335   :  { %1441 = vmatpush.bf16.msrb.mxu2 %v4673_v59  ;;  %1454 = vmatpush.bf16.msrb.mxu3 %v4677_v60 }
 0x338   :  { %1416 = vmatpush.bf16.msrb.mxu0 %v4679_v61  ;;  %1429 = vmatpush.bf16.msrb.mxu1 %v4682_v1 }
 0x339   :  { %1442 = vmatpush.bf16.msrb.mxu2 %v4685_v7  ;;  %1455 = vmatpush.bf16.msrb.mxu3 %v4689_v8 }
 0x33c   :  { %1417 = vmatpush.bf16.msrb.mxu0 %v4691_v9  ;;  %1430 = vmatpush.bf16.msrb.mxu1 %v4694_v13 }
 0x33d   :  { %1443 = vmatpush.bf16.msrb.mxu2 %v4697_v19  ;;  %1456 = vmatpush.bf16.msrb.mxu3 %v4701_v20 }
 0x340   :  { %1418 = vmatpush.bf16.msrb.mxu0 %v4703_v21  ;;  %1431 = vmatpush.bf16.msrb.mxu1 %v4709_v23 }
 0x341   :  { %1444 = vmatpush.bf16.msrb.mxu2 %v4722_v35  ;;  %1457 = vmatpush.bf16.msrb.mxu3 %v4714_v26 }
 0x344   :  { %1419 = vmatpush.bf16.msrb.mxu0 %v4718_v30  ;;  %1432 = vmatpush.bf16.msrb.mxu1 %v4720_v34 }
 0x345   :  { %1445 = vmatpush.bf16.msrb.mxu2 %v4739_v55  ;;  %1458 = vmatpush.bf16.msrb.mxu3 %v4725_v40 }
 0x348   :  { %1420 = vmatpush.bf16.msrb.mxu0 %v4729_v45  ;;  %1433 = vmatpush.bf16.msrb.mxu1 %v4731_v46 }
 0x349   :  { %1446 = vmatpush.bf16.msrb.mxu2 %v4750_v11  ;;  %1459 = vmatpush.bf16.msrb.mxu3 %v4741_v62 }
 0x34c   :  { %1421 = vmatpush.bf16.msrb.mxu0 %v4743_v63  ;;  %1434 = vmatpush.bf16.msrb.mxu1 %v4746_v4 }
 0x34d   :  { %1447 = vmatpush.bf16.msrb.mxu2 %v4758_v16  ;;  %1460 = vmatpush.bf16.msrb.mxu3 %v4752_v12 }
 0x3ab   :  { %v1169_v24 = vpop.f32.mrf.mxu0  ;;  %v1182_v33 = vpop.f32.mrf.mxu1 }
 0x3ac   :  { %v1212_v18 = vadd.f32 %v1169_v24, %v5967_v5  ;;  %v1213_v10 = vadd.f32 %v1182_v33, %v5968_v17 }
 0x3ae   :  { %v3810_v44 = vmul.f32 -1.442695, %v1212_v18  ;;  %v3811_v14 = vmul.f32 -1.442695, %v1213_v10 }
 0x3b0   :  { %4343 = vpow2.f32 %v3810_v44 }
 0x3b1   :  { %4345 = vpow2.f32 %v3811_v14 }
 0x3b2   :  { %v1195_v51 = vpop.f32.mrf.mxu2  ;;  %v1208_v22 = vpop.f32.mrf.mxu3 }
 0x3b3   :  { %v1215_v32 = vadd.f32 %v1208_v22, %v5969_v25  ;;  %v1171_v27 = vpop.f32.mrf.mxu0  ;;  %v1184_v31 = vpop.f32.mrf.mxu1  ;;  %v1214_v28 = vadd.f32 %v1195_v51, %v5970_v29 }
 0x3b5   :  { %v3812_v0 = vmul.f32 -1.442695, %v1215_v32 }
 0x3b6   :  { %v4344_v3 = vpop.eup %4343 }
 0x3b7   :  { %v4346_v58 = vpop.eup %4345  ;;  %v1219_v43 = vadd.f32 1.0, %v4344_v3  ;;  %4347 = vpow2.f32 %v3812_v0 }
 0x3b8   :  { %v1238_v36 = vadd.f32 1.0, %v4346_v58 }
 0x3b9   :  { %4349 = vrcp.f32 %v1219_v43  ;;  %v1231_v17 = vand.u32 2147483648, %v1219_v43  ;;  %v1229_v14 = vand.u32 2147483647, %v1219_v43  ;;  %vm1225_vm2 = vweird.f32 %v1219_v43 }
 0x3ba   :  { %4351 = vrcp.f32 %v1238_v36  ;;  %v1197_v6 = vpop.f32.mrf.mxu2  ;;  %v1210_v57 = vpop.f32.mrf.mxu3  ;;  %v1250_v10 = vand.u32 2147483648, %v1238_v36  ;;  %v1248_v25 = vand.u32 2147483647, %v1238_v36  ;;  %vm1244_vm3 = vweird.f32 %v1238_v36 }
 0x3bb   :  { %v1232_v51 = vor.u32 1.1754944e-38, %v1231_v17  ;;  %vm1230_vm6 = vcmp.eq.f32.partialorder %v1229_v14, 8.507059e+37 }
 0x3bc   :  { %v1251_v3 = vor.u32 1.1754944e-38, %v1250_v10  ;;  %vm1249_vm7 = vcmp.eq.f32.partialorder %v1248_v25, 8.507059e+37  ;;  %v5972_v25 = vld [vmem:[#allocation23_spill] sm:$0xff] }
 0x3bd   :  { %v4348_v50 = vpop.eup %4347 }
 0x3be   :  { %v1258_v52 = vadd.f32 1.0, %v4348_v50 }
 0x3bf   :  { %v4350_v15 = vpop.eup %4349 }
 0x3c0   :  { %v4352_v2 = vpop.eup %4351  ;;  %v1221_v24 = vmul.f32 %v4350_v15, %v1219_v43  ;;  %4353 = vrcp.f32 %v1258_v52  ;;  %vm1226_vm0 = vweird.f32 %v4350_v15  ;;  %vm1264_vm9 = vweird.f32 %v1258_v52 }
 0x3c1   :  { %v1240_v33 = vmul.f32 %v4352_v2, %v1238_v36  ;;  %4355 = vtanh.f32 %v1214_v28  ;;  %vm1245_vm1 = vweird.f32 %v4352_v2  ;;  %vm1227_vm4 = vmor %vm1225_vm2, %vm1226_vm0 }
 0x3c2   :  { %v1222_v5 = vsub.f32 1.0, %v1221_v24  ;;  %vm1246_vm5 = vmor %vm1244_vm3, %vm1245_vm1 }
 0x3c3   :  { %v1241_v18 = vsub.f32 1.0, %v1240_v33 }
 0x3c4   :  { %v1223_v44 = vmul.f32 %v4350_v15, %v1222_v5 }
 0x3c5   :  { %v1242_v22 = vmul.f32 %v4352_v2, %v1241_v18  ;;  %v1270_v18 = vand.u32 2147483648, %v1258_v52 }
 0x3c6   :  { %v4354_v32 = vpop.eup %4353  ;;  %v1224_v27 = vadd.f32 %v4350_v15, %v1223_v44 }
 0x3c7   :  { %v1243_v31 = vadd.f32 %v4352_v2, %v1242_v22  ;;  %v1260_v0 = vmul.f32 %v4354_v32, %v1258_v52  ;;  %v4356_v6 = vpop.eup %4355  ;;  %vm1265_vm8 = vweird.f32 %v4354_v32  ;;  %v1271_v10 = vor.u32 1.1754944e-38, %v1270_v18 }
 0x3c8   :  { %v1228_v58 = vsel %vm1227_vm4, %v4350_v15, %v1224_v27  ;;  %v1268_v15 = vand.u32 2147483647, %v1258_v52  ;;  %vm1266_vm10 = vmor %vm1264_vm9, %vm1265_vm8 }
 0x3c9   :  { %v1233_v57 = vsel %vm1230_vm6, %v1232_v51, %v1228_v58  ;;  %v1247_v50 = vsel %vm1246_vm5, %v4352_v2, %v1243_v31  ;;  %v1261_v29 = vsub.f32 1.0, %v1260_v0 }
 0x3ca   :  { %v1252_v28 = vsel %vm1249_vm7, %v1251_v3, %v1247_v50  ;;  %v1275_v24 = vmul.f32 %v4356_v6, %v1233_v57  ;;  %vm1269_vm11 = vcmp.eq.f32.partialorder %v1268_v15, 8.507059e+37  ;;  %v5973_v6 = vld [vmem:[#allocation25_spill] sm:$0xff] }
 0x3cb   :  { %v1274_v33 = vmul.f32 %v1252_v28, %v5072_v39  ;;  %v1262_v5 = vmul.f32 %v4354_v32, %v1261_v29  ;;  %v5971_v39 = vld [vmem:[#allocation21_spill] sm:$0xff]  ;;  %v410_v57 = vadd.f32 %v5973_v6, %v4861_v56 }
 0x3cc   :  { %v311_v52 = vadd.f32 %v5971_v39, %v4845_v38 }
 0x3cd   :  { %v5115_v43 = vadd.f32 %v1275_v24, %v1274_v33  ;;  %v1263_v36 = vadd.f32 %v4354_v32, %v1262_v5 }
 0x3cf   :  { %4357 = vtanh.f32 %v5115_v43  ;;  %v1267_v17 = vsel %vm1266_vm10, %v4354_v32, %v1263_v36  ;;  %v344_v32 = vadd.f32 %v5972_v25, %v4849_v42 }
 0x3d0   :  { %v1272_v44 = vsel %vm1269_vm11, %v1271_v10, %v1267_v17 }
 0x3d5   :  { %v4358_v2 = vpop.eup %4357 }
 0x3d6   :  { %v1278_v14 = vmul.f32 %v4358_v2, %v1272_v44 }
 0x3d8   :  { %v1279_v22 = vpack.c.bf16 %v1278_v14, %v1278_v14  ;;  %v5974_v14 = vld [vmem:[#allocation24_spill] sm:$0xff] }
 0x3da   :  { %3813 = vst [vmem:[%s5924_s4 + $0x10] sm:$0xf] %v1279_v22  ;;  %1295 = vmatmul.bf16.vlgmr.msra.gmra.mxu0 %v1279_v22  ;;  %1308 = vmatmul.bf16.vlgmr.msra.gmra.mxu1 %v1279_v22 }
 0x3db   :  { %1321 = vmatmul.bf16.vlgmr.msra.gmra.mxu2 %v1279_v22  ;;  %1334 = vmatmul.bf16.vlgmr.msra.gmra.mxu3 %v1279_v22  ;;  %v377_v22 = vadd.f32 %v5974_v14, %v4859_v54 }
 0x3dc   :  { %1541 = vmatpush.bf16.msra.mxu0 %v4658_v37  ;;  %1554 = vmatpush.bf16.msra.mxu1 %v4660_v41 }
 0x3dd   :  { %1567 = vmatpush.bf16.msra.mxu2 %v4662_v47  ;;  %1580 = vmatpush.bf16.msra.mxu3 %v4665_v48 }
 0x3e0   :  { %1542 = vmatpush.bf16.msra.mxu0 %v4667_v49  ;;  %1555 = vmatpush.bf16.msra.mxu1 %v4670_v53 }
 0x3e1   :  { %1568 = vmatpush.bf16.msra.mxu2 %v4673_v59  ;;  %1581 = vmatpush.bf16.msra.mxu3 %v4677_v60 }
 0x3e4   :  { %1543 = vmatpush.bf16.msra.mxu0 %v4679_v61  ;;  %1556 = vmatpush.bf16.msra.mxu1 %v4682_v1 }
 0x3e5   :  { %1569 = vmatpush.bf16.msra.mxu2 %v4685_v7  ;;  %1582 = vmatpush.bf16.msra.mxu3 %v4689_v8 }
 0x3e8   :  { %1544 = vmatpush.bf16.msra.mxu0 %v4691_v9  ;;  %1557 = vmatpush.bf16.msra.mxu1 %v4694_v13 }
 0x3e9   :  { %1570 = vmatpush.bf16.msra.mxu2 %v4697_v19  ;;  %1583 = vmatpush.bf16.msra.mxu3 %v4701_v20 }
 0x3ec   :  { %1545 = vmatpush.bf16.msra.mxu0 %v4703_v21  ;;  %1558 = vmatpush.bf16.msra.mxu1 %v4709_v23 }
 0x3ed   :  { %1571 = vmatpush.bf16.msra.mxu2 %v4722_v35  ;;  %1584 = vmatpush.bf16.msra.mxu3 %v4714_v26 }
 0x3f0   :  { %1546 = vmatpush.bf16.msra.mxu0 %v4718_v30  ;;  %1559 = vmatpush.bf16.msra.mxu1 %v4720_v34 }
 0x3f1   :  { %1572 = vmatpush.bf16.msra.mxu2 %v4739_v55  ;;  %1585 = vmatpush.bf16.msra.mxu3 %v4725_v40 }
 0x3f4   :  { %1547 = vmatpush.bf16.msra.mxu0 %v4729_v45  ;;  %1560 = vmatpush.bf16.msra.mxu1 %v4731_v46 }
 0x3f5   :  { %1573 = vmatpush.bf16.msra.mxu2 %v4750_v11  ;;  %1586 = vmatpush.bf16.msra.mxu3 %v4741_v62 }
 0x3f8   :  { %1548 = vmatpush.bf16.msra.mxu0 %v4743_v63  ;;  %1561 = vmatpush.bf16.msra.mxu1 %v4746_v4 }
 0x3f9   :  { %1574 = vmatpush.bf16.msra.mxu2 %v4758_v16  ;;  %1587 = vmatpush.bf16.msra.mxu3 %v4752_v12 }
 0x457   :  { %v1296_v27 = vpop.f32.mrf.mxu0  ;;  %v1309_v51 = vpop.f32.mrf.mxu1 }
 0x458   :  { %v1339_v31 = vadd.f32 %v1296_v27, %v311_v52  ;;  %v1340_v0 = vadd.f32 %v1309_v51, %v344_v32 }
 0x45a   :  { %v3814_v3 = vmul.f32 -1.442695, %v1339_v31  ;;  %v3815_v58 = vmul.f32 -1.442695, %v1340_v0 }
 0x45c   :  { %4359 = vpow2.f32 %v3814_v3 }
 0x45d   :  { %4361 = vpow2.f32 %v3815_v58 }
 0x45e   :  { %v1322_v50 = vpop.f32.mrf.mxu2  ;;  %v1335_v29 = vpop.f32.mrf.mxu3 }
 0x45f   :  { %v1342_v28 = vadd.f32 %v1335_v29, %v410_v57  ;;  %v1298_v24 = vpop.f32.mrf.mxu0  ;;  %v1311_v33 = vpop.f32.mrf.mxu1  ;;  %v1341_v25 = vadd.f32 %v1322_v50, %v377_v22 }
 0x461   :  { %v3816_v5 = vmul.f32 -1.442695, %v1342_v28 }
 0x462   :  { %v4360_v36 = vpop.eup %4359 }
 0x463   :  { %v4362_v18 = vpop.eup %4361  ;;  %v1346_v15 = vadd.f32 1.0, %v4360_v36  ;;  %4363 = vpow2.f32 %v3816_v5 }
 0x464   :  { %v1365_v17 = vadd.f32 1.0, %v4362_v18 }
 0x465   :  { %4365 = vrcp.f32 %v1346_v15  ;;  %v1358_v3 = vand.u32 2147483648, %v1346_v15  ;;  %v1356_v57 = vand.u32 2147483647, %v1346_v15  ;;  %vm1352_vm14 = vweird.f32 %v1346_v15 }
 0x466   :  { %4367 = vrcp.f32 %v1365_v17  ;;  %v1324_v10 = vpop.f32.mrf.mxu2  ;;  %v1337_v2 = vpop.f32.mrf.mxu3  ;;  %v1377_v58 = vand.u32 2147483648, %v1365_v17  ;;  %v1375_v28 = vand.u32 2147483647, %v1365_v17  ;;  %vm1371_vm15 = vweird.f32 %v1365_v17 }
 0x467   :  { %v1359_v50 = vor.u32 1.1754944e-38, %v1358_v3  ;;  %vm1357_vm2 = vcmp.eq.f32.partialorder %v1356_v57, 8.507059e+37 }
 0x468   :  { %v1378_v18 = vor.u32 1.1754944e-38, %v1377_v58  ;;  %vm1376_vm3 = vcmp.eq.f32.partialorder %v1375_v28, 8.507059e+37 }
 0x469   :  { %v4364_v44 = vpop.eup %4363 }
 0x46a   :  { %v1385_v39 = vadd.f32 1.0, %v4364_v44 }
 0x46b   :  { %v4366_v52 = vpop.eup %4365 }
 0x46c   :  { %v4368_v32 = vpop.eup %4367  ;;  %v1348_v27 = vmul.f32 %v4366_v52, %v1346_v15  ;;  %4369 = vrcp.f32 %v1385_v39  ;;  %vm1353_vm12 = vweird.f32 %v4366_v52  ;;  %vm1391_vm5 = vweird.f32 %v1385_v39 }
 0x46d   :  { %v1367_v51 = vmul.f32 %v4368_v32, %v1365_v17  ;;  %4371 = vtanh.f32 %v1341_v25  ;;  %vm1372_vm13 = vweird.f32 %v4368_v32  ;;  %vm1354_vm0 = vmor %vm1352_vm14, %vm1353_vm12 }
 0x46e   :  { %v1349_v31 = vsub.f32 1.0, %v1348_v27  ;;  %vm1373_vm1 = vmor %vm1371_vm15, %vm1372_vm13 }
 0x46f   :  { %v1368_v0 = vsub.f32 1.0, %v1367_v51 }
 0x470   :  { %v1350_v6 = vmul.f32 %v4366_v52, %v1349_v31 }
 0x471   :  { %v1369_v29 = vmul.f32 %v4368_v32, %v1368_v0  ;;  %v1397_v0 = vand.u32 2147483648, %v1385_v39 }
 0x472   :  { %v4370_v24 = vpop.eup %4369  ;;  %v1351_v33 = vadd.f32 %v4366_v52, %v1350_v6 }
 0x473   :  { %v1370_v5 = vadd.f32 %v4368_v32, %v1369_v29  ;;  %v1387_v36 = vmul.f32 %v4370_v24, %v1385_v39  ;;  %v4372_v2 = vpop.eup %4371  ;;  %vm1392_vm4 = vweird.f32 %v4370_v24  ;;  %v1398_v58 = vor.u32 1.1754944e-38, %v1397_v0 }
 0x474   :  { %v1355_v10 = vsel %vm1354_vm0, %v4366_v52, %v1351_v33  ;;  %v1395_v52 = vand.u32 2147483647, %v1385_v39  ;;  %vm1393_vm6 = vmor %vm1391_vm5, %vm1392_vm4 }
 0x475   :  { %v1360_v44 = vsel %vm1357_vm2, %v1359_v50, %v1355_v10  ;;  %v1374_v14 = vsel %vm1373_vm1, %v4368_v32, %v1370_v5  ;;  %v1388_v22 = vsub.f32 1.0, %v1387_v36 }
 0x476   :  { %v1379_v25 = vsel %vm1376_vm3, %v1378_v18, %v1374_v14  ;;  %v1402_v27 = vmul.f32 %v4372_v2, %v1360_v44  ;;  %vm1396_vm7 = vcmp.eq.f32.partialorder %v1395_v52, 8.507059e+37 }
 0x477   :  { %v1401_v51 = vmul.f32 %v1379_v25, %v5115_v43  ;;  %v1389_v31 = vmul.f32 %v4370_v24, %v1388_v22 }
 0x479   :  { %v5162_v15 = vadd.f32 %v1402_v27, %v1401_v51  ;;  %v1390_v17 = vadd.f32 %v4370_v24, %v1389_v31 }
 0x47b   :  { %4373 = vtanh.f32 %v5162_v15  ;;  %v1394_v3 = vsel %vm1393_vm6, %v4370_v24, %v1390_v17 }
 0x47c   :  { %v1399_v6 = vsel %vm1396_vm7, %v1398_v58, %v1394_v3 }
 0x481   :  { %v4374_v32 = vpop.eup %4373 }
 0x482   :  { %v1405_v57 = vmul.f32 %v4374_v32, %v1399_v6 }
 0x484   :  { %v1406_v29 = vpack.c.bf16 %v1405_v57, %v1405_v57 }
 0x486   :  { %3817 = vst [vmem:[%s5924_s4 + $0x14] sm:$0xf] %v1406_v29  ;;  %1422 = vmatmul.bf16.vlgmr.msrb.gmra.mxu0 %v1406_v29  ;;  %1435 = vmatmul.bf16.vlgmr.msrb.gmra.mxu1 %v1406_v29 }
 0x487   :  { %1448 = vmatmul.bf16.vlgmr.msrb.gmra.mxu2 %v1406_v29  ;;  %1461 = vmatmul.bf16.vlgmr.msrb.gmra.mxu3 %v1406_v29 }
 0x488   :  { %1668 = vmatpush.bf16.msrb.mxu0 %v4658_v37  ;;  %1681 = vmatpush.bf16.msrb.mxu1 %v4660_v41 }
 0x489   :  { %1694 = vmatpush.bf16.msrb.mxu2 %v4662_v47  ;;  %1707 = vmatpush.bf16.msrb.mxu3 %v4665_v48  ;;  %v5975_v47 = vld [vmem:[#allocation26_spill] sm:$0xff] }
 0x48c   :  { %1669 = vmatpush.bf16.msrb.mxu0 %v4667_v49  ;;  %1682 = vmatpush.bf16.msrb.mxu1 %v4670_v53  ;;  %v5976_v49 = vld [vmem:[#allocation27_spill] sm:$0xff] }
 0x48d   :  { %1695 = vmatpush.bf16.msrb.mxu2 %v4673_v59  ;;  %1708 = vmatpush.bf16.msrb.mxu3 %v4677_v60 }
 0x490   :  { %1670 = vmatpush.bf16.msrb.mxu0 %v4679_v61  ;;  %1683 = vmatpush.bf16.msrb.mxu1 %v4682_v1 }
 0x491   :  { %1696 = vmatpush.bf16.msrb.mxu2 %v4685_v7  ;;  %1709 = vmatpush.bf16.msrb.mxu3 %v4689_v8  ;;  %v5977_v7 = vld [vmem:[#allocation30_spill] sm:$0xff] }
 0x494   :  { %1671 = vmatpush.bf16.msrb.mxu0 %v4691_v9  ;;  %1684 = vmatpush.bf16.msrb.mxu1 %v4694_v13 }
 0x495   :  { %1697 = vmatpush.bf16.msrb.mxu2 %v4697_v19  ;;  %1710 = vmatpush.bf16.msrb.mxu3 %v4701_v20 }
 0x498   :  { %1672 = vmatpush.bf16.msrb.mxu0 %v4703_v21  ;;  %1685 = vmatpush.bf16.msrb.mxu1 %v4709_v23 }
 0x499   :  { %1698 = vmatpush.bf16.msrb.mxu2 %v4722_v35  ;;  %1711 = vmatpush.bf16.msrb.mxu3 %v4714_v26 }
 0x49c   :  { %1673 = vmatpush.bf16.msrb.mxu0 %v4718_v30  ;;  %1686 = vmatpush.bf16.msrb.mxu1 %v4720_v34 }
 0x49d   :  { %1699 = vmatpush.bf16.msrb.mxu2 %v4739_v55  ;;  %1712 = vmatpush.bf16.msrb.mxu3 %v4725_v40 }
 0x4a0   :  { %1674 = vmatpush.bf16.msrb.mxu0 %v4729_v45  ;;  %1687 = vmatpush.bf16.msrb.mxu1 %v4731_v46  ;;  %v5978_v46 = vld [vmem:[#allocation28_spill] sm:$0xff] }
 0x4a1   :  { %1700 = vmatpush.bf16.msrb.mxu2 %v4750_v11  ;;  %1713 = vmatpush.bf16.msrb.mxu3 %v4741_v62 }
 0x4a4   :  { %1675 = vmatpush.bf16.msrb.mxu0 %v4743_v63  ;;  %1688 = vmatpush.bf16.msrb.mxu1 %v4746_v4 }
 0x4a5   :  { %1701 = vmatpush.bf16.msrb.mxu2 %v4758_v16  ;;  %1714 = vmatpush.bf16.msrb.mxu3 %v4752_v12 }
 0x503   :  { %v1423_v37 = vpop.f32.mrf.mxu0  ;;  %v1436_v41 = vpop.f32.mrf.mxu1 }
 0x504   :  { %v1466_v48 = vadd.f32 %v1423_v37, %v5975_v47  ;;  %v1467_v53 = vadd.f32 %v1436_v41, %v5976_v49  ;;  %v4238_v49 = vld [vmem:[#allocation3 + $0x1e4] sm:$0xf] }
 0x506   :  { %v3818_v59 = vmul.f32 -1.442695, %v1466_v48  ;;  %v3819_v60 = vmul.f32 -1.442695, %v1467_v53  ;;  %v4240_v48 = vld [vmem:[#allocation3 + $0x1ec] sm:$0xf0] }
 0x507   :  { %v5979_v53 = vld [vmem:[#allocation29_spill] sm:$0xff] }
 0x508   :  { %4375 = vpow2.f32 %v3818_v59  ;;  %v316_v59 = vadd.f32 %v5979_v53, %v4845_v38  ;;  %v3945_v38 = vld [vmem:[#allocation3 + $0x1c0] sm:$0xf] }
 0x509   :  { %4377 = vpow2.f32 %v3819_v60  ;;  %v5980_v60 = vld [vmem:[#allocation31_spill] sm:$0xff] }
 0x50a   :  { %v1449_v61 = vpop.f32.mrf.mxu2  ;;  %v1462_v1 = vpop.f32.mrf.mxu3 }
 0x50b   :  { %v1469_v8 = vadd.f32 %v1462_v1, %v5977_v7  ;;  %v1425_v9 = vpop.f32.mrf.mxu0  ;;  %v1438_v13 = vpop.f32.mrf.mxu1  ;;  %v1468_v55 = vadd.f32 %v1449_v61, %v5978_v46  ;;  %v349_v61 = vadd.f32 %v5980_v60, %v4849_v42  ;;  %v3963_v7 = vld [vmem:[#allocation3 + $0x1f0] sm:$0xf0] }
 0x50c   :  { %v4241_v9 = vld [vmem:[#allocation3 + $0x1f4] sm:$0xf0] }
 0x50d   :  { %v3820_v19 = vmul.f32 -1.442695, %v1469_v8  ;;  %v3969_v8 = vld [vmem:[#allocation3 + $0x1e8] sm:$0xf] }
 0x50e   :  { %v4376_v20 = vpop.eup %4375 }
 0x50f   :  { %v4378_v21 = vpop.eup %4377  ;;  %v1473_v23 = vadd.f32 1.0, %v4376_v20  ;;  %4379 = vpow2.f32 %v3820_v19  ;;  %v3966_v20 = vor.u32 %v4238_v49, %v3963_v7  ;;  %v3897_v7 = vld [vmem:[#allocation3 + $0x160] sm:$0xf] }
 0x510   :  { %v1492_v26 = vadd.f32 1.0, %v4378_v21  ;;  %v3970_v21 = vor.u32 %v4241_v9, %v3969_v8 }
 0x511   :  { %4381 = vrcp.f32 %v1473_v23  ;;  %v1485_v16 = vand.u32 2147483648, %v1473_v23  ;;  %v1483_v28 = vand.u32 2147483647, %v1473_v23  ;;  %vm1479_vm10 = vweird.f32 %v1473_v23 }
 0x512   :  { %4383 = vrcp.f32 %v1492_v26  ;;  %v1451_v30 = vpop.f32.mrf.mxu2  ;;  %v1464_v34 = vpop.f32.mrf.mxu3  ;;  %v1504_v43 = vand.u32 2147483648, %v1492_v26  ;;  %v1502_v33 = vand.u32 2147483647, %v1492_v26  ;;  %vm1498_vm11 = vweird.f32 %v1492_v26 }
 0x513   :  { %v1486_v36 = vor.u32 1.1754944e-38, %v1485_v16  ;;  %vm1484_vm14 = vcmp.eq.f32.partialorder %v1483_v28, 8.507059e+37  ;;  %v4232_v28 = vld [vmem:[#allocation3 + $0x1ac] sm:$0xf0] }
 0x514   :  { %v1505_v2 = vor.u32 1.1754944e-38, %v1504_v43  ;;  %vm1503_vm15 = vcmp.eq.f32.partialorder %v1502_v33, 8.507059e+37  ;;  %v3955_v43 = vld [vmem:[#allocation3 + $0x1d8] sm:$0xf0] }
 0x515   :  { %v4380_v35 = vpop.eup %4379 }
 0x516   :  { %v1512_v40 = vadd.f32 1.0, %v4380_v35 }
 0x517   :  { %v4382_v45 = vpop.eup %4381 }
 0x518   :  { %v4384_v62 = vpop.eup %4383  ;;  %v1475_v63 = vmul.f32 %v4382_v45, %v1473_v23  ;;  %4385 = vrcp.f32 %v1512_v40  ;;  %vm1480_vm8 = vweird.f32 %v4382_v45  ;;  %v1524_v58 = vand.u32 2147483648, %v1512_v40  ;;  %v4239_v23 = vld [vmem:[#allocation3 + $0x1ec] sm:$0xf] }
 0x519   :  { %v1494_v4 = vmul.f32 %v4384_v62, %v1492_v26  ;;  %4387 = vtanh.f32 %v1468_v55  ;;  %vm1499_vm9 = vweird.f32 %v4384_v62  ;;  %vm1481_vm12 = vmor %vm1479_vm10, %vm1480_vm8  ;;  %vm1518_vm1 = vweird.f32 %v1512_v40  ;;  %v3971_v26 = vld [vmem:[#allocation3 + $0x1f8] sm:$0xf0] }
 0x51a   :  { %v1476_v11 = vsub.f32 1.0, %v1475_v63  ;;  %vm1500_vm13 = vmor %vm1498_vm11, %vm1499_vm9  ;;  %v1522_v32 = vand.u32 2147483647, %v1512_v40  ;;  %v1525_v57 = vor.u32 1.1754944e-38, %v1524_v58  ;;  %v3974_v35 = vor.u32 %v4239_v23, %v3971_v26  ;;  %v4228_v58 = vld [vmem:[#allocation3 + $0x18c] sm:$0xf0] }
 0x51b   :  { %v1495_v12 = vsub.f32 1.0, %v1494_v4  ;;  %v3953_v4 = vld [vmem:[#allocation3 + $0x1c8] sm:$0xf]  ;;  %v4222_v23 = vld [vmem:[#allocation3 + $0x164] sm:$0xf] }
 0x51c   :  { %v1477_v39 = vmul.f32 %v4382_v45, %v1476_v11  ;;  %vm1523_vm3 = vcmp.eq.f32.partialorder %v1522_v32, 8.507059e+37  ;;  %v4237_v11 = vld [vmem:[#allocation3 + $0x1d4] sm:$0xf0]  ;;  %v4226_v32 = vld [vmem:[#allocation3 + $0x184] sm:$0xf] }
 0x51d   :  { %v1496_v24 = vmul.f32 %v4384_v62, %v1495_v12  ;;  %v4235_v12 = vld [vmem:[#allocation3 + $0x1cc] sm:$0xf]  ;;  %v3954_v16 = vor.u32 %v4237_v11, %v3953_v4  ;;  %v3899_v26 = vld [vmem:[#allocation3 + $0x170] sm:$0xf0]  ;;  %v4220_v4 = vld [vmem:[#allocation3 + $0x14c] sm:$0xf0] }
 0x51e   :  { %v4386_v50 = vpop.eup %4385  ;;  %v1478_v5 = vadd.f32 %v4382_v45, %v1477_v39  ;;  %v3929_v39 = vld [vmem:[#allocation3 + $0x1a0] sm:$0xf]  ;;  %v4218_v11 = vld [vmem:[#allocation3 + $0x144] sm:$0xf] }
 0x51f   :  { %v1497_v18 = vadd.f32 %v4384_v62, %v1496_v24  ;;  %v1514_v10 = vmul.f32 %v4386_v50, %v1512_v40  ;;  %v4388_v14 = vpop.eup %4387  ;;  %vm1519_vm0 = vweird.f32 %v4386_v50  ;;  %v4236_v40 = vld [vmem:[#allocation3 + $0x1cc] sm:$0xf0]  ;;  %v5981_v24 = vld [vmem:[#allocation33_spill] sm:$0xff] }
 0x520   :  { %v1482_v44 = vsel %vm1481_vm12, %v4382_v45, %v1478_v5  ;;  %vm1520_vm2 = vmor %vm1518_vm1, %vm1519_vm0  ;;  %v4234_v45 = vld [vmem:[#allocation3 + $0x1c4] sm:$0xf]  ;;  %v3946_v55 = vor.u32 %v4236_v40, %v3945_v38  ;;  %v415_v33 = vadd.f32 %v5981_v24, %v4861_v56  ;;  %v3930_v5 = vor.u32 %v4232_v28, %v3929_v39  ;;  %v4225_v38 = vld [vmem:[#allocation3 + $0x174] sm:$0xf0] }
 0x521   :  { %v1487_v22 = vsel %vm1484_vm14, %v1486_v36, %v1482_v44  ;;  %v1501_v25 = vsel %vm1500_vm13, %v4384_v62, %v1497_v18  ;;  %v1515_v27 = vsub.f32 1.0, %v1514_v10  ;;  %v3947_v62 = vld [vmem:[#allocation3 + $0x1d0] sm:$0xf0]  ;;  %v4230_v36 = vld [vmem:[#allocation3 + $0x1a4] sm:$0xf] }
 0x522   :  { %v1506_v51 = vsel %vm1503_vm15, %v1505_v2, %v1501_v25  ;;  %v1529_v31 = vmul.f32 %v4388_v14, %v1487_v22  ;;  %v3950_v63 = vor.u32 %v4234_v45, %v3947_v62  ;;  %v3931_v18 = vld [vmem:[#allocation3 + $0x1b0] sm:$0xf0]  ;;  %v3937_v10 = vld [vmem:[#allocation3 + $0x1a8] sm:$0xf]  ;;  %v4233_v22 = vld [vmem:[#allocation3 + $0x1b4] sm:$0xf0] }
 0x523   :  { %v1528_v17 = vmul.f32 %v1506_v51, %v5162_v15  ;;  %v1516_v0 = vmul.f32 %v4386_v50, %v1515_v27  ;;  %v3961_v15 = vld [vmem:[#allocation3 + $0x1e0] sm:$0xf]  ;;  %v3934_v14 = vor.u32 %v4230_v36, %v3931_v18  ;;  %v4231_v25 = vld [vmem:[#allocation3 + $0x1ac] sm:$0xf]  ;;  %v3939_v27 = vld [vmem:[#allocation3 + $0x1b8] sm:$0xf0] }
 0x524   :  { %v3962_v1 = vor.u32 %v4240_v48, %v3961_v15  ;;  %v3942_v56 = vor.u32 %v4231_v25, %v3939_v27  ;;  %v4227_v15 = vld [vmem:[#allocation3 + $0x18c] sm:$0xf]  ;;  %v3923_v48 = vld [vmem:[#allocation3 + $0x198] sm:$0xf0]  ;;  %v3881_v62 = vld [vmem:[#allocation3 + $0x140] sm:$0xf] }
 0x525   :  { %v5205_v52 = vadd.f32 %v1529_v31, %v1528_v17  ;;  %v1517_v3 = vadd.f32 %v4386_v50, %v1516_v0  ;;  %v3938_v0 = vor.u32 %v4233_v22, %v3937_v10  ;;  %v3889_v39 = vld [vmem:[#allocation3 + $0x148] sm:$0xf]  ;;  %v4221_v28 = vld [vmem:[#allocation3 + $0x154] sm:$0xf0]  ;;  %v3865_v36 = vld [vmem:[#allocation3 + $0x120] sm:$0xf] }
 0x526   :  { %v3890_v25 = vor.u32 %v4221_v28, %v3889_v39 }
 0x527   :  { %4389 = vtanh.f32 %v5205_v52  ;;  %v1521_v6 = vsel %vm1520_vm2, %v4386_v50, %v1517_v3  ;;  %v3958_v50 = vor.u32 %v4235_v12, %v3955_v43  ;;  %v3913_v3 = vld [vmem:[#allocation3 + $0x180] sm:$0xf]  ;;  %v3883_v43 = vld [vmem:[#allocation3 + $0x150] sm:$0xf0] }
 0x528   :  { %v1526_v37 = vsel %vm1523_vm3, %v1525_v57, %v1521_v6  ;;  %v3914_v6 = vor.u32 %v4228_v58, %v3913_v3  ;;  %v3915_v57 = vld [vmem:[#allocation3 + $0x190] sm:$0xf0]  ;;  %v3886_v22 = vor.u32 %v4218_v11, %v3883_v43  ;;  %v3873_v58 = vld [vmem:[#allocation3 + $0x128] sm:$0xf] }
 0x52d   :  { %v4390_v29 = vpop.eup %4389 }
 0x52e   :  { %v1532_v41 = vmul.f32 %v4390_v29, %v1526_v37  ;;  %v3921_v29 = vld [vmem:[#allocation3 + $0x188] sm:$0xf]  ;;  %v4229_v37 = vld [vmem:[#allocation3 + $0x194] sm:$0xf0] }
 0x52f   :  { %v3922_v53 = vor.u32 %v4229_v37, %v3921_v29  ;;  %v4215_v29 = vld [vmem:[#allocation3 + $0x12c] sm:$0xf]  ;;  %v3875_v37 = vld [vmem:[#allocation3 + $0x138] sm:$0xf0] }
 0x530   :  { %v1533_v47 = vpack.c.bf16 %v1532_v41, %v1532_v41 }
 0x532   :  { %3821 = vst [vmem:[%s5924_s4 + $0x18] sm:$0xf] %v1533_v47  ;;  %1549 = vmatmul.bf16.vlgmr.msra.gmra.mxu0 %v1533_v47  ;;  %1562 = vmatmul.bf16.vlgmr.msra.gmra.mxu1 %v1533_v47 }
 0x533   :  { %1575 = vmatmul.bf16.vlgmr.msra.gmra.mxu2 %v1533_v47  ;;  %1588 = vmatmul.bf16.vlgmr.msra.gmra.mxu3 %v1533_v47  ;;  %v3918_v47 = vor.u32 %v4226_v32, %v3915_v57  ;;  %v4217_v57 = vld [vmem:[#allocation3 + $0x134] sm:$0xf0] }
 0x534   :  { %2031 = vmatpush.bf16.msra.mxu0 %v3962_v1  ;;  %2064 = vmatpush.bf16.msra.mxu1 %v3966_v20 }
 0x535   :  { %2097 = vmatpush.bf16.msra.mxu2 %v3970_v21  ;;  %2130 = vmatpush.bf16.msra.mxu3 %v3974_v35  ;;  %v3905_v35 = vld [vmem:[#allocation3 + $0x168] sm:$0xf] }
 0x538   :  { %2032 = vmatpush.bf16.msra.mxu0 %v3946_v55  ;;  %2065 = vmatpush.bf16.msra.mxu1 %v3950_v63  ;;  %v3907_v55 = vld [vmem:[#allocation3 + $0x178] sm:$0xf0] }
 0x539   :  { %2098 = vmatpush.bf16.msra.mxu2 %v3954_v16  ;;  %2131 = vmatpush.bf16.msra.mxu3 %v3958_v50  ;;  %v3882_v16 = vor.u32 %v4220_v4, %v3881_v62  ;;  %v4219_v50 = vld [vmem:[#allocation3 + $0x14c] sm:$0xf] }
 0x53c   :  { %2033 = vmatpush.bf16.msra.mxu0 %v3930_v5  ;;  %2066 = vmatpush.bf16.msra.mxu1 %v3934_v14  ;;  %v3891_v5 = vld [vmem:[#allocation3 + $0x158] sm:$0xf0] }
 0x53d   :  { %2099 = vmatpush.bf16.msra.mxu2 %v3938_v0  ;;  %2132 = vmatpush.bf16.msra.mxu3 %v3942_v56  ;;  %v3894_v27 = vor.u32 %v4219_v50, %v3891_v5  ;;  %v4207_v50 = vld [vmem:[%s5924_s4 + $0x8] sm:$0xff]  ;;  %v4089_v5 = vld [vmem:[#allocation5 + $0x1e0] sm:$0xf]  ;;  %v4266_v0 = vld [vmem:[#allocation5 + $0x1c4] sm:$0xf] }
 0x540   :  { %2034 = vmatpush.bf16.msra.mxu0 %v3914_v6  ;;  %2067 = vmatpush.bf16.msra.mxu1 %v3918_v47  ;;  %v3874_v47 = vor.u32 %v4217_v57, %v3873_v58  ;;  %v5985_v57 = vld [vmem:[#allocation34_spill] sm:$0xff] }
 0x541   :  { %2100 = vmatpush.bf16.msra.mxu2 %v3922_v53  ;;  %v4210_v53 = vld [vmem:[#allocation3 + $0x104] sm:$0xf] }
 0x5af   :  { %v1550_v13 = vpop.f32.mrf.mxu0  ;;  %v1563_v19 = vpop.f32.mrf.mxu1 }
 0x5b0   :  { %v1593_v30 = vadd.f32 %v1550_v13, %v316_v59  ;;  %v1594_v34 = vadd.f32 %v1563_v19, %v349_v61  ;;  %v3926_v61 = vor.u32 %v4227_v15, %v3923_v48  ;;  %v4224_v13 = vld [vmem:[#allocation3 + $0x16c] sm:$0xf0]  ;;  %v5982_v19 = vld [vmem:[#allocation32_spill] sm:$0xff]  ;;  %v3878_v15 = vor.u32 %v4215_v29, %v3875_v37  ;;  %v3849_v48 = vld [vmem:[#allocation3 + $0x100] sm:$0xf] }
 0x5b1   :  { %v382_v20 = vadd.f32 %v5982_v19, %v4859_v54  ;;  %v3898_v21 = vor.u32 %v4224_v13, %v3897_v7  ;;  %v4213_v13 = vld [vmem:[#allocation3 + $0x114] sm:$0xf0]  ;;  %v5986_v37 = vld [vmem:[#allocation35_spill] sm:$0xff] }
 0x5b2   :  { %v3822_v42 = vmul.f32 -1.442695, %v1593_v30  ;;  %v3823_v46 = vmul.f32 -1.442695, %v1594_v34  ;;  %2133 = vmatpush.bf16.msra.mxu3 %v3926_v61  ;;  %v3902_v34 = vor.u32 %v4222_v23, %v3899_v26 }
 0x5b3   :  { %2035 = vmatpush.bf16.msra.mxu0 %v3898_v21 }
 0x5b4   :  { %4391 = vpow2.f32 %v3822_v42  ;;  %v3906_v42 = vor.u32 %v4225_v38, %v3905_v35  ;;  %2068 = vmatpush.bf16.msra.mxu1 %v3902_v34  ;;  %v3859_v34 = vld [vmem:[#allocation3 + $0x118] sm:$0xf0] }
 0x5b5   :  { %4393 = vpow2.f32 %v3823_v46  ;;  %v4223_v46 = vld [vmem:[#allocation3 + $0x16c] sm:$0xf] }
 0x5b6   :  { %v1576_v2 = vpop.f32.mrf.mxu2  ;;  %v1589_v44 = vpop.f32.mrf.mxu3  ;;  %v3910_v54 = vor.u32 %v4223_v46, %v3907_v55  ;;  %2101 = vmatpush.bf16.msra.mxu2 %v3906_v42 }
 0x5b7   :  { %v1596_v51 = vadd.f32 %v1589_v44, %v415_v33  ;;  %v1552_v31 = vpop.f32.mrf.mxu0  ;;  %v1565_v17 = vpop.f32.mrf.mxu1  ;;  %v1595_v45 = vadd.f32 %v1576_v2, %v382_v20  ;;  %2036 = vmatpush.bf16.msra.mxu0 %v3882_v16  ;;  %v4216_v44 = vld [vmem:[#allocation3 + $0x12c] sm:$0xf0] }
 0x5b8   :  { %2134 = vmatpush.bf16.msra.mxu3 %v3910_v54  ;;  %v3867_v31 = vld [vmem:[#allocation3 + $0x130] sm:$0xf0]  ;;  %v3866_v3 = vor.u32 %v4216_v44, %v3865_v36  ;;  %2069 = vmatpush.bf16.msra.mxu1 %v3886_v22  ;;  %v4272_v36 = vld [vmem:[#allocation5 + $0x1ec] sm:$0xf0]  ;;  %v4271_v44 = vld [vmem:[#allocation5 + $0x1ec] sm:$0xf] }
 0x5b9   :  { %v3824_v41 = vmul.f32 -1.442695, %v1596_v51  ;;  %v4214_v51 = vld [vmem:[#allocation3 + $0x124] sm:$0xf] }
 0x5ba   :  { %v4392_v49 = vpop.eup %4391  ;;  %2102 = vmatpush.bf16.msra.mxu2 %v3890_v25  ;;  %v3870_v6 = vor.u32 %v4214_v51, %v3867_v31  ;;  %v4073_v31 = vld [vmem:[#allocation5 + $0x1c0] sm:$0xf] }
 0x5bb   :  { %v4394_v59 = vpop.eup %4393  ;;  %v5217_v60 = vadd.f32 1.0, %v4392_v49  ;;  %4395 = vpow2.f32 %v3824_v41  ;;  %2037 = vmatpush.bf16.msra.mxu0 %v3866_v3  ;;  %v4212_v49 = vld [vmem:[#allocation3 + $0x10c] sm:$0xf0]  ;;  %v4075_v3 = vld [vmem:[#allocation5 + $0x1d0] sm:$0xf0] }
 0x5bc   :  { %v5219_v1 = vadd.f32 1.0, %v4394_v59  ;;  %2135 = vmatpush.bf16.msra.mxu3 %v3894_v27  ;;  %v3850_v7 = vor.u32 %v4212_v49, %v3849_v48  ;;  %2070 = vmatpush.bf16.msra.mxu1 %v3870_v6  ;;  %v4208_v27 = vld [vmem:[%s5924_s4 + $0x10] sm:$0xff]  ;;  %v5296_v58 = vor.u32 %v4266_v0, %v4075_v3  ;;  %v4259_v3 = vld [vmem:[#allocation5 + $0x18c] sm:$0xf] }
 0x5bd   :  { %4397 = vrcp.f32 %v5217_v60  ;;  %v1610_v30 = vand.u32 2147483647, %v5217_v60  ;;  %v1612_v2 = vand.u32 2147483648, %v5217_v60  ;;  %vm1606_vm8 = vweird.f32 %v5217_v60 }
 0x5be   :  { %4399 = vrcp.f32 %v5219_v1  ;;  %v1578_v8 = vpop.f32.mrf.mxu2  ;;  %v1591_v9 = vpop.f32.mrf.mxu3  ;;  %v1631_v10 = vand.u32 2147483648, %v5219_v1  ;;  %v1629_v56 = vand.u32 2147483647, %v5219_v1  ;;  %vm1625_vm7 = vweird.f32 %v5219_v1  ;;  %2103 = vmatpush.bf16.msra.mxu2 %v3874_v47 }
 0x5bf   :  { %vm5239_vm4 = vcmp.eq.f32.partialorder %v1610_v30, 8.507059e+37  ;;  %v3851_v8 = vld [vmem:[#allocation3 + $0x110] sm:$0xf0]  ;;  %v3857_v9 = vld [vmem:[#allocation3 + $0x108] sm:$0xf]  ;;  %v1613_v21 = vor.u32 1.1754944e-38, %v1612_v2  ;;  %2038 = vmatpush.bf16.msra.mxu0 %v3850_v7 }
 0x5c0   :  { %v1632_v20 = vor.u32 1.1754944e-38, %v1631_v10  ;;  %v4211_v30 = vld [vmem:[#allocation3 + $0x10c] sm:$0xf]  ;;  %vm1630_vm11 = vcmp.eq.f32.partialorder %v1629_v56, 8.507059e+37  ;;  %v3854_v35 = vor.u32 %v4210_v53, %v3851_v8  ;;  %v3858_v38 = vor.u32 %v4213_v13, %v3857_v9  ;;  %2136 = vmatpush.bf16.msra.mxu3 %v3878_v15  ;;  %v4091_v2 = vld [vmem:[#allocation5 + $0x1f0] sm:$0xf0] }
 0x5c1   :  { %v4396_v40 = vpop.eup %4395  ;;  %v3862_v46 = vor.u32 %v4211_v30, %v3859_v34  ;;  %v5279_v10 = vor.u32 %v4272_v36, %v4089_v5  ;;  %v5987_v53 = vld [vmem:[#allocation37_spill] sm:$0xff]  ;;  %v4097_v9 = vld [vmem:[#allocation5 + $0x1e8] sm:$0xf]  ;;  %v4273_v13 = vld [vmem:[#allocation5 + $0x1f4] sm:$0xf0] }
 0x5c2   :  { %v5226_v63 = vadd.f32 1.0, %v4396_v40  ;;  %2071 = vmatpush.bf16.msra.mxu1 %v3854_v35  ;;  %2104 = vmatpush.bf16.msra.mxu2 %v3858_v38  ;;  %v4267_v30 = vld [vmem:[#allocation5 + $0x1cc] sm:$0xf]  ;;  %v4083_v34 = vld [vmem:[#allocation5 + $0x1d8] sm:$0xf0] }
 0x5c3   :  { %v5228_v12 = vpop.eup %4397 }
 0x5c4   :  { %v5230_v24 = vpop.eup %4399  ;;  %v1602_v33 = vmul.f32 %v5228_v12, %v5217_v60  ;;  %4401 = vrcp.f32 %v5226_v63  ;;  %vm1607_vm5 = vweird.f32 %v5228_v12  ;;  %2137 = vmatpush.bf16.msra.mxu3 %v3862_v46  ;;  %vm1645_vm13 = vweird.f32 %v5226_v63 }
 0x5c5   :  { %v1621_v18 = vmul.f32 %v5230_v24, %v5219_v1  ;;  %4403 = vtanh.f32 %v1595_v45  ;;  %vm1626_vm6 = vweird.f32 %v5230_v24  ;;  %vm1608_vm9 = vmor %vm1606_vm8, %vm1607_vm5  ;;  %v1649_v16 = vand.u32 2147483647, %v5226_v63 }
 0x5c6   :  { %v1603_v14 = vsub.f32 1.0, %v1602_v33  ;;  %vm1627_vm10 = vmor %vm1625_vm7, %vm1626_vm6 }
 0x5c7   :  { %v1622_v17 = vsub.f32 1.0, %v1621_v18  ;;  %vm1650_vm15 = vcmp.eq.f32.partialorder %v1649_v16, 8.507059e+37  ;;  %v4270_v18 = vld [vmem:[#allocation5 + $0x1e4] sm:$0xf] }
 0x5c8   :  { %v1604_v32 = vmul.f32 %v5228_v12, %v1603_v14  ;;  %v4099_v14 = vld [vmem:[#allocation5 + $0x1f8] sm:$0xf0]  ;;  %v5281_v22 = vor.u32 %v4270_v18, %v4091_v2  ;;  %v4260_v18 = vld [vmem:[#allocation5 + $0x18c] sm:$0xf0]  ;;  %v4258_v2 = vld [vmem:[#allocation5 + $0x184] sm:$0xf] }
 0x5c9   :  { %v1623_v41 = vmul.f32 %v5230_v24, %v1622_v17  ;;  %v5283_v25 = vor.u32 %v4271_v44, %v4099_v14  ;;  %v4268_v17 = vld [vmem:[#allocation5 + $0x1cc] sm:$0xf0]  ;;  %v4043_v44 = vld [vmem:[#allocation5 + $0x190] sm:$0xf0] }
 0x5ca   :  { %v4402_v59 = vpop.eup %4401  ;;  %v1605_v61 = vadd.f32 %v5228_v12, %v1604_v32  ;;  %v5294_v56 = vor.u32 %v4268_v17, %v4073_v31  ;;  %v4265_v31 = vld [vmem:[#allocation5 + $0x1b4] sm:$0xf0] }
 0x5cb   :  { %v4404_v19 = vpop.eup %4403  ;;  %v1624_v23 = vadd.f32 %v5230_v24, %v1623_v41  ;;  %v1641_v26 = vmul.f32 %v4402_v59, %v5226_v63  ;;  %vm1646_vm12 = vweird.f32 %v4402_v59 }
 0x5cc   :  { %v1609_v60 = vsel %vm1608_vm9, %v5228_v12, %v1605_v61  ;;  %v1651_v12 = vand.u32 2147483648, %v5226_v63  ;;  %vm1647_vm14 = vmor %vm1645_vm13, %vm1646_vm12  ;;  %v4206_v63 = vld [vmem:[%s5924_s4] sm:$0xff] }
 0x5cd   :  { %v1614_v40 = vsel %vm5239_vm4, %v1613_v21, %v1609_v60  ;;  %v1628_v45 = vsel %vm1627_vm10, %v5230_v24, %v1624_v23  ;;  %v1642_v42 = vsub.f32 1.0, %v1641_v26 }
 0x5ce   :  { %v1633_v55 = vsel %vm1630_vm11, %v1632_v20, %v1628_v45  ;;  %v1656_v62 = vmul.f32 %v4404_v19, %v1614_v40  ;;  %v1652_v39 = vor.u32 1.1754944e-38, %v1651_v12  ;;  %v5303_v20 = vor.u32 %v4273_v13, %v4097_v9  ;;  %v4057_v45 = vld [vmem:[#allocation5 + $0x1a0] sm:$0xf]  ;;  %v4049_v9 = vld [vmem:[#allocation5 + $0x188] sm:$0xf] }
 0x5cf   :  { %v1655_v1 = vmul.f32 %v1633_v55, %v5205_v52  ;;  %v1643_v54 = vmul.f32 %v4402_v59, %v1642_v42  ;;  %v5309_v40 = vor.u32 %v4267_v30, %v4083_v34  ;;  %v4264_v42 = vld [vmem:[#allocation5 + $0x1ac] sm:$0xf0]  ;;  %v4261_v13 = vld [vmem:[#allocation5 + $0x194] sm:$0xf0]  ;;  %v4255_v30 = vld [vmem:[#allocation5 + $0x16c] sm:$0xf] }
 0x5d0   :  { %v5311_v55 = vor.u32 %v4264_v42, %v4057_v45  ;;  %v4035_v34 = vld [vmem:[#allocation5 + $0x178] sm:$0xf0]  ;;  %v5370_v42 = vor.u32 %v4261_v13, %v4049_v9  ;;  %v3977_v9 = vld [vmem:[#allocation5 + $0x100] sm:$0xf]  ;;  %v4244_v13 = vld [vmem:[#allocation5 + $0x10c] sm:$0xf0] }
 0x5d1   :  { %v5264_v4 = vadd.f32 %v1656_v62, %v1655_v1  ;;  %v1644_v11 = vadd.f32 %v4402_v59, %v1643_v54  ;;  %v4262_v62 = vld [vmem:[#allocation5 + $0x1a4] sm:$0xf]  ;;  %v4059_v1 = vld [vmem:[#allocation5 + $0x1b0] sm:$0xf0] }
 0x5d2   :  { %v5315_v16 = vor.u32 %v4262_v62, %v4059_v1  ;;  %v4250_v62 = vld [vmem:[#allocation5 + $0x144] sm:$0xf]  ;;  %v4011_v1 = vld [vmem:[#allocation5 + $0x150] sm:$0xf0] }
 0x5d3   :  { %4405 = vtanh.f32 %v5264_v4  ;;  %v1648_v43 = vsel %vm1647_vm14, %v4402_v59, %v1644_v11  ;;  %v5988_v11 = vld [vmem:[#allocation36_spill] sm:$0xff] }
 0x5d4   :  { %v1653_v28 = vsel %vm1650_vm15, %v1652_v39, %v1648_v43  ;;  %v4081_v43 = vld [vmem:[#allocation5 + $0x1c8] sm:$0xf]  ;;  %v4269_v39 = vld [vmem:[#allocation5 + $0x1d4] sm:$0xf0] }
 0x5d9   :  { %v4406_v52 = vpop.eup %4405 }
 0x5da   :  { %v1659_v24 = vmul.f32 %v4406_v52, %v1653_v28  ;;  %v4263_v52 = vld [vmem:[#allocation5 + $0x1ac] sm:$0xf] }
 0x5dc   :  { %v1660_v33 = vpack.c.bf16 %v1659_v24, %v1659_v24 }
 0x5de   :  { %3825 = vst [vmem:[%s5924_s4 + $0x1c] sm:$0xf] %v1660_v33  ;;  %1676 = vmatmul.bf16.vlgmr.msrb.gmra.mxu0 %v1660_v33  ;;  %1689 = vmatmul.bf16.vlgmr.msrb.gmra.mxu1 %v1660_v33 }
 0x5df   :  { %1702 = vmatmul.bf16.vlgmr.msrb.gmra.mxu2 %v1660_v33  ;;  %1715 = vmatmul.bf16.vlgmr.msrb.gmra.mxu3 %v1660_v33  ;;  %v5321_v33 = vor.u32 %v4269_v39, %v4081_v43  ;;  %v5386_v39 = vor.u32 %v4255_v30, %v4035_v34  ;;  %v3979_v34 = vld [vmem:[#allocation5 + $0x110] sm:$0xf0] }
 0x5e0   :  { %2396 = vmatpush.bf16.msrb.mxu0 %v5279_v10  ;;  %2409 = vmatpush.bf16.msrb.mxu1 %v5281_v22 }
 0x5e1   :  { %2435 = vmatpush.bf16.msrb.mxu3 %v5283_v25  ;;  %2422 = vmatpush.bf16.msrb.mxu2 %v5303_v20 }
 0x5e4   :  { %2397 = vmatpush.bf16.msrb.mxu0 %v5294_v56  ;;  %2410 = vmatpush.bf16.msrb.mxu1 %v5296_v58 }
 0x5e5   :  { %v4209_v51 = vld [vmem:[%s5924_s4 + $0x18] sm:$0xff]  ;;  %2436 = vmatpush.bf16.msrb.mxu3 %v5309_v40  ;;  %2423 = vmatpush.bf16.msrb.mxu2 %v5321_v33 }
 0x5e8   :  { %2398 = vmatpush.bf16.msrb.mxu0 %v5311_v55  ;;  %2411 = vmatpush.bf16.msrb.mxu1 %v5315_v16 }
 0x5ee   :  { %2039 = vmatmul.bf16.vlgmr.msra.gmra.mxu0 %v4206_v63  ;;  %2072 = vmatmul.bf16.vlgmr.msra.gmra.mxu1 %v4206_v63 }
 0x5ef   :  { %2105 = vmatmul.bf16.vlgmr.msra.gmra.mxu2 %v4206_v63  ;;  %2138 = vmatmul.bf16.vlgmr.msra.gmra.mxu3 %v4206_v63  ;;  %v4067_v63 = vld [vmem:[#allocation5 + $0x1b8] sm:$0xf0] }
 0x5f0   :  { %v5326_v36 = vor.u32 %v4263_v52, %v4067_v63  ;;  %v4033_v52 = vld [vmem:[#allocation5 + $0x168] sm:$0xf] }
 0x5f2   :  { %2437 = vmatpush.bf16.msrb.mxu3 %v5326_v36 }
 0x5fe   :  { %2044 = vmatmul.bf16.gmra.mxu0 %v4207_v50  ;;  %2077 = vmatmul.bf16.gmra.mxu1 %v4207_v50 }
 0x5ff   :  { %2110 = vmatmul.bf16.gmra.mxu2 %v4207_v50  ;;  %2143 = vmatmul.bf16.gmra.mxu3 %v4207_v50  ;;  %v4041_v50 = vld [vmem:[#allocation5 + $0x180] sm:$0xf] }
 0x60e   :  { %2049 = vmatmul.bf16.gmra.mxu0 %v4208_v27  ;;  %2082 = vmatmul.bf16.gmra.mxu1 %v4208_v27 }
 0x60f   :  { %2115 = vmatmul.bf16.gmra.mxu2 %v4208_v27  ;;  %2148 = vmatmul.bf16.gmra.mxu3 %v4208_v27 }
 0x61e   :  { %2054 = vmatmul.bf16.gmra.mxu0 %v4209_v51  ;;  %2087 = vmatmul.bf16.gmra.mxu1 %v4209_v51 }
 0x61f   :  { %2120 = vmatmul.bf16.gmra.mxu2 %v4209_v51  ;;  %2153 = vmatmul.bf16.gmra.mxu3 %v4209_v51  ;;  %v4065_v51 = vld [vmem:[#allocation5 + $0x1a8] sm:$0xf] }
 0x65b   :  { %v1677_v32 = vpop.f32.mrf.mxu0  ;;  %v1690_v6 = vpop.f32.mrf.mxu1 }
 0x65c   :  { %v1720_v29 = vadd.f32 %v1677_v32, %v5985_v57  ;;  %v1721_v41 = vadd.f32 %v1690_v6, %v5986_v37  ;;  %v4051_v32 = vld [vmem:[#allocation5 + $0x198] sm:$0xf0]  ;;  %v5338_v57 = vor.u32 %v4260_v18, %v4041_v50  ;;  %v5342_v37 = vor.u32 %v4265_v31, %v4065_v51 }
 0x65d   :  { %v5394_v18 = vor.u32 %v4250_v62, %v4011_v1 }
 0x65e   :  { %v3826_v47 = vmul.f32 -1.442695, %v1720_v29  ;;  %v3827_v15 = vmul.f32 -1.442695, %v1721_v41  ;;  %v5340_v29 = vor.u32 %v4258_v2, %v4043_v44  ;;  %v4025_v41 = vld [vmem:[#allocation5 + $0x160] sm:$0xf]  ;;  %2399 = vmatpush.bf16.msrb.mxu0 %v5338_v57  ;;  %2424 = vmatpush.bf16.msrb.mxu2 %v5342_v37 }
 0x65f   :  { %v4251_v2 = vld [vmem:[#allocation5 + $0x14c] sm:$0xf]  ;;  %v4019_v44 = vld [vmem:[#allocation5 + $0x158] sm:$0xf0] }
 0x660   :  { %4407 = vpow2.f32 %v3826_v47  ;;  %v4256_v47 = vld [vmem:[#allocation5 + $0x16c] sm:$0xf0]  ;;  %2412 = vmatpush.bf16.msrb.mxu1 %v5340_v29 }
 0x661   :  { %4409 = vpow2.f32 %v3827_v15 }
 0x662   :  { %v1703_v48 = vpop.f32.mrf.mxu2  ;;  %v1716_v49 = vpop.f32.mrf.mxu3  ;;  %2425 = vmatpush.bf16.msrb.mxu2 %v5370_v42 }
 0x663   :  { %v1723_v59 = vadd.f32 %v1716_v49, %v5987_v53  ;;  %v1679_v61 = vpop.f32.mrf.mxu0  ;;  %v1692_v7 = vpop.f32.mrf.mxu1  ;;  %v1722_v12 = vadd.f32 %v1703_v48, %v5988_v11  ;;  %v5410_v53 = vor.u32 %v4251_v2, %v4019_v44  ;;  %v4243_v11 = vld [vmem:[#allocation5 + $0x10c] sm:$0xf] }
 0x664   :  { %v4254_v61 = vld [vmem:[#allocation5 + $0x164] sm:$0xf] }
 0x665   :  { %v3828_v8 = vmul.f32 -1.442695, %v1723_v59 }
 0x666   :  { %v4408_v19 = vpop.eup %4407 }
 0x667   :  { %v4410_v21 = vpop.eup %4409  ;;  %v1727_v23 = vadd.f32 1.0, %v4408_v19  ;;  %4411 = vpow2.f32 %v3828_v8  ;;  %v4027_v8 = vld [vmem:[#allocation5 + $0x170] sm:$0xf0] }
 0x668   :  { %v5305_v26 = vadd.f32 1.0, %v4410_v21  ;;  %v5360_v21 = vor.u32 %v4259_v3, %v4051_v32  ;;  %v5368_v45 = vor.u32 %v4254_v61, %v4027_v8  ;;  %v4246_v3 = vld [vmem:[#allocation5 + $0x124] sm:$0xf]  ;;  %v4247_v61 = vld [vmem:[#allocation5 + $0x12c] sm:$0xf] }
 0x669   :  { %4413 = vrcp.f32 %v1727_v23  ;;  %v1737_v38 = vand.u32 2147483647, %v1727_v23  ;;  %v1739_v46 = vand.u32 2147483648, %v1727_v23  ;;  %vm1733_vm1 = vweird.f32 %v1727_v23 }
 0x66a   :  { %4415 = vrcp.f32 %v5305_v26  ;;  %v1705_v60 = vpop.f32.mrf.mxu2  ;;  %v1718_v35 = vpop.f32.mrf.mxu3  ;;  %v1758_v28 = vand.u32 2147483648, %v5305_v26  ;;  %v1756_v0 = vand.u32 2147483647, %v5305_v26  ;;  %vm1752_vm5 = vweird.f32 %v5305_v26  ;;  %2438 = vmatpush.bf16.msrb.mxu3 %v5360_v21  ;;  %2413 = vmatpush.bf16.msrb.mxu1 %v5368_v45 }
 0x66b   :  { %vm5350_vm3 = vcmp.eq.f32.partialorder %v1737_v38, 8.507059e+37  ;;  %v1740_v59 = vor.u32 1.1754944e-38, %v1739_v46  ;;  %v4009_v60 = vld [vmem:[#allocation5 + $0x140] sm:$0xf]  ;;  %v4252_v46 = vld [vmem:[#allocation5 + $0x14c] sm:$0xf0] }
 0x66c   :  { %v1759_v48 = vor.u32 1.1754944e-38, %v1758_v28  ;;  %vm5379_vm7 = vcmp.eq.f32.partialorder %v1756_v0, 8.507059e+37  ;;  %v4257_v28 = vld [vmem:[#allocation5 + $0x174] sm:$0xf0]  ;;  %v5392_v50 = vor.u32 %v4252_v46, %v4009_v60  ;;  %v4248_v0 = vld [vmem:[#allocation5 + $0x12c] sm:$0xf0] }
 0x66d   :  { %v4412_v54 = vpop.eup %4411  ;;  %v4001_v60 = vld [vmem:[#allocation5 + $0x128] sm:$0xf] }
 0x66e   :  { %v5318_v24 = vadd.f32 1.0, %v4412_v54  ;;  %2439 = vmatpush.bf16.msrb.mxu3 %v5386_v39  ;;  %2414 = vmatpush.bf16.msrb.mxu1 %v5394_v18 }
 0x66f   :  { %v5323_v5 = vpop.eup %4413 }
 0x670   :  { %v5328_v14 = vpop.eup %4415  ;;  %v1729_v27 = vmul.f32 %v5323_v5, %v1727_v23  ;;  %vm1734_vm0 = vweird.f32 %v5323_v5  ;;  %4417 = vrcp.f32 %v5318_v24  ;;  %v5362_v23 = vor.u32 %v4256_v47, %v4025_v41  ;;  %v3995_v41 = vld [vmem:[#allocation5 + $0x130] sm:$0xf0]  ;;  %v4017_v47 = vld [vmem:[#allocation5 + $0x148] sm:$0xf] }
 0x671   :  { %v1748_v17 = vmul.f32 %v5328_v14, %v5305_v26  ;;  %4419 = vtanh.f32 %v1722_v12  ;;  %vm5346_vm2 = vmor %vm1733_vm1, %vm1734_vm0  ;;  %vm1753_vm4 = vweird.f32 %v5328_v14  ;;  %v1778_v46 = vand.u32 2147483648, %v5318_v24 }
 0x672   :  { %v1730_v6 = vsub.f32 1.0, %v1729_v27  ;;  %vm5374_vm6 = vmor %vm1752_vm5, %vm1753_vm4  ;;  %2400 = vmatpush.bf16.msrb.mxu0 %v5362_v23  ;;  %v3993_v27 = vld [vmem:[#allocation5 + $0x120] sm:$0xf]  ;;  %2440 = vmatpush.bf16.msrb.mxu3 %v5410_v53  ;;  %vm1772_vm9 = vweird.f32 %v5318_v24  ;;  %v1776_v1 = vand.u32 2147483647, %v5318_v24 }
 0x673   :  { %v1749_v15 = vsub.f32 1.0, %v1748_v17 }
 0x674   :  { %v1731_v7 = vmul.f32 %v5323_v5, %v1730_v6  ;;  %vm1777_vm11 = vcmp.eq.f32.partialorder %v1776_v1, 8.507059e+37 }
 0x675   :  { %v1750_v19 = vmul.f32 %v5328_v14, %v1749_v15  ;;  %v4253_v15 = vld [vmem:[#allocation5 + $0x154] sm:$0xf0] }
 0x676   :  { %v5364_v35 = vpop.eup %4417  ;;  %v1732_v38 = vadd.f32 %v5323_v5, %v1731_v7  ;;  %2401 = vmatpush.bf16.msrb.mxu0 %v5392_v50  ;;  %v4003_v7 = vld [vmem:[#allocation5 + $0x138] sm:$0xf0] }
 0x677   :  { %v4420_v54 = vpop.eup %4419  ;;  %v1751_v12 = vadd.f32 %v5328_v14, %v1750_v19  ;;  %v1768_v43 = vmul.f32 %v5364_v35, %v5318_v24  ;;  %v4242_v19 = vld [vmem:[#allocation5 + $0x104] sm:$0xf]  ;;  %vm1773_vm8 = vweird.f32 %v5364_v35  ;;  %v5425_v62 = vor.u32 %v4247_v61, %v4003_v7 }
 0x678   :  { %v1736_v63 = vsel %vm5346_vm2, %v5323_v5, %v1732_v38  ;;  %v5403_v5 = vor.u32 %v4257_v28, %v4033_v52  ;;  %v4249_v38 = vld [vmem:[#allocation5 + $0x134] sm:$0xf0]  ;;  %vm1774_vm10 = vmor %vm1772_vm9, %vm1773_vm8  ;;  %v5434_v26 = vor.u32 %v4242_v19, %v3979_v34  ;;  %v3985_v28 = vld [vmem:[#allocation5 + $0x108] sm:$0xf]  ;;  %v1779_v24 = vor.u32 1.1754944e-38, %v1778_v46 }
 0x679   :  { %v1741_v51 = vsel %vm5350_vm3, %v1740_v59, %v1736_v63  ;;  %v1755_v31 = vsel %vm5374_vm6, %v5328_v14, %v1751_v12  ;;  %v1769_v17 = vsub.f32 1.0, %v1768_v43  ;;  %v5413_v59 = vor.u32 %v4248_v0, %v3993_v27  ;;  %v3987_v12 = vld [vmem:[#allocation5 + $0x118] sm:$0xf0]  ;;  %v4245_v63 = vld [vmem:[#allocation5 + $0x114] sm:$0xf0]  ;;  %2441 = vmatpush.bf16.msrb.mxu3 %v5425_v62 }
 0x67a   :  { %v1760_v32 = vsel %vm5379_vm7, %v1759_v48, %v1755_v31  ;;  %v1783_v6 = vmul.f32 %v4420_v54, %v1741_v51  ;;  %2426 = vmatpush.bf16.msrb.mxu2 %v5403_v5  ;;  %v5417_v48 = vor.u32 %v4246_v3, %v3995_v41  ;;  %v5430_v54 = vor.u32 %v4244_v13, %v3977_v9  ;;  %v2073_v41 = vpop.f32.mrf.mxu1 }
 0x67b   :  { %v1782_v49 = vmul.f32 %v1760_v32, %v5264_v4  ;;  %v1770_v14 = vmul.f32 %v5364_v35, %v1769_v17  ;;  %v5419_v4 = vor.u32 %v4253_v15, %v4017_v47  ;;  %2402 = vmatpush.bf16.msrb.mxu0 %v5413_v59  ;;  %v5436_v43 = vor.u32 %v4249_v38, %v4001_v60  ;;  %v5523_v47 = vpop.f32.mrf.mxu2  ;;  %v2139_v15 = vpop.f32.mrf.mxu3 }
 0x67c   :  { %2415 = vmatpush.bf16.msrb.mxu1 %v5417_v48  ;;  %v5440_v2 = vor.u32 %v4243_v11, %v3987_v12  ;;  %v5445_v51 = vor.u32 %v4245_v63, %v3985_v28  ;;  %v5997_v32 = vmov 0  }
 0x67d   :  { %v1784_v8 = vadd.f32 %v1783_v6, %v1782_v49  ;;  %v1771_v30 = vadd.f32 %v5364_v35, %v1770_v14  ;;  %v2040_v6 = vpop.f32.mrf.mxu0 }
 0x67e   :  { %2427 = vmatpush.bf16.msrb.mxu2 %v5419_v4  ;;  %2442 = vmatpush.bf16.msrb.mxu3 %v5440_v2 }
 0x67f   :  { %4421 = vtanh.f32 %v1784_v8  ;;  %v1775_v52 = vsel %vm1774_vm10, %v5364_v35, %v1771_v30  ;;  %2403 = vmatpush.bf16.msrb.mxu0 %v5430_v54 }
 0x680   :  { %v1780_v27 = vsel %vm1777_vm11, %v1779_v24, %v1775_v52  ;;  %2416 = vmatpush.bf16.msrb.mxu1 %v5434_v26 }
 0x682   :  { %2428 = vmatpush.bf16.msrb.mxu2 %v5436_v43  ;;  %2560 = vmatpush.bf16.msra.mxu3 %v5283_v25  ;;  %v5527_v14 = vpop.f32.mrf.mxu1 }
 0x683   :  { %2521 = vmatpush.bf16.msra.mxu0 %v5279_v10  ;;  %v5529_v61 = vpop.f32.mrf.mxu2  ;;  %v5531_v7 = vpop.f32.mrf.mxu3 }
 0x684   :  { %2534 = vmatpush.bf16.msra.mxu1 %v5281_v22  ;;  %5998 = vst [vmem:[#allocation9_spill] sm:$0xff] %v5529_v61 }
 0x685   :  { %v4422_v44 = vpop.eup %4421  ;;  %v5525_v49 = vpop.f32.mrf.mxu0 }
 0x686   :  { %v1786_v31 = vmul.f32 %v4422_v44, %v1780_v27  ;;  %2429 = vmatpush.bf16.msrb.mxu2 %v5445_v51  ;;  %2561 = vmatpush.bf16.msra.mxu3 %v5309_v40 }
 0x687   :  { %2522 = vmatpush.bf16.msra.mxu0 %v5294_v56 }
 0x688   :  { %v1787_v35 = vpack.c.bf16 %v1786_v31, %v1786_v31  ;;  %2535 = vmatpush.bf16.msra.mxu1 %v5296_v58 }
 0x68a   :  { %3829 = vst [vmem:[%s5924_s4 + $0x20] sm:$0xf] %v1787_v35  ;;  %2547 = vmatpush.bf16.msra.mxu2 %v5303_v20  ;;  %2562 = vmatpush.bf16.msra.mxu3 %v5326_v36  ;;  %v5535_v9 = vpop.f32.mrf.mxu1 }
 0x68b   :  { %2523 = vmatpush.bf16.msra.mxu0 %v5311_v55  ;;  %6000 = vst [vmem:[#allocation11_spill] sm:$0xff] %v5535_v9  ;;  %v5537_v13 = vpop.f32.mrf.mxu2  ;;  %v5539_v19 = vpop.f32.mrf.mxu3 }
 0x68c   :  { %2536 = vmatpush.bf16.msra.mxu1 %v5315_v16  ;;  %6001 = vst [vmem:[#allocation14_spill] sm:$0xff] %v5537_v13 }
 0x68d   :  { %v5533_v8 = vpop.f32.mrf.mxu0  ;;  %6002 = vst [vmem:[#allocation12_spill] sm:$0xff] %v5539_v19 }
 0x68e   :  { %2548 = vmatpush.bf16.msra.mxu2 %v5321_v33  ;;  %2563 = vmatpush.bf16.msra.mxu3 %v5360_v21  ;;  %5999 = vst [vmem:[#allocation10_spill] sm:$0xff] %v5533_v8 }
 0x68f   :  { %2524 = vmatpush.bf16.msra.mxu0 %v5338_v57 }
 0x690   :  { %2537 = vmatpush.bf16.msra.mxu1 %v5340_v29 }
 0x691   :  { %v1798_v17 = vld [vmem:[%s5924_s4 + $0x20] sm:$0xf] }
 0x692   :  { %v1860_v0 = vunpack.c.l.b16 %v1798_v17  ;;  %2549 = vmatpush.bf16.msra.mxu2 %v5342_v37  ;;  %2564 = vmatpush.bf16.msra.mxu3 %v5386_v39  ;;  %v5543_v34 = vpop.f32.mrf.mxu1 }
 0x693   :  { %2525 = vmatpush.bf16.msra.mxu0 %v5362_v23  ;;  %6004 = vst [vmem:[#allocation15_spill] sm:$0xff] %v5543_v34  ;;  %v5545_v60 = vpop.f32.mrf.mxu2  ;;  %v5547_v38 = vpop.f32.mrf.mxu3 }
 0x694   :  { %v1865_v3 = vpack.c.b16 %v1860_v0, %v1860_v0  ;;  %2538 = vmatpush.bf16.msra.mxu1 %v5368_v45  ;;  %6005 = vst [vmem:[#allocation17_spill] sm:$0xff] %v5545_v60 }
 0x695   :  { %v5541_v30 = vpop.f32.mrf.mxu0  ;;  %6006 = vst [vmem:[#allocation16_spill] sm:$0xff] %v5547_v38 }
 0x696   :  { %2059 = vmatmul.bf16.gmra.mxu0 %v1865_v3  ;;  %2092 = vmatmul.bf16.gmra.mxu1 %v1865_v3  ;;  %6003 = vst [vmem:[#allocation13_spill] sm:$0xff] %v5541_v30 }
 0x697   :  { %2125 = vmatmul.bf16.gmra.mxu2 %v1865_v3  ;;  %2158 = vmatmul.bf16.gmra.mxu3 %v1865_v3 }
 0x698   :  { %2550 = vmatpush.bf16.msra.mxu2 %v5370_v42  ;;  %2526 = vmatpush.bf16.msra.mxu0 %v5392_v50 }
 0x699   :  { %2539 = vmatpush.bf16.msra.mxu1 %v5394_v18  ;;  %2565 = vmatpush.bf16.msra.mxu3 %v5410_v53 }
 0x69a   :  { %v5551_v1 = vpop.f32.mrf.mxu1 }
 0x69b   :  { %6008 = vst [vmem:[#allocation19_spill] sm:$0xff] %v5551_v1  ;;  %v5553_v11 = vpop.f32.mrf.mxu2  ;;  %v5555_v12 = vpop.f32.mrf.mxu3 }
 0x69c   :  { %2551 = vmatpush.bf16.msra.mxu2 %v5403_v5  ;;  %2527 = vmatpush.bf16.msra.mxu0 %v5413_v59  ;;  %6009 = vst [vmem:[#allocation22_spill] sm:$0xff] %v5553_v11 }
 0x69d   :  { %2540 = vmatpush.bf16.msra.mxu1 %v5417_v48  ;;  %2566 = vmatpush.bf16.msra.mxu3 %v5425_v62  ;;  %v5549_v46 = vpop.f32.mrf.mxu0  ;;  %6010 = vst [vmem:[#allocation20_spill] sm:$0xff] %v5555_v12 }
 0x69e   :  { %6007 = vst [vmem:[#allocation18_spill] sm:$0xff] %v5549_v46 }
 0x6a0   :  { %2552 = vmatpush.bf16.msra.mxu2 %v5419_v4  ;;  %2528 = vmatpush.bf16.msra.mxu0 %v5430_v54 }
 0x6a1   :  { %2541 = vmatpush.bf16.msra.mxu1 %v5434_v26  ;;  %2567 = vmatpush.bf16.msra.mxu3 %v5440_v2 }
 0x6a2   :  { %v5559_v28 = vpop.f32.mrf.mxu1 }
 0x6a3   :  { %6012 = vst [vmem:[#allocation23_spill] sm:$0xff] %v5559_v28  ;;  %v5561_v63 = vpop.f32.mrf.mxu2  ;;  %v5563_v24 = vpop.f32.mrf.mxu3 }
 0x6a4   :  { %2553 = vmatpush.bf16.msra.mxu2 %v5436_v43  ;;  %6013 = vst [vmem:[#allocation25_spill] sm:$0xff] %v5561_v63 }
 0x6a5   :  { %v5557_v52 = vpop.f32.mrf.mxu0  ;;  %6014 = vst [vmem:[#allocation24_spill] sm:$0xff] %v5563_v24 }
 0x6a6   :  { %2404 = vmatmul.bf16.vlgmr.msrb.gmra.mxu0 %v5997_v32  ;;  %2417 = vmatmul.bf16.vlgmr.msrb.gmra.mxu1 %v5997_v32  ;;  %6011 = vst [vmem:[#allocation21_spill] sm:$0xff] %v5557_v52 }
 0x6a7   :  { %2430 = vmatmul.bf16.vlgmr.msrb.gmra.mxu2 %v5997_v32  ;;  %2443 = vmatmul.bf16.vlgmr.msrb.gmra.mxu3 %v5997_v32 }
 0x6a8   :  { %2554 = vmatpush.bf16.msra.mxu2 %v5445_v51  ;;  %2646 = vmatpush.bf16.msrb.mxu0 %v5279_v10 }
 0x6a9   :  { %2659 = vmatpush.bf16.msrb.mxu1 %v5281_v22  ;;  %2685 = vmatpush.bf16.msrb.mxu3 %v5283_v25 }
 0x6aa   :  { %v5567_v27 = vpop.f32.mrf.mxu1 }
 0x6ab   :  { %6016 = vst [vmem:[#allocation27_spill] sm:$0xff] %v5567_v27  ;;  %v5569_v31 = vpop.f32.mrf.mxu2  ;;  %v5571_v35 = vpop.f32.mrf.mxu3 }
 0x6ac   :  { %2672 = vmatpush.bf16.msrb.mxu2 %v5303_v20  ;;  %2647 = vmatpush.bf16.msrb.mxu0 %v5294_v56  ;;  %6017 = vst [vmem:[#allocation30_spill] sm:$0xff] %v5569_v31  ;;  %v3830_v31 = vld [vmem:[%s5923_s3 + $0x4] sm:$0xf] }
 0x6ad   :  { %2660 = vmatpush.bf16.msrb.mxu1 %v5296_v58  ;;  %2686 = vmatpush.bf16.msrb.mxu3 %v5309_v40  ;;  %v5565_v44 = vpop.f32.mrf.mxu0  ;;  %6018 = vst [vmem:[#allocation28_spill] sm:$0xff] %v5571_v35  ;;  %v5592_v27 = vperm.slane %v3830_v31, 0  ;;  %v5598_v12 = vperm.slane %v3830_v31, 3 }
 0x6ae   :  { %6015 = vst [vmem:[#allocation26_spill] sm:$0xff] %v5565_v44 }
 0x6b0   :  { %2673 = vmatpush.bf16.msrb.mxu2 %v5321_v33  ;;  %2648 = vmatpush.bf16.msrb.mxu0 %v5311_v55 }
 0x6b1   :  { %2661 = vmatpush.bf16.msrb.mxu1 %v5315_v16  ;;  %2687 = vmatpush.bf16.msrb.mxu3 %v5326_v36 }
 0x6b2   :  { %v5575_v0 = vpop.f32.mrf.mxu1 }
 0x6b3   :  { %6020 = vst [vmem:[#allocation31_spill] sm:$0xff] %v5575_v0  ;;  %v5577_v3 = vpop.f32.mrf.mxu2  ;;  %v5579_v32 = vpop.f32.mrf.mxu3  ;;  %v5594_v0 = vperm.slane %v3830_v31, 1 }
 0x6b4   :  { %2674 = vmatpush.bf16.msrb.mxu2 %v5342_v37  ;;  %2649 = vmatpush.bf16.msrb.mxu0 %v5338_v57  ;;  %6021 = vst [vmem:[#allocation33_spill] sm:$0xff] %v5577_v3  ;;  %v2041_v3 = vadd.f32 %v2040_v6, %v5592_v27 }
 0x6b5   :  { %2662 = vmatpush.bf16.msrb.mxu1 %v5340_v29  ;;  %2688 = vmatpush.bf16.msrb.mxu3 %v5360_v21  ;;  %v5573_v17 = vpop.f32.mrf.mxu0  ;;  %6022 = vst [vmem:[#allocation32_spill] sm:$0xff] %v5579_v32 }
 0x6b6   :  { %6019 = vst [vmem:[#allocation29_spill] sm:$0xff] %v5573_v17 }
 0x6b8   :  { %2675 = vmatpush.bf16.msrb.mxu2 %v5370_v42  ;;  %2650 = vmatpush.bf16.msrb.mxu0 %v5362_v23 }
 0x6b9   :  { %2663 = vmatpush.bf16.msrb.mxu1 %v5368_v45  ;;  %2689 = vmatpush.bf16.msrb.mxu3 %v5386_v39 }
 0x6bc   :  { %2676 = vmatpush.bf16.msrb.mxu2 %v5403_v5  ;;  %2651 = vmatpush.bf16.msrb.mxu0 %v5392_v50 }
 0x6bd   :  { %2664 = vmatpush.bf16.msrb.mxu1 %v5394_v18  ;;  %2690 = vmatpush.bf16.msrb.mxu3 %v5410_v53 }
 0x6c0   :  { %2677 = vmatpush.bf16.msrb.mxu2 %v5419_v4  ;;  %2652 = vmatpush.bf16.msrb.mxu0 %v5413_v59 }
 0x6c1   :  { %2665 = vmatpush.bf16.msrb.mxu1 %v5417_v48  ;;  %2691 = vmatpush.bf16.msrb.mxu3 %v5425_v62 }
 0x6c4   :  { %2678 = vmatpush.bf16.msrb.mxu2 %v5436_v43  ;;  %2653 = vmatpush.bf16.msrb.mxu0 %v5430_v54 }
 0x6c5   :  { %2666 = vmatpush.bf16.msrb.mxu1 %v5434_v26  ;;  %2692 = vmatpush.bf16.msrb.mxu3 %v5440_v2 }
 0x6c8   :  { %2679 = vmatpush.bf16.msrb.mxu2 %v5445_v51 }
 0x713   :  { %v5581_v28 = vpop.f32.mrf.mxu0  ;;  %v5583_v63 = vpop.f32.mrf.mxu1 }
 0x714   :  { %6023 = vst [vmem:[#allocation34_spill] sm:$0xff] %v5581_v28  ;;  %v2074_v28 = vadd.f32 %v2073_v41, %v5594_v0 }
 0x715   :  { %6024 = vst [vmem:[#allocation35_spill] sm:$0xff] %v5583_v63 }
 0x71a   :  { %v5585_v24 = vpop.f32.mrf.mxu2  ;;  %v5587_v44 = vpop.f32.mrf.mxu3 }
 0x71b   :  { %6025 = vst [vmem:[#allocation37_spill] sm:$0xff] %v5585_v24  ;;  %v2062_v35 = vpop.f32.mrf.mxu0  ;;  %v2095_v17 = vpop.f32.mrf.mxu1 }
 0x71c   :  { %6026 = vst [vmem:[#allocation36_spill] sm:$0xff] %v5587_v44  ;;  %v2140_v35 = vadd.f32 %v2139_v15, %v5598_v12 }
 0x722   :  { %v2128_v32 = vpop.f32.mrf.mxu2  ;;  %v2161_v63 = vpop.f32.mrf.mxu3 }
 0x723   :  { %v2405_v52 = vpop.f32.mrf.mxu0  ;;  %v2418_v24 = vpop.f32.mrf.mxu1 }
 0x724   :  { %v2448_v11 = vadd.f32 %v2405_v52, %v2041_v3  ;;  %v2449_v44 = vadd.f32 %v2418_v24, %v2074_v28  ;;  %v5601_v28 = vperm.slane %v3830_v31, 2 }
 0x726   :  { %v4103_v1 = vmul.f32 -1.442695, %v2448_v11  ;;  %v4104_v46 = vmul.f32 -1.442695, %v2449_v44  ;;  %6027 = vst [vmem:[#allocation38_spill] sm:$0xff] %v5601_v28  ;;  %v2107_v15 = vadd.f32 %v5523_v47, %v5601_v28 }
 0x728   :  { %4423 = vpow2.f32 %v4103_v1 }
 0x729   :  { %4425 = vpow2.f32 %v4104_v46 }
 0x72a   :  { %v2431_v17 = vpop.f32.mrf.mxu2  ;;  %v2444_v60 = vpop.f32.mrf.mxu3 }
 0x72b   :  { %v2451_v38 = vadd.f32 %v2444_v60, %v2140_v35  ;;  %v2407_v6 = vpop.f32.mrf.mxu0  ;;  %v2420_v34 = vpop.f32.mrf.mxu1  ;;  %v2450_v44 = vadd.f32 %v2431_v17, %v2107_v15 }
 0x72d   :  { %v4105_v41 = vmul.f32 -1.442695, %v2451_v38 }
 0x72e   :  { %v4424_v32 = vpop.eup %4423 }
 0x72f   :  { %v4426_v63 = vpop.eup %4425  ;;  %v2455_v30 = vadd.f32 1.0, %v4424_v32  ;;  %4427 = vpow2.f32 %v4105_v41 }
 0x730   :  { %v2474_v52 = vadd.f32 1.0, %v4426_v63 }
 0x731   :  { %4429 = vrcp.f32 %v2455_v30  ;;  %v2467_v41 = vand.u32 2147483648, %v2455_v30  ;;  %v2465_v63 = vand.u32 2147483647, %v2455_v30  ;;  %vm2461_vm14 = vweird.f32 %v2455_v30 }
 0x732   :  { %4431 = vrcp.f32 %v2474_v52  ;;  %v2446_v11 = vpop.f32.mrf.mxu3  ;;  %v2433_v1 = vpop.f32.mrf.mxu2  ;;  %v2486_v31 = vand.u32 2147483648, %v2474_v52  ;;  %vm2480_vm15 = vweird.f32 %v2474_v52 }
 0x733   :  { %v2484_v1 = vand.u32 2147483647, %v2474_v52  ;;  %v2468_v17 = vor.u32 1.1754944e-38, %v2467_v41  ;;  %vm2466_vm1 = vcmp.eq.f32.partialorder %v2465_v63, 8.507059e+37 }
 0x734   :  { %v2487_v19 = vor.u32 1.1754944e-38, %v2486_v31 }
 0x735   :  { %v4428_v24 = vpop.eup %4427  ;;  %vm2485_vm3 = vcmp.eq.f32.partialorder %v2484_v1, 8.507059e+37 }
 0x736   :  { %v2494_v46 = vadd.f32 1.0, %v4428_v24 }
 0x737   :  { %v4430_v60 = vpop.eup %4429 }
 0x738   :  { %v4432_v34 = vpop.eup %4431  ;;  %v2457_v38 = vmul.f32 %v4430_v60, %v2455_v30  ;;  %4433 = vrcp.f32 %v2494_v46  ;;  %vm2462_vm12 = vweird.f32 %v4430_v60  ;;  %vm2500_vm5 = vweird.f32 %v2494_v46 }
 0x739   :  { %v2476_v3 = vmul.f32 %v4432_v34, %v2474_v52  ;;  %4435 = vtanh.f32 %v2450_v44  ;;  %vm2481_vm13 = vweird.f32 %v4432_v34  ;;  %vm2463_vm0 = vmor %vm2461_vm14, %vm2462_vm12  ;;  %v2506_v52 = vand.u32 2147483648, %v2494_v46 }
 0x73a   :  { %v2458_v35 = vsub.f32 1.0, %v2457_v38  ;;  %vm2482_vm2 = vmor %vm2480_vm15, %vm2481_vm13 }
 0x73b   :  { %v2477_v6 = vsub.f32 1.0, %v2476_v3  ;;  %v2507_v31 = vor.u32 1.1754944e-38, %v2506_v52 }
 0x73c   :  { %v2459_v32 = vmul.f32 %v4430_v60, %v2458_v35 }
 0x73d   :  { %v2478_v11 = vmul.f32 %v4432_v34, %v2477_v6 }
 0x73e   :  { %v4434_v13 = vpop.eup %4433  ;;  %v2460_v47 = vadd.f32 %v4430_v60, %v2459_v32 }
 0x73f   :  { %v2479_v24 = vadd.f32 %v4432_v34, %v2478_v11  ;;  %v2496_v15 = vmul.f32 %v4434_v13, %v2494_v46  ;;  %v4436_v44 = vpop.eup %4435  ;;  %vm2501_vm4 = vweird.f32 %v4434_v13 }
 0x740   :  { %v2464_v38 = vsel %vm2463_vm0, %v4430_v60, %v2460_v47  ;;  %v2504_v60 = vand.u32 2147483647, %v2494_v46  ;;  %vm2502_vm6 = vmor %vm2500_vm5, %vm2501_vm4 }
 0x741   :  { %v2469_v3 = vsel %vm2466_vm1, %v2468_v17, %v2464_v38  ;;  %v2483_v35 = vsel %vm2482_vm2, %v4432_v34, %v2479_v24  ;;  %v2497_v9 = vsub.f32 1.0, %v2496_v15  ;;  %v2142_v17 = vadd.f32 %v5531_v7, %v5598_v12 }
 0x742   :  { %v2488_v6 = vsel %vm2485_vm3, %v2487_v19, %v2483_v35  ;;  %v2511_v8 = vmul.f32 %v4436_v44, %v2469_v3  ;;  %vm2505_vm7 = vcmp.eq.f32.partialorder %v2504_v60, 8.507059e+37 }
 0x743   :  { %v2510_v61 = vmul.f32 0.0, %v2488_v6  ;;  %v2498_v28 = vmul.f32 %v4434_v13, %v2497_v9 }
 0x745   :  { %v5605_v32 = vadd.f32 %v2511_v8, %v2510_v61  ;;  %v2499_v30 = vadd.f32 %v4434_v13, %v2498_v28  ;;  %v2043_v61 = vadd.f32 %v5525_v49, %v5592_v27  ;;  %v2076_v8 = vadd.f32 %v5527_v14, %v5594_v0 }
 0x747   :  { %4437 = vtanh.f32 %v5605_v32  ;;  %v2503_v41 = vsel %vm2502_vm6, %v4434_v13, %v2499_v30 }
 0x748   :  { %v2508_v63 = vsel %vm2505_vm7, %v2507_v31, %v2503_v41  ;;  %v6028_v31 = vld [vmem:[#allocation38_spill] sm:$0xff] }
 0x74d   :  { %v4438_v34 = vpop.eup %4437 }
 0x74e   :  { %v2514_v11 = vmul.f32 %v4438_v34, %v2508_v63  ;;  %v6029_v34 = vld [vmem:[#allocation9_spill] sm:$0xff] }
 0x74f   :  { %v2109_v7 = vadd.f32 %v6029_v34, %v6028_v31 }
 0x750   :  { %v2515_v19 = vpack.c.bf16 %v2514_v11, %v2514_v11 }
 0x752   :  { %2516 = vst [vmem:[%s5924_s4] sm:$0xf] %v2515_v19  ;;  %2529 = vmatmul.bf16.vlgmr.msra.gmra.mxu0 %v2515_v19  ;;  %2542 = vmatmul.bf16.vlgmr.msra.gmra.mxu1 %v2515_v19 }
 0x753   :  { %2555 = vmatmul.bf16.vlgmr.msra.gmra.mxu2 %v2515_v19  ;;  %2568 = vmatmul.bf16.vlgmr.msra.gmra.mxu3 %v2515_v19 }
 0x754   :  { %2771 = vmatpush.bf16.msra.mxu0 %v5279_v10  ;;  %2784 = vmatpush.bf16.msra.mxu1 %v5281_v22 }
 0x755   :  { %2797 = vmatpush.bf16.msra.mxu2 %v5303_v20  ;;  %2810 = vmatpush.bf16.msra.mxu3 %v5283_v25 }
 0x758   :  { %2772 = vmatpush.bf16.msra.mxu0 %v5294_v56  ;;  %2785 = vmatpush.bf16.msra.mxu1 %v5296_v58 }
 0x759   :  { %2798 = vmatpush.bf16.msra.mxu2 %v5321_v33  ;;  %2811 = vmatpush.bf16.msra.mxu3 %v5309_v40 }
 0x75c   :  { %2773 = vmatpush.bf16.msra.mxu0 %v5311_v55  ;;  %2786 = vmatpush.bf16.msra.mxu1 %v5315_v16 }
 0x75d   :  { %2799 = vmatpush.bf16.msra.mxu2 %v5342_v37  ;;  %2812 = vmatpush.bf16.msra.mxu3 %v5326_v36 }
 0x760   :  { %2774 = vmatpush.bf16.msra.mxu0 %v5338_v57  ;;  %2787 = vmatpush.bf16.msra.mxu1 %v5340_v29 }
 0x761   :  { %2800 = vmatpush.bf16.msra.mxu2 %v5370_v42  ;;  %2813 = vmatpush.bf16.msra.mxu3 %v5360_v21 }
 0x764   :  { %2775 = vmatpush.bf16.msra.mxu0 %v5362_v23  ;;  %2788 = vmatpush.bf16.msra.mxu1 %v5368_v45 }
 0x765   :  { %2801 = vmatpush.bf16.msra.mxu2 %v5403_v5  ;;  %2814 = vmatpush.bf16.msra.mxu3 %v5386_v39 }
 0x768   :  { %2776 = vmatpush.bf16.msra.mxu0 %v5392_v50  ;;  %2789 = vmatpush.bf16.msra.mxu1 %v5394_v18 }
 0x769   :  { %2802 = vmatpush.bf16.msra.mxu2 %v5419_v4  ;;  %2815 = vmatpush.bf16.msra.mxu3 %v5410_v53 }
 0x76c   :  { %2777 = vmatpush.bf16.msra.mxu0 %v5413_v59  ;;  %2790 = vmatpush.bf16.msra.mxu1 %v5417_v48 }
 0x76d   :  { %2803 = vmatpush.bf16.msra.mxu2 %v5436_v43  ;;  %2816 = vmatpush.bf16.msra.mxu3 %v5425_v62 }
 0x770   :  { %2778 = vmatpush.bf16.msra.mxu0 %v5430_v54  ;;  %2791 = vmatpush.bf16.msra.mxu1 %v5434_v26 }
 0x771   :  { %2804 = vmatpush.bf16.msra.mxu2 %v5445_v51  ;;  %2817 = vmatpush.bf16.msra.mxu3 %v5440_v2 }
 0x7cf   :  { %v2530_v9 = vpop.f32.mrf.mxu0  ;;  %v2543_v13 = vpop.f32.mrf.mxu1 }
 0x7d0   :  { %v2573_v28 = vadd.f32 %v2530_v9, %v2043_v61  ;;  %v2574_v46 = vadd.f32 %v2543_v13, %v2076_v8 }
 0x7d2   :  { %v4106_v1 = vmul.f32 -1.442695, %v2573_v28  ;;  %v4107_v47 = vmul.f32 -1.442695, %v2574_v46 }
 0x7d4   :  { %4439 = vpow2.f32 %v4106_v1 }
 0x7d5   :  { %4441 = vpow2.f32 %v4107_v47 }
 0x7d6   :  { %v2556_v24 = vpop.f32.mrf.mxu2  ;;  %v2569_v15 = vpop.f32.mrf.mxu3 }
 0x7d7   :  { %v2576_v38 = vadd.f32 %v2569_v15, %v2142_v17  ;;  %v2532_v44 = vpop.f32.mrf.mxu0  ;;  %v2545_v3 = vpop.f32.mrf.mxu1  ;;  %v2575_v19 = vadd.f32 %v2556_v24, %v2109_v7 }
 0x7d9   :  { %v4108_v49 = vmul.f32 -1.442695, %v2576_v38 }
 0x7da   :  { %v4440_v35 = vpop.eup %4439 }
 0x7db   :  { %v4442_v6 = vpop.eup %4441  ;;  %v2580_v14 = vadd.f32 1.0, %v4440_v35  ;;  %4443 = vpow2.f32 %v4108_v49 }
 0x7dc   :  { %v2599_v30 = vadd.f32 1.0, %v4442_v6 }
 0x7dd   :  { %4445 = vrcp.f32 %v2580_v14  ;;  %v2592_v46 = vand.u32 2147483648, %v2580_v14  ;;  %v2590_v17 = vand.u32 2147483647, %v2580_v14  ;;  %vm2586_vm10 = vweird.f32 %v2580_v14 }
 0x7de   :  { %4447 = vrcp.f32 %v2599_v30  ;;  %v2558_v52 = vpop.f32.mrf.mxu2  ;;  %v2571_v60 = vpop.f32.mrf.mxu3  ;;  %v2611_v1 = vand.u32 2147483648, %v2599_v30  ;;  %v2609_v38 = vand.u32 2147483647, %v2599_v30  ;;  %vm2605_vm11 = vweird.f32 %v2599_v30 }
 0x7df   :  { %v2593_v24 = vor.u32 1.1754944e-38, %v2592_v46  ;;  %vm2591_vm14 = vcmp.eq.f32.partialorder %v2590_v17, 8.507059e+37 }
 0x7e0   :  { %v2612_v6 = vor.u32 1.1754944e-38, %v2611_v1  ;;  %vm2610_vm15 = vcmp.eq.f32.partialorder %v2609_v38, 8.507059e+37  ;;  %v6031_v38 = vld [vmem:[#allocation11_spill] sm:$0xff] }
 0x7e1   :  { %v4444_v41 = vpop.eup %4443 }
 0x7e2   :  { %v2619_v63 = vadd.f32 1.0, %v4444_v41 }
 0x7e3   :  { %v4446_v11 = vpop.eup %4445 }
 0x7e4   :  { %v4448_v61 = vpop.eup %4447  ;;  %v2582_v8 = vmul.f32 %v4446_v11, %v2580_v14  ;;  %4449 = vrcp.f32 %v2619_v63  ;;  %vm2587_vm8 = vweird.f32 %v4446_v11  ;;  %vm2625_vm1 = vweird.f32 %v2619_v63 }
 0x7e5   :  { %v2601_v9 = vmul.f32 %v4448_v61, %v2599_v30  ;;  %4451 = vtanh.f32 %v2575_v19  ;;  %vm2606_vm9 = vweird.f32 %v4448_v61  ;;  %vm2588_vm12 = vmor %vm2586_vm10, %vm2587_vm8 }
 0x7e6   :  { %v2583_v13 = vsub.f32 1.0, %v2582_v8  ;;  %vm2607_vm13 = vmor %vm2605_vm11, %vm2606_vm9 }
 0x7e7   :  { %v2602_v28 = vsub.f32 1.0, %v2601_v9 }
 0x7e8   :  { %v2584_v47 = vmul.f32 %v4446_v11, %v2583_v13 }
 0x7e9   :  { %v2603_v15 = vmul.f32 %v4448_v61, %v2602_v28  ;;  %v2631_v28 = vand.u32 2147483648, %v2619_v63 }
 0x7ea   :  { %v4450_v44 = vpop.eup %4449  ;;  %v2585_v3 = vadd.f32 %v4446_v11, %v2584_v47 }
 0x7eb   :  { %v2604_v49 = vadd.f32 %v4448_v61, %v2603_v15  ;;  %v2621_v35 = vmul.f32 %v4450_v44, %v2619_v63  ;;  %v4452_v60 = vpop.eup %4451  ;;  %vm2626_vm0 = vweird.f32 %v4450_v44  ;;  %v2632_v1 = vor.u32 1.1754944e-38, %v2631_v28 }
 0x7ec   :  { %v2589_v52 = vsel %vm2588_vm12, %v4446_v11, %v2585_v3  ;;  %v2629_v11 = vand.u32 2147483647, %v2619_v63  ;;  %vm2627_vm2 = vmor %vm2625_vm1, %vm2626_vm0 }
 0x7ed   :  { %v2594_v41 = vsel %vm2591_vm14, %v2593_v24, %v2589_v52  ;;  %v2608_v34 = vsel %vm2607_vm13, %v4448_v61, %v2604_v49  ;;  %v2622_v7 = vsub.f32 1.0, %v2621_v35 }
 0x7ee   :  { %v2613_v19 = vsel %vm2610_vm15, %v2612_v6, %v2608_v34  ;;  %v2636_v8 = vmul.f32 %v4452_v60, %v2594_v41  ;;  %vm2630_vm3 = vcmp.eq.f32.partialorder %v2629_v11, 8.507059e+37  ;;  %v6032_v60 = vld [vmem:[#allocation12_spill] sm:$0xff] }
 0x7ef   :  { %v2635_v9 = vmul.f32 %v2613_v19, %v5605_v32  ;;  %v2623_v13 = vmul.f32 %v4450_v44, %v2622_v7  ;;  %v6030_v32 = vld [vmem:[#allocation10_spill] sm:$0xff]  ;;  %v2145_v41 = vadd.f32 %v6032_v60, %v5598_v12 }
 0x7f0   :  { %v2046_v63 = vadd.f32 %v6030_v32, %v5592_v27 }
 0x7f1   :  { %v5652_v14 = vadd.f32 %v2636_v8, %v2635_v9  ;;  %v2624_v30 = vadd.f32 %v4450_v44, %v2623_v13 }
 0x7f3   :  { %4453 = vtanh.f32 %v5652_v14  ;;  %v2628_v46 = vsel %vm2627_vm2, %v4450_v44, %v2624_v30  ;;  %v2079_v44 = vadd.f32 %v6031_v38, %v5594_v0 }
 0x7f4   :  { %v2633_v47 = vsel %vm2630_vm3, %v2632_v1, %v2628_v46 }
 0x7f9   :  { %v4454_v61 = vpop.eup %4453 }
 0x7fa   :  { %v2639_v17 = vmul.f32 %v4454_v61, %v2633_v47 }
 0x7fc   :  { %v2640_v15 = vpack.c.bf16 %v2639_v17, %v2639_v17  ;;  %v6033_v17 = vld [vmem:[#allocation14_spill] sm:$0xff] }
 0x7fe   :  { %4109 = vst [vmem:[%s5924_s4 + $0x4] sm:$0xf] %v2640_v15  ;;  %2654 = vmatmul.bf16.vlgmr.msrb.gmra.mxu0 %v2640_v15  ;;  %2667 = vmatmul.bf16.vlgmr.msrb.gmra.mxu1 %v2640_v15 }
 0x7ff   :  { %2680 = vmatmul.bf16.vlgmr.msrb.gmra.mxu2 %v2640_v15  ;;  %2693 = vmatmul.bf16.vlgmr.msrb.gmra.mxu3 %v2640_v15  ;;  %v2112_v15 = vadd.f32 %v6033_v17, %v6028_v31 }
 0x800   :  { %2896 = vmatpush.bf16.msrb.mxu0 %v5279_v10  ;;  %2909 = vmatpush.bf16.msrb.mxu1 %v5281_v22 }
 0x801   :  { %2922 = vmatpush.bf16.msrb.mxu2 %v5303_v20  ;;  %2935 = vmatpush.bf16.msrb.mxu3 %v5283_v25 }
 0x804   :  { %2897 = vmatpush.bf16.msrb.mxu0 %v5294_v56  ;;  %2910 = vmatpush.bf16.msrb.mxu1 %v5296_v58 }
 0x805   :  { %2923 = vmatpush.bf16.msrb.mxu2 %v5321_v33  ;;  %2936 = vmatpush.bf16.msrb.mxu3 %v5309_v40 }
 0x808   :  { %2898 = vmatpush.bf16.msrb.mxu0 %v5311_v55  ;;  %2911 = vmatpush.bf16.msrb.mxu1 %v5315_v16 }
 0x809   :  { %2924 = vmatpush.bf16.msrb.mxu2 %v5342_v37  ;;  %2937 = vmatpush.bf16.msrb.mxu3 %v5326_v36 }
 0x80c   :  { %2899 = vmatpush.bf16.msrb.mxu0 %v5338_v57  ;;  %2912 = vmatpush.bf16.msrb.mxu1 %v5340_v29 }
 0x80d   :  { %2925 = vmatpush.bf16.msrb.mxu2 %v5370_v42  ;;  %2938 = vmatpush.bf16.msrb.mxu3 %v5360_v21 }
 0x810   :  { %2900 = vmatpush.bf16.msrb.mxu0 %v5362_v23  ;;  %2913 = vmatpush.bf16.msrb.mxu1 %v5368_v45 }
 0x811   :  { %2926 = vmatpush.bf16.msrb.mxu2 %v5403_v5  ;;  %2939 = vmatpush.bf16.msrb.mxu3 %v5386_v39 }
 0x814   :  { %2901 = vmatpush.bf16.msrb.mxu0 %v5392_v50  ;;  %2914 = vmatpush.bf16.msrb.mxu1 %v5394_v18 }
 0x815   :  { %2927 = vmatpush.bf16.msrb.mxu2 %v5419_v4  ;;  %2940 = vmatpush.bf16.msrb.mxu3 %v5410_v53 }
 0x818   :  { %2902 = vmatpush.bf16.msrb.mxu0 %v5413_v59  ;;  %2915 = vmatpush.bf16.msrb.mxu1 %v5417_v48 }
 0x819   :  { %2928 = vmatpush.bf16.msrb.mxu2 %v5436_v43  ;;  %2941 = vmatpush.bf16.msrb.mxu3 %v5425_v62 }
 0x81c   :  { %2903 = vmatpush.bf16.msrb.mxu0 %v5430_v54  ;;  %2916 = vmatpush.bf16.msrb.mxu1 %v5434_v26 }
 0x81d   :  { %2929 = vmatpush.bf16.msrb.mxu2 %v5445_v51  ;;  %2942 = vmatpush.bf16.msrb.mxu3 %v5440_v2 }
 0x87b   :  { %v2655_v3 = vpop.f32.mrf.mxu0  ;;  %v2668_v24 = vpop.f32.mrf.mxu1 }
 0x87c   :  { %v2698_v49 = vadd.f32 %v2655_v3, %v2046_v63  ;;  %v2699_v35 = vadd.f32 %v2668_v24, %v2079_v44 }
 0x87e   :  { %v4110_v6 = vmul.f32 -1.442695, %v2698_v49  ;;  %v4111_v52 = vmul.f32 -1.442695, %v2699_v35 }
 0x880   :  { %4455 = vpow2.f32 %v4110_v6 }
 0x881   :  { %4457 = vpow2.f32 %v4111_v52 }
 0x882   :  { %v2681_v34 = vpop.f32.mrf.mxu2  ;;  %v2694_v7 = vpop.f32.mrf.mxu3 }
 0x883   :  { %v2701_v19 = vadd.f32 %v2694_v7, %v2145_v41  ;;  %v2657_v8 = vpop.f32.mrf.mxu0  ;;  %v2670_v9 = vpop.f32.mrf.mxu1  ;;  %v2700_v38 = vadd.f32 %v2681_v34, %v2112_v15 }
 0x885   :  { %v4112_v13 = vmul.f32 -1.442695, %v2701_v19 }
 0x886   :  { %v4456_v30 = vpop.eup %4455 }
 0x887   :  { %v4458_v28 = vpop.eup %4457  ;;  %v2705_v11 = vadd.f32 1.0, %v4456_v30  ;;  %4459 = vpow2.f32 %v4112_v13 }
 0x888   :  { %v2724_v46 = vadd.f32 1.0, %v4458_v28 }
 0x889   :  { %4461 = vrcp.f32 %v2705_v11  ;;  %v2717_v6 = vand.u32 2147483648, %v2705_v11  ;;  %v2715_v41 = vand.u32 2147483647, %v2705_v11  ;;  %vm2711_vm6 = vweird.f32 %v2705_v11 }
 0x88a   :  { %4463 = vrcp.f32 %v2724_v46  ;;  %v2683_v1 = vpop.f32.mrf.mxu2  ;;  %v2696_v61 = vpop.f32.mrf.mxu3  ;;  %v2736_v52 = vand.u32 2147483648, %v2724_v46  ;;  %v2734_v19 = vand.u32 2147483647, %v2724_v46  ;;  %vm2730_vm7 = vweird.f32 %v2724_v46 }
 0x88b   :  { %v2718_v34 = vor.u32 1.1754944e-38, %v2717_v6  ;;  %vm2716_vm10 = vcmp.eq.f32.partialorder %v2715_v41, 8.507059e+37 }
 0x88c   :  { %v2737_v28 = vor.u32 1.1754944e-38, %v2736_v52  ;;  %vm2735_vm11 = vcmp.eq.f32.partialorder %v2734_v19, 8.507059e+37  ;;  %v6035_v19 = vld [vmem:[#allocation15_spill] sm:$0xff] }
 0x88d   :  { %v4460_v47 = vpop.eup %4459 }
 0x88e   :  { %v2744_v32 = vadd.f32 1.0, %v4460_v47 }
 0x88f   :  { %v4462_v63 = vpop.eup %4461 }
 0x890   :  { %v4464_v44 = vpop.eup %4463  ;;  %v2707_v3 = vmul.f32 %v4462_v63, %v2705_v11  ;;  %4465 = vrcp.f32 %v2744_v32  ;;  %vm2712_vm4 = vweird.f32 %v4462_v63  ;;  %vm2750_vm13 = vweird.f32 %v2744_v32 }
 0x891   :  { %v2726_v24 = vmul.f32 %v4464_v44, %v2724_v46  ;;  %4467 = vtanh.f32 %v2700_v38  ;;  %vm2731_vm5 = vweird.f32 %v4464_v44  ;;  %vm2713_vm8 = vmor %vm2711_vm6, %vm2712_vm4 }
 0x892   :  { %v2708_v49 = vsub.f32 1.0, %v2707_v3  ;;  %vm2732_vm9 = vmor %vm2730_vm7, %vm2731_vm5 }
 0x893   :  { %v2727_v35 = vsub.f32 1.0, %v2726_v24 }
 0x894   :  { %v2709_v60 = vmul.f32 %v4462_v63, %v2708_v49 }
 0x895   :  { %v2728_v7 = vmul.f32 %v4464_v44, %v2727_v35  ;;  %v2756_v35 = vand.u32 2147483648, %v2744_v32 }
 0x896   :  { %v4466_v8 = vpop.eup %4465  ;;  %v2710_v9 = vadd.f32 %v4462_v63, %v2709_v60 }
 0x897   :  { %v2729_v13 = vadd.f32 %v4464_v44, %v2728_v7  ;;  %v2746_v30 = vmul.f32 %v4466_v8, %v2744_v32  ;;  %v4468_v61 = vpop.eup %4467  ;;  %vm2751_vm12 = vweird.f32 %v4466_v8  ;;  %v2757_v52 = vor.u32 1.1754944e-38, %v2756_v35 }
 0x898   :  { %v2714_v1 = vsel %vm2713_vm8, %v4462_v63, %v2710_v9  ;;  %v2754_v63 = vand.u32 2147483647, %v2744_v32  ;;  %vm2752_vm14 = vmor %vm2750_vm13, %vm2751_vm12 }
 0x899   :  { %v2719_v47 = vsel %vm2716_vm10, %v2718_v34, %v2714_v1  ;;  %v2733_v17 = vsel %vm2732_vm9, %v4464_v44, %v2729_v13  ;;  %v2747_v15 = vsub.f32 1.0, %v2746_v30 }
 0x89a   :  { %v2738_v38 = vsel %vm2735_vm11, %v2737_v28, %v2733_v17  ;;  %v2761_v3 = vmul.f32 %v4468_v61, %v2719_v47  ;;  %vm2755_vm15 = vcmp.eq.f32.partialorder %v2754_v63, 8.507059e+37  ;;  %v6036_v61 = vld [vmem:[#allocation16_spill] sm:$0xff] }
 0x89b   :  { %v2760_v24 = vmul.f32 %v2738_v38, %v5652_v14  ;;  %v2748_v49 = vmul.f32 %v4466_v8, %v2747_v15  ;;  %v6034_v14 = vld [vmem:[#allocation13_spill] sm:$0xff]  ;;  %v2147_v47 = vadd.f32 %v6036_v61, %v5598_v12 }
 0x89c   :  { %v2048_v32 = vadd.f32 %v6034_v14, %v5592_v27 }
 0x89d   :  { %v5699_v11 = vadd.f32 %v2761_v3, %v2760_v24  ;;  %v2749_v46 = vadd.f32 %v4466_v8, %v2748_v49 }
 0x89f   :  { %4469 = vtanh.f32 %v5699_v11  ;;  %v2753_v6 = vsel %vm2752_vm14, %v4466_v8, %v2749_v46  ;;  %v2081_v8 = vadd.f32 %v6035_v19, %v5594_v0 }
 0x8a0   :  { %v2758_v60 = vsel %vm2755_vm15, %v2757_v52, %v2753_v6 }
 0x8a5   :  { %v4470_v44 = vpop.eup %4469 }
 0x8a6   :  { %v2764_v41 = vmul.f32 %v4470_v44, %v2758_v60 }
 0x8a8   :  { %v2765_v7 = vpack.c.bf16 %v2764_v41, %v2764_v41  ;;  %v6037_v41 = vld [vmem:[#allocation17_spill] sm:$0xff] }
 0x8aa   :  { %4113 = vst [vmem:[%s5924_s4 + $0x8] sm:$0xf] %v2765_v7  ;;  %2779 = vmatmul.bf16.vlgmr.msra.gmra.mxu0 %v2765_v7  ;;  %2792 = vmatmul.bf16.vlgmr.msra.gmra.mxu1 %v2765_v7 }
 0x8ab   :  { %2805 = vmatmul.bf16.vlgmr.msra.gmra.mxu2 %v2765_v7  ;;  %2818 = vmatmul.bf16.vlgmr.msra.gmra.mxu3 %v2765_v7  ;;  %v2114_v7 = vadd.f32 %v6037_v41, %v6028_v31 }
 0x8ac   :  { %3021 = vmatpush.bf16.msra.mxu0 %v5279_v10  ;;  %3034 = vmatpush.bf16.msra.mxu1 %v5281_v22 }
 0x8ad   :  { %3047 = vmatpush.bf16.msra.mxu2 %v5303_v20  ;;  %3060 = vmatpush.bf16.msra.mxu3 %v5283_v25 }
 0x8b0   :  { %3022 = vmatpush.bf16.msra.mxu0 %v5294_v56  ;;  %3035 = vmatpush.bf16.msra.mxu1 %v5296_v58 }
 0x8b1   :  { %3048 = vmatpush.bf16.msra.mxu2 %v5321_v33  ;;  %3061 = vmatpush.bf16.msra.mxu3 %v5309_v40 }
 0x8b4   :  { %3023 = vmatpush.bf16.msra.mxu0 %v5311_v55  ;;  %3036 = vmatpush.bf16.msra.mxu1 %v5315_v16 }
 0x8b5   :  { %3049 = vmatpush.bf16.msra.mxu2 %v5342_v37  ;;  %3062 = vmatpush.bf16.msra.mxu3 %v5326_v36 }
 0x8b8   :  { %3024 = vmatpush.bf16.msra.mxu0 %v5338_v57  ;;  %3037 = vmatpush.bf16.msra.mxu1 %v5340_v29 }
 0x8b9   :  { %3050 = vmatpush.bf16.msra.mxu2 %v5370_v42  ;;  %3063 = vmatpush.bf16.msra.mxu3 %v5360_v21 }
 0x8bc   :  { %3025 = vmatpush.bf16.msra.mxu0 %v5362_v23  ;;  %3038 = vmatpush.bf16.msra.mxu1 %v5368_v45 }
 0x8bd   :  { %3051 = vmatpush.bf16.msra.mxu2 %v5403_v5  ;;  %3064 = vmatpush.bf16.msra.mxu3 %v5386_v39 }
 0x8c0   :  { %3026 = vmatpush.bf16.msra.mxu0 %v5392_v50  ;;  %3039 = vmatpush.bf16.msra.mxu1 %v5394_v18 }
 0x8c1   :  { %3052 = vmatpush.bf16.msra.mxu2 %v5419_v4  ;;  %3065 = vmatpush.bf16.msra.mxu3 %v5410_v53 }
 0x8c4   :  { %3027 = vmatpush.bf16.msra.mxu0 %v5413_v59  ;;  %3040 = vmatpush.bf16.msra.mxu1 %v5417_v48 }
 0x8c5   :  { %3053 = vmatpush.bf16.msra.mxu2 %v5436_v43  ;;  %3066 = vmatpush.bf16.msra.mxu3 %v5425_v62 }
 0x8c8   :  { %3028 = vmatpush.bf16.msra.mxu0 %v5430_v54  ;;  %3041 = vmatpush.bf16.msra.mxu1 %v5434_v26 }
 0x8c9   :  { %3054 = vmatpush.bf16.msra.mxu2 %v5445_v51  ;;  %3067 = vmatpush.bf16.msra.mxu3 %v5440_v2 }
 0x927   :  { %v2780_v9 = vpop.f32.mrf.mxu0  ;;  %v2793_v34 = vpop.f32.mrf.mxu1 }
 0x928   :  { %v2823_v13 = vadd.f32 %v2780_v9, %v2048_v32  ;;  %v2824_v30 = vadd.f32 %v2793_v34, %v2081_v8 }
 0x92a   :  { %v4114_v28 = vmul.f32 -1.442695, %v2823_v13  ;;  %v4115_v1 = vmul.f32 -1.442695, %v2824_v30 }
 0x92c   :  { %4471 = vpow2.f32 %v4114_v28 }
 0x92d   :  { %4473 = vpow2.f32 %v4115_v1 }
 0x92e   :  { %v2806_v17 = vpop.f32.mrf.mxu2  ;;  %v2819_v15 = vpop.f32.mrf.mxu3 }
 0x92f   :  { %v2826_v38 = vadd.f32 %v2819_v15, %v2147_v47  ;;  %v2782_v3 = vpop.f32.mrf.mxu0  ;;  %v2795_v24 = vpop.f32.mrf.mxu1  ;;  %v2825_v19 = vadd.f32 %v2806_v17, %v2114_v7 }
 0x931   :  { %v4116_v49 = vmul.f32 -1.442695, %v2826_v38 }
 0x932   :  { %v4472_v46 = vpop.eup %4471 }
 0x933   :  { %v4474_v35 = vpop.eup %4473  ;;  %v2830_v63 = vadd.f32 1.0, %v4472_v46  ;;  %4475 = vpow2.f32 %v4116_v49 }
 0x934   :  { %v2849_v6 = vadd.f32 1.0, %v4474_v35 }
 0x935   :  { %4477 = vrcp.f32 %v2830_v63  ;;  %v2842_v28 = vand.u32 2147483648, %v2830_v63  ;;  %v2840_v47 = vand.u32 2147483647, %v2830_v63  ;;  %vm2836_vm2 = vweird.f32 %v2830_v63 }
 0x936   :  { %4479 = vrcp.f32 %v2849_v6  ;;  %v2808_v52 = vpop.f32.mrf.mxu2  ;;  %v2821_v44 = vpop.f32.mrf.mxu3  ;;  %v2861_v1 = vand.u32 2147483648, %v2849_v6  ;;  %v2859_v38 = vand.u32 2147483647, %v2849_v6  ;;  %vm2855_vm3 = vweird.f32 %v2849_v6 }
 0x937   :  { %v2843_v17 = vor.u32 1.1754944e-38, %v2842_v28  ;;  %vm2841_vm6 = vcmp.eq.f32.partialorder %v2840_v47, 8.507059e+37 }
 0x938   :  { %v2862_v35 = vor.u32 1.1754944e-38, %v2861_v1  ;;  %vm2860_vm7 = vcmp.eq.f32.partialorder %v2859_v38, 8.507059e+37  ;;  %v6039_v38 = vld [vmem:[#allocation19_spill] sm:$0xff] }
 0x939   :  { %v4476_v60 = vpop.eup %4475 }
 0x93a   :  { %v2869_v14 = vadd.f32 1.0, %v4476_v60 }
 0x93b   :  { %v4478_v32 = vpop.eup %4477 }
 0x93c   :  { %v4480_v8 = vpop.eup %4479  ;;  %v2832_v9 = vmul.f32 %v4478_v32, %v2830_v63  ;;  %4481 = vrcp.f32 %v2869_v14  ;;  %vm2837_vm0 = vweird.f32 %v4478_v32  ;;  %vm2875_vm9 = vweird.f32 %v2869_v14 }
 0x93d   :  { %v2851_v34 = vmul.f32 %v4480_v8, %v2849_v6  ;;  %4483 = vtanh.f32 %v2825_v19  ;;  %vm2856_vm1 = vweird.f32 %v4480_v8  ;;  %vm2838_vm4 = vmor %vm2836_vm2, %vm2837_vm0 }
 0x93e   :  { %v2833_v13 = vsub.f32 1.0, %v2832_v9  ;;  %vm2857_vm5 = vmor %vm2855_vm3, %vm2856_vm1 }
 0x93f   :  { %v2852_v30 = vsub.f32 1.0, %v2851_v34 }
 0x940   :  { %v2834_v61 = vmul.f32 %v4478_v32, %v2833_v13 }
 0x941   :  { %v2853_v15 = vmul.f32 %v4480_v8, %v2852_v30  ;;  %v2881_v30 = vand.u32 2147483648, %v2869_v14 }
 0x942   :  { %v4482_v3 = vpop.eup %4481  ;;  %v2835_v24 = vadd.f32 %v4478_v32, %v2834_v61 }
 0x943   :  { %v2854_v49 = vadd.f32 %v4480_v8, %v2853_v15  ;;  %v2871_v46 = vmul.f32 %v4482_v3, %v2869_v14  ;;  %v4484_v44 = vpop.eup %4483  ;;  %vm2876_vm8 = vweird.f32 %v4482_v3  ;;  %v2882_v1 = vor.u32 1.1754944e-38, %v2881_v30 }
 0x944   :  { %v2839_v52 = vsel %vm2838_vm4, %v4478_v32, %v2835_v24  ;;  %v2879_v32 = vand.u32 2147483647, %v2869_v14  ;;  %vm2877_vm10 = vmor %vm2875_vm9, %vm2876_vm8 }
 0x945   :  { %v2844_v60 = vsel %vm2841_vm6, %v2843_v17, %v2839_v52  ;;  %v2858_v41 = vsel %vm2857_vm5, %v4480_v8, %v2854_v49  ;;  %v2872_v7 = vsub.f32 1.0, %v2871_v46 }
 0x946   :  { %v2863_v19 = vsel %vm2860_vm7, %v2862_v35, %v2858_v41  ;;  %v2886_v9 = vmul.f32 %v4484_v44, %v2844_v60  ;;  %vm2880_vm11 = vcmp.eq.f32.partialorder %v2879_v32, 8.507059e+37  ;;  %v6040_v44 = vld [vmem:[#allocation20_spill] sm:$0xff] }
 0x947   :  { %v2885_v34 = vmul.f32 %v2863_v19, %v5699_v11  ;;  %v2873_v13 = vmul.f32 %v4482_v3, %v2872_v7  ;;  %v6038_v11 = vld [vmem:[#allocation18_spill] sm:$0xff]  ;;  %v2150_v60 = vadd.f32 %v6040_v44, %v5598_v12 }
 0x948   :  { %v2051_v14 = vadd.f32 %v6038_v11, %v5592_v27 }
 0x949   :  { %v5746_v63 = vadd.f32 %v2886_v9, %v2885_v34  ;;  %v2874_v6 = vadd.f32 %v4482_v3, %v2873_v13 }
 0x94b   :  { %4485 = vtanh.f32 %v5746_v63  ;;  %v2878_v28 = vsel %vm2877_vm10, %v4482_v3, %v2874_v6  ;;  %v2084_v3 = vadd.f32 %v6039_v38, %v5594_v0 }
 0x94c   :  { %v2883_v61 = vsel %vm2880_vm11, %v2882_v1, %v2878_v28 }
 0x951   :  { %v4486_v8 = vpop.eup %4485 }
 0x952   :  { %v2889_v47 = vmul.f32 %v4486_v8, %v2883_v61 }
 0x954   :  { %v2890_v15 = vpack.c.bf16 %v2889_v47, %v2889_v47  ;;  %v6041_v47 = vld [vmem:[#allocation22_spill] sm:$0xff] }
 0x956   :  { %4117 = vst [vmem:[%s5924_s4 + $0xc] sm:$0xf] %v2890_v15  ;;  %2904 = vmatmul.bf16.vlgmr.msrb.gmra.mxu0 %v2890_v15  ;;  %2917 = vmatmul.bf16.vlgmr.msrb.gmra.mxu1 %v2890_v15 }
 0x957   :  { %2930 = vmatmul.bf16.vlgmr.msrb.gmra.mxu2 %v2890_v15  ;;  %2943 = vmatmul.bf16.vlgmr.msrb.gmra.mxu3 %v2890_v15  ;;  %v2117_v15 = vadd.f32 %v6041_v47, %v6028_v31 }
 0x958   :  { %3146 = vmatpush.bf16.msrb.mxu0 %v5279_v10  ;;  %3159 = vmatpush.bf16.msrb.mxu1 %v5281_v22 }
 0x959   :  { %3172 = vmatpush.bf16.msrb.mxu2 %v5303_v20  ;;  %3185 = vmatpush.bf16.msrb.mxu3 %v5283_v25 }
 0x95c   :  { %3147 = vmatpush.bf16.msrb.mxu0 %v5294_v56  ;;  %3160 = vmatpush.bf16.msrb.mxu1 %v5296_v58 }
 0x95d   :  { %3173 = vmatpush.bf16.msrb.mxu2 %v5321_v33  ;;  %3186 = vmatpush.bf16.msrb.mxu3 %v5309_v40 }
 0x960   :  { %3148 = vmatpush.bf16.msrb.mxu0 %v5311_v55  ;;  %3161 = vmatpush.bf16.msrb.mxu1 %v5315_v16 }
 0x961   :  { %3174 = vmatpush.bf16.msrb.mxu2 %v5342_v37  ;;  %3187 = vmatpush.bf16.msrb.mxu3 %v5326_v36 }
 0x964   :  { %3149 = vmatpush.bf16.msrb.mxu0 %v5338_v57  ;;  %3162 = vmatpush.bf16.msrb.mxu1 %v5340_v29 }
 0x965   :  { %3175 = vmatpush.bf16.msrb.mxu2 %v5370_v42  ;;  %3188 = vmatpush.bf16.msrb.mxu3 %v5360_v21 }
 0x968   :  { %3150 = vmatpush.bf16.msrb.mxu0 %v5362_v23  ;;  %3163 = vmatpush.bf16.msrb.mxu1 %v5368_v45 }
 0x969   :  { %3176 = vmatpush.bf16.msrb.mxu2 %v5403_v5  ;;  %3189 = vmatpush.bf16.msrb.mxu3 %v5386_v39 }
 0x96c   :  { %3151 = vmatpush.bf16.msrb.mxu0 %v5392_v50  ;;  %3164 = vmatpush.bf16.msrb.mxu1 %v5394_v18 }
 0x96d   :  { %3177 = vmatpush.bf16.msrb.mxu2 %v5419_v4  ;;  %3190 = vmatpush.bf16.msrb.mxu3 %v5410_v53 }
 0x970   :  { %3152 = vmatpush.bf16.msrb.mxu0 %v5413_v59  ;;  %3165 = vmatpush.bf16.msrb.mxu1 %v5417_v48 }
 0x971   :  { %3178 = vmatpush.bf16.msrb.mxu2 %v5436_v43  ;;  %3191 = vmatpush.bf16.msrb.mxu3 %v5425_v62 }
 0x974   :  { %3153 = vmatpush.bf16.msrb.mxu0 %v5430_v54  ;;  %3166 = vmatpush.bf16.msrb.mxu1 %v5434_v26 }
 0x975   :  { %3179 = vmatpush.bf16.msrb.mxu2 %v5445_v51  ;;  %3192 = vmatpush.bf16.msrb.mxu3 %v5440_v2 }
 0x9d3   :  { %v2905_v24 = vpop.f32.mrf.mxu0  ;;  %v2918_v17 = vpop.f32.mrf.mxu1 }
 0x9d4   :  { %v2948_v49 = vadd.f32 %v2905_v24, %v2051_v14  ;;  %v2949_v46 = vadd.f32 %v2918_v17, %v2084_v3 }
 0x9d6   :  { %v4118_v35 = vmul.f32 -1.442695, %v2948_v49  ;;  %v4119_v52 = vmul.f32 -1.442695, %v2949_v46 }
 0x9d8   :  { %4487 = vpow2.f32 %v4118_v35 }
 0x9d9   :  { %4489 = vpow2.f32 %v4119_v52 }
 0x9da   :  { %v2931_v41 = vpop.f32.mrf.mxu2  ;;  %v2944_v7 = vpop.f32.mrf.mxu3 }
 0x9db   :  { %v2951_v19 = vadd.f32 %v2944_v7, %v2150_v60  ;;  %v2907_v9 = vpop.f32.mrf.mxu0  ;;  %v2920_v34 = vpop.f32.mrf.mxu1  ;;  %v2950_v38 = vadd.f32 %v2931_v41, %v2117_v15 }
 0x9dd   :  { %v4120_v13 = vmul.f32 -1.442695, %v2951_v19 }
 0x9de   :  { %v4488_v6 = vpop.eup %4487 }
 0x9df   :  { %v4490_v30 = vpop.eup %4489  ;;  %v2955_v32 = vadd.f32 1.0, %v4488_v6  ;;  %4491 = vpow2.f32 %v4120_v13 }
 0x9e0   :  { %v2974_v28 = vadd.f32 1.0, %v4490_v30 }
 0x9e1   :  { %4493 = vrcp.f32 %v2955_v32  ;;  %v2967_v35 = vand.u32 2147483648, %v2955_v32  ;;  %v2965_v60 = vand.u32 2147483647, %v2955_v32  ;;  %vm2961_vm14 = vweird.f32 %v2955_v32 }
 0x9e2   :  { %4495 = vrcp.f32 %v2974_v28  ;;  %v2933_v1 = vpop.f32.mrf.mxu2  ;;  %v2946_v8 = vpop.f32.mrf.mxu3  ;;  %v2986_v52 = vand.u32 2147483648, %v2974_v28  ;;  %v2984_v19 = vand.u32 2147483647, %v2974_v28  ;;  %vm2980_vm15 = vweird.f32 %v2974_v28 }
 0x9e3   :  { %v2968_v41 = vor.u32 1.1754944e-38, %v2967_v35  ;;  %vm2966_vm2 = vcmp.eq.f32.partialorder %v2965_v60, 8.507059e+37 }
 0x9e4   :  { %v2987_v30 = vor.u32 1.1754944e-38, %v2986_v52  ;;  %vm2985_vm3 = vcmp.eq.f32.partialorder %v2984_v19, 8.507059e+37  ;;  %v6043_v19 = vld [vmem:[#allocation23_spill] sm:$0xff] }
 0x9e5   :  { %v4492_v61 = vpop.eup %4491 }
 0x9e6   :  { %v2994_v11 = vadd.f32 1.0, %v4492_v61 }
 0x9e7   :  { %v4494_v14 = vpop.eup %4493 }
 0x9e8   :  { %v4496_v3 = vpop.eup %4495  ;;  %v2957_v24 = vmul.f32 %v4494_v14, %v2955_v32  ;;  %4497 = vrcp.f32 %v2994_v11  ;;  %vm2962_vm12 = vweird.f32 %v4494_v14  ;;  %vm3000_vm5 = vweird.f32 %v2994_v11 }
 0x9e9   :  { %v2976_v17 = vmul.f32 %v4496_v3, %v2974_v28  ;;  %4499 = vtanh.f32 %v2950_v38  ;;  %vm2981_vm13 = vweird.f32 %v4496_v3  ;;  %vm2963_vm0 = vmor %vm2961_vm14, %vm2962_vm12 }
 0x9ea   :  { %v2958_v49 = vsub.f32 1.0, %v2957_v24  ;;  %vm2982_vm1 = vmor %vm2980_vm15, %vm2981_vm13 }
 0x9eb   :  { %v2977_v46 = vsub.f32 1.0, %v2976_v17 }
 0x9ec   :  { %v2959_v44 = vmul.f32 %v4494_v14, %v2958_v49 }
 0x9ed   :  { %v2978_v7 = vmul.f32 %v4496_v3, %v2977_v46  ;;  %v3006_v46 = vand.u32 2147483648, %v2994_v11 }
 0x9ee   :  { %v4498_v9 = vpop.eup %4497  ;;  %v2960_v34 = vadd.f32 %v4494_v14, %v2959_v44 }
 0x9ef   :  { %v2979_v13 = vadd.f32 %v4496_v3, %v2978_v7  ;;  %v2996_v6 = vmul.f32 %v4498_v9, %v2994_v11  ;;  %v4500_v8 = vpop.eup %4499  ;;  %vm3001_vm4 = vweird.f32 %v4498_v9  ;;  %v3007_v52 = vor.u32 1.1754944e-38, %v3006_v46 }
 0x9f0   :  { %v2964_v1 = vsel %vm2963_vm0, %v4494_v14, %v2960_v34  ;;  %v3004_v14 = vand.u32 2147483647, %v2994_v11  ;;  %vm3002_vm6 = vmor %vm3000_vm5, %vm3001_vm4 }
 0x9f1   :  { %v2969_v61 = vsel %vm2966_vm2, %v2968_v41, %v2964_v1  ;;  %v2983_v47 = vsel %vm2982_vm1, %v4496_v3, %v2979_v13  ;;  %v2997_v15 = vsub.f32 1.0, %v2996_v6 }
 0x9f2   :  { %v2988_v38 = vsel %vm2985_vm3, %v2987_v30, %v2983_v47  ;;  %v3011_v24 = vmul.f32 %v4500_v8, %v2969_v61  ;;  %vm3005_vm7 = vcmp.eq.f32.partialorder %v3004_v14, 8.507059e+37  ;;  %v6044_v8 = vld [vmem:[#allocation24_spill] sm:$0xff] }
 0x9f3   :  { %v3010_v17 = vmul.f32 %v2988_v38, %v5746_v63  ;;  %v2998_v49 = vmul.f32 %v4498_v9, %v2997_v15  ;;  %v6042_v63 = vld [vmem:[#allocation21_spill] sm:$0xff]  ;;  %v2152_v61 = vadd.f32 %v6044_v8, %v5598_v12 }
 0x9f4   :  { %v2053_v11 = vadd.f32 %v6042_v63, %v5592_v27 }
 0x9f5   :  { %v5793_v32 = vadd.f32 %v3011_v24, %v3010_v17  ;;  %v2999_v28 = vadd.f32 %v4498_v9, %v2998_v49 }
 0x9f7   :  { %4501 = vtanh.f32 %v5793_v32  ;;  %v3003_v35 = vsel %vm3002_vm6, %v4498_v9, %v2999_v28  ;;  %v2086_v9 = vadd.f32 %v6043_v19, %v5594_v0 }
 0x9f8   :  { %v3008_v44 = vsel %vm3005_vm7, %v3007_v52, %v3003_v35 }
 0x9fd   :  { %v4502_v3 = vpop.eup %4501 }
 0x9fe   :  { %v3014_v60 = vmul.f32 %v4502_v3, %v3008_v44 }
 0xa00   :  { %v3015_v7 = vpack.c.bf16 %v3014_v60, %v3014_v60  ;;  %v6045_v60 = vld [vmem:[#allocation25_spill] sm:$0xff] }
 0xa02   :  { %4121 = vst [vmem:[%s5924_s4 + $0x10] sm:$0xf] %v3015_v7  ;;  %3029 = vmatmul.bf16.vlgmr.msra.gmra.mxu0 %v3015_v7  ;;  %3042 = vmatmul.bf16.vlgmr.msra.gmra.mxu1 %v3015_v7 }
 0xa03   :  { %3055 = vmatmul.bf16.vlgmr.msra.gmra.mxu2 %v3015_v7  ;;  %3068 = vmatmul.bf16.vlgmr.msra.gmra.mxu3 %v3015_v7  ;;  %v2119_v7 = vadd.f32 %v6045_v60, %v6028_v31 }
 0xa04   :  { %3271 = vmatpush.bf16.msra.mxu0 %v5279_v10  ;;  %3284 = vmatpush.bf16.msra.mxu1 %v5281_v22 }
 0xa05   :  { %3297 = vmatpush.bf16.msra.mxu2 %v5303_v20  ;;  %3310 = vmatpush.bf16.msra.mxu3 %v5283_v25 }
 0xa08   :  { %3272 = vmatpush.bf16.msra.mxu0 %v5294_v56  ;;  %3285 = vmatpush.bf16.msra.mxu1 %v5296_v58 }
 0xa09   :  { %3298 = vmatpush.bf16.msra.mxu2 %v5321_v33  ;;  %3311 = vmatpush.bf16.msra.mxu3 %v5309_v40 }
 0xa0c   :  { %3273 = vmatpush.bf16.msra.mxu0 %v5311_v55  ;;  %3286 = vmatpush.bf16.msra.mxu1 %v5315_v16 }
 0xa0d   :  { %3299 = vmatpush.bf16.msra.mxu2 %v5342_v37  ;;  %3312 = vmatpush.bf16.msra.mxu3 %v5326_v36 }
 0xa10   :  { %3274 = vmatpush.bf16.msra.mxu0 %v5338_v57  ;;  %3287 = vmatpush.bf16.msra.mxu1 %v5340_v29 }
 0xa11   :  { %3300 = vmatpush.bf16.msra.mxu2 %v5370_v42  ;;  %3313 = vmatpush.bf16.msra.mxu3 %v5360_v21 }
 0xa14   :  { %3275 = vmatpush.bf16.msra.mxu0 %v5362_v23  ;;  %3288 = vmatpush.bf16.msra.mxu1 %v5368_v45 }
 0xa15   :  { %3301 = vmatpush.bf16.msra.mxu2 %v5403_v5  ;;  %3314 = vmatpush.bf16.msra.mxu3 %v5386_v39 }
 0xa18   :  { %3276 = vmatpush.bf16.msra.mxu0 %v5392_v50  ;;  %3289 = vmatpush.bf16.msra.mxu1 %v5394_v18 }
 0xa19   :  { %3302 = vmatpush.bf16.msra.mxu2 %v5419_v4  ;;  %3315 = vmatpush.bf16.msra.mxu3 %v5410_v53 }
 0xa1c   :  { %3277 = vmatpush.bf16.msra.mxu0 %v5413_v59  ;;  %3290 = vmatpush.bf16.msra.mxu1 %v5417_v48 }
 0xa1d   :  { %3303 = vmatpush.bf16.msra.mxu2 %v5436_v43  ;;  %3316 = vmatpush.bf16.msra.mxu3 %v5425_v62 }
 0xa20   :  { %3278 = vmatpush.bf16.msra.mxu0 %v5430_v54  ;;  %3291 = vmatpush.bf16.msra.mxu1 %v5434_v26 }
 0xa21   :  { %3304 = vmatpush.bf16.msra.mxu2 %v5445_v51  ;;  %3317 = vmatpush.bf16.msra.mxu3 %v5440_v2 }
 0xa7f   :  { %v3030_v34 = vpop.f32.mrf.mxu0  ;;  %v3043_v41 = vpop.f32.mrf.mxu1 }
 0xa80   :  { %v3073_v13 = vadd.f32 %v3030_v34, %v2053_v11  ;;  %v3074_v6 = vadd.f32 %v3043_v41, %v2086_v9 }
 0xa82   :  { %v4122_v30 = vmul.f32 -1.442695, %v3073_v13  ;;  %v4123_v1 = vmul.f32 -1.442695, %v3074_v6 }
 0xa84   :  { %4503 = vpow2.f32 %v4122_v30 }
 0xa85   :  { %4505 = vpow2.f32 %v4123_v1 }
 0xa86   :  { %v3056_v47 = vpop.f32.mrf.mxu2  ;;  %v3069_v15 = vpop.f32.mrf.mxu3 }
 0xa87   :  { %v3076_v38 = vadd.f32 %v3069_v15, %v2152_v61  ;;  %v3032_v24 = vpop.f32.mrf.mxu0  ;;  %v3045_v17 = vpop.f32.mrf.mxu1  ;;  %v3075_v19 = vadd.f32 %v3056_v47, %v2119_v7 }
 0xa89   :  { %v4124_v49 = vmul.f32 -1.442695, %v3076_v38 }
 0xa8a   :  { %v4504_v28 = vpop.eup %4503 }
 0xa8b   :  { %v4506_v46 = vpop.eup %4505  ;;  %v3080_v14 = vadd.f32 1.0, %v4504_v28  ;;  %4507 = vpow2.f32 %v4124_v49 }
 0xa8c   :  { %v3099_v35 = vadd.f32 1.0, %v4506_v46 }
 0xa8d   :  { %4509 = vrcp.f32 %v3080_v14  ;;  %v3092_v30 = vand.u32 2147483648, %v3080_v14  ;;  %v3090_v61 = vand.u32 2147483647, %v3080_v14  ;;  %vm3086_vm10 = vweird.f32 %v3080_v14 }
 0xa8e   :  { %4511 = vrcp.f32 %v3099_v35  ;;  %v3058_v52 = vpop.f32.mrf.mxu2  ;;  %v3071_v3 = vpop.f32.mrf.mxu3  ;;  %v3111_v1 = vand.u32 2147483648, %v3099_v35  ;;  %v3109_v38 = vand.u32 2147483647, %v3099_v35  ;;  %vm3105_vm11 = vweird.f32 %v3099_v35 }
 0xa8f   :  { %v3093_v47 = vor.u32 1.1754944e-38, %v3092_v30  ;;  %vm3091_vm14 = vcmp.eq.f32.partialorder %v3090_v61, 8.507059e+37 }
 0xa90   :  { %v3112_v46 = vor.u32 1.1754944e-38, %v3111_v1  ;;  %vm3110_vm15 = vcmp.eq.f32.partialorder %v3109_v38, 8.507059e+37 }
 0xa91   :  { %v4508_v44 = vpop.eup %4507 }
 0xa92   :  { %v3119_v63 = vadd.f32 1.0, %v4508_v44 }
 0xa93   :  { %v4510_v11 = vpop.eup %4509 }
 0xa94   :  { %v4512_v9 = vpop.eup %4511  ;;  %v3082_v34 = vmul.f32 %v4510_v11, %v3080_v14  ;;  %4513 = vrcp.f32 %v3119_v63  ;;  %vm3087_vm8 = vweird.f32 %v4510_v11  ;;  %vm3125_vm1 = vweird.f32 %v3119_v63 }
 0xa95   :  { %v3101_v41 = vmul.f32 %v4512_v9, %v3099_v35  ;;  %4515 = vtanh.f32 %v3075_v19  ;;  %vm3106_vm9 = vweird.f32 %v4512_v9  ;;  %vm3088_vm12 = vmor %vm3086_vm10, %vm3087_vm8 }
 0xa96   :  { %v3083_v13 = vsub.f32 1.0, %v3082_v34  ;;  %vm3107_vm13 = vmor %vm3105_vm11, %vm3106_vm9 }
 0xa97   :  { %v3102_v6 = vsub.f32 1.0, %v3101_v41 }
 0xa98   :  { %v3084_v8 = vmul.f32 %v4510_v11, %v3083_v13 }
 0xa99   :  { %v3103_v15 = vmul.f32 %v4512_v9, %v3102_v6  ;;  %v3131_v6 = vand.u32 2147483648, %v3119_v63 }
 0xa9a   :  { %v4514_v24 = vpop.eup %4513  ;;  %v3085_v17 = vadd.f32 %v4510_v11, %v3084_v8 }
 0xa9b   :  { %v3104_v49 = vadd.f32 %v4512_v9, %v3103_v15  ;;  %v3121_v28 = vmul.f32 %v4514_v24, %v3119_v63  ;;  %v4516_v3 = vpop.eup %4515  ;;  %vm3126_vm0 = vweird.f32 %v4514_v24  ;;  %v3132_v1 = vor.u32 1.1754944e-38, %v3131_v6 }
 0xa9c   :  { %v3089_v52 = vsel %vm3088_vm12, %v4510_v11, %v3085_v17  ;;  %v3129_v11 = vand.u32 2147483647, %v3119_v63  ;;  %vm3127_vm2 = vmor %vm3125_vm1, %vm3126_vm0 }
 0xa9d   :  { %v3094_v44 = vsel %vm3091_vm14, %v3093_v47, %v3089_v52  ;;  %v3108_v60 = vsel %vm3107_vm13, %v4512_v9, %v3104_v49  ;;  %v3122_v7 = vsub.f32 1.0, %v3121_v28 }
 0xa9e   :  { %v3113_v19 = vsel %vm3110_vm15, %v3112_v46, %v3108_v60  ;;  %v3136_v34 = vmul.f32 %v4516_v3, %v3094_v44  ;;  %vm3130_vm3 = vcmp.eq.f32.partialorder %v3129_v11, 8.507059e+37 }
 0xa9f   :  { %v3135_v41 = vmul.f32 %v3113_v19, %v5793_v32  ;;  %v3123_v13 = vmul.f32 %v4514_v24, %v3122_v7 }
 0xaa1   :  { %v5840_v14 = vadd.f32 %v3136_v34, %v3135_v41  ;;  %v3124_v35 = vadd.f32 %v4514_v24, %v3123_v13 }
 0xaa3   :  { %4517 = vtanh.f32 %v5840_v14  ;;  %v3128_v30 = vsel %vm3127_vm2, %v4514_v24, %v3124_v35 }
 0xaa4   :  { %v3133_v8 = vsel %vm3130_vm3, %v3132_v1, %v3128_v30 }
 0xaa9   :  { %v4518_v9 = vpop.eup %4517 }
 0xaaa   :  { %v3139_v61 = vmul.f32 %v4518_v9, %v3133_v8 }
 0xaac   :  { %v3140_v15 = vpack.c.bf16 %v3139_v61, %v3139_v61 }
 0xaae   :  { %4125 = vst [vmem:[%s5924_s4 + $0x14] sm:$0xf] %v3140_v15  ;;  %3154 = vmatmul.bf16.vlgmr.msrb.gmra.mxu0 %v3140_v15  ;;  %3167 = vmatmul.bf16.vlgmr.msrb.gmra.mxu1 %v3140_v15 }
 0xaaf   :  { %3180 = vmatmul.bf16.vlgmr.msrb.gmra.mxu2 %v3140_v15  ;;  %3193 = vmatmul.bf16.vlgmr.msrb.gmra.mxu3 %v3140_v15 }
 0xab0   :  { %3396 = vmatpush.bf16.msrb.mxu0 %v5279_v10  ;;  %3409 = vmatpush.bf16.msrb.mxu1 %v5281_v22  ;;  %v6046_v10 = vld [vmem:[#allocation26_spill] sm:$0xff] }
 0xab1   :  { %3422 = vmatpush.bf16.msrb.mxu2 %v5303_v20  ;;  %3435 = vmatpush.bf16.msrb.mxu3 %v5283_v25  ;;  %v2056_v22 = vadd.f32 %v6046_v10, %v5592_v27  ;;  %v6047_v25 = vld [vmem:[#allocation27_spill] sm:$0xff] }
 0xab4   :  { %3397 = vmatpush.bf16.msrb.mxu0 %v5294_v56  ;;  %3410 = vmatpush.bf16.msrb.mxu1 %v5296_v58  ;;  %v2089_v56 = vadd.f32 %v6047_v25, %v5594_v0 }
 0xab5   :  { %3423 = vmatpush.bf16.msrb.mxu2 %v5321_v33  ;;  %3436 = vmatpush.bf16.msrb.mxu3 %v5309_v40 }
 0xab8   :  { %3398 = vmatpush.bf16.msrb.mxu0 %v5311_v55  ;;  %3411 = vmatpush.bf16.msrb.mxu1 %v5315_v16 }
 0xab9   :  { %3424 = vmatpush.bf16.msrb.mxu2 %v5342_v37  ;;  %3437 = vmatpush.bf16.msrb.mxu3 %v5326_v36  ;;  %v6048_v36 = vld [vmem:[#allocation28_spill] sm:$0xff] }
 0xabc   :  { %3399 = vmatpush.bf16.msrb.mxu0 %v5338_v57  ;;  %3412 = vmatpush.bf16.msrb.mxu1 %v5340_v29  ;;  %v2155_v57 = vadd.f32 %v6048_v36, %v5598_v12 }
 0xabd   :  { %3425 = vmatpush.bf16.msrb.mxu2 %v5370_v42  ;;  %3438 = vmatpush.bf16.msrb.mxu3 %v5360_v21 }
 0xac0   :  { %3400 = vmatpush.bf16.msrb.mxu0 %v5362_v23  ;;  %3413 = vmatpush.bf16.msrb.mxu1 %v5368_v45 }
 0xac1   :  { %3426 = vmatpush.bf16.msrb.mxu2 %v5403_v5  ;;  %3439 = vmatpush.bf16.msrb.mxu3 %v5386_v39 }
 0xac4   :  { %3401 = vmatpush.bf16.msrb.mxu0 %v5392_v50  ;;  %3414 = vmatpush.bf16.msrb.mxu1 %v5394_v18 }
 0xac5   :  { %3427 = vmatpush.bf16.msrb.mxu2 %v5419_v4  ;;  %3440 = vmatpush.bf16.msrb.mxu3 %v5410_v53  ;;  %v6049_v4 = vld [vmem:[#allocation30_spill] sm:$0xff] }
 0xac8   :  { %3402 = vmatpush.bf16.msrb.mxu0 %v5413_v59  ;;  %3415 = vmatpush.bf16.msrb.mxu1 %v5417_v48 }
 0xac9   :  { %3428 = vmatpush.bf16.msrb.mxu2 %v5436_v43  ;;  %3441 = vmatpush.bf16.msrb.mxu3 %v5425_v62  ;;  %v2122_v62 = vadd.f32 %v6049_v4, %v6028_v31 }
 0xacc   :  { %3403 = vmatpush.bf16.msrb.mxu0 %v5430_v54  ;;  %3416 = vmatpush.bf16.msrb.mxu1 %v5434_v26 }
 0xacd   :  { %3429 = vmatpush.bf16.msrb.mxu2 %v5445_v51  ;;  %3442 = vmatpush.bf16.msrb.mxu3 %v5440_v2 }
 0xb2b   :  { %v3155_v58 = vpop.f32.mrf.mxu0  ;;  %v3168_v20 = vpop.f32.mrf.mxu1 }
 0xb2c   :  { %v3198_v40 = vadd.f32 %v3155_v58, %v2056_v22  ;;  %v3199_v55 = vadd.f32 %v3168_v20, %v2089_v56 }
 0xb2e   :  { %v4126_v16 = vmul.f32 -1.442695, %v3198_v40  ;;  %v4127_v33 = vmul.f32 -1.442695, %v3199_v55 }
 0xb30   :  { %4519 = vpow2.f32 %v4126_v16  ;;  %v6051_v16 = vld [vmem:[#allocation31_spill] sm:$0xff] }
 0xb31   :  { %4521 = vpow2.f32 %v4127_v33  ;;  %v2091_v33 = vadd.f32 %v6051_v16, %v5594_v0 }
 0xb32   :  { %v3181_v29 = vpop.f32.mrf.mxu2  ;;  %v3194_v37 = vpop.f32.mrf.mxu3 }
 0xb33   :  { %v3201_v21 = vadd.f32 %v3194_v37, %v2155_v57  ;;  %v3157_v23 = vpop.f32.mrf.mxu0  ;;  %v3170_v45 = vpop.f32.mrf.mxu1  ;;  %v3200_v43 = vadd.f32 %v3181_v29, %v2122_v62 }
 0xb34   :  { %v6052_v45 = vld [vmem:[#allocation32_spill] sm:$0xff] }
 0xb35   :  { %v4128_v42 = vmul.f32 -1.442695, %v3201_v21 }
 0xb36   :  { %v4520_v39 = vpop.eup %4519 }
 0xb37   :  { %v4522_v50 = vpop.eup %4521  ;;  %v3205_v18 = vadd.f32 1.0, %v4520_v39  ;;  %4523 = vpow2.f32 %v4128_v42  ;;  %v2157_v42 = vadd.f32 %v6052_v45, %v5598_v12 }
 0xb38   :  { %v3224_v5 = vadd.f32 1.0, %v4522_v50 }
 0xb39   :  { %4525 = vrcp.f32 %v3205_v18  ;;  %v3217_v24 = vand.u32 2147483648, %v3205_v18  ;;  %v3215_v49 = vand.u32 2147483647, %v3205_v18  ;;  %vm3211_vm6 = vweird.f32 %v3205_v18 }
 0xb3a   :  { %4527 = vrcp.f32 %v3224_v5  ;;  %v3183_v53 = vpop.f32.mrf.mxu2  ;;  %v3196_v59 = vpop.f32.mrf.mxu3  ;;  %v3236_v17 = vand.u32 2147483648, %v3224_v5  ;;  %v3234_v46 = vand.u32 2147483647, %v3224_v5  ;;  %vm3230_vm7 = vweird.f32 %v3224_v5 }
 0xb3b   :  { %v3218_v44 = vor.u32 1.1754944e-38, %v3217_v24  ;;  %vm3216_vm10 = vcmp.eq.f32.partialorder %v3215_v49, 8.507059e+37 }
 0xb3c   :  { %v3237_v19 = vor.u32 1.1754944e-38, %v3236_v17  ;;  %vm3235_vm11 = vcmp.eq.f32.partialorder %v3234_v46, 8.507059e+37 }
 0xb3d   :  { %v4524_v48 = vpop.eup %4523 }
 0xb3e   :  { %v3244_v54 = vadd.f32 1.0, %v4524_v48 }
 0xb3f   :  { %v4526_v26 = vpop.eup %4525 }
 0xb40   :  { %v4528_v2 = vpop.eup %4527  ;;  %v3207_v51 = vmul.f32 %v4526_v26, %v3205_v18  ;;  %4529 = vrcp.f32 %v3244_v54  ;;  %vm3212_vm4 = vweird.f32 %v4526_v26  ;;  %v3256_v15 = vand.u32 2147483648, %v3244_v54 }
 0xb41   :  { %v3226_v32 = vmul.f32 %v4528_v2, %v3224_v5  ;;  %4531 = vtanh.f32 %v3200_v43  ;;  %vm3231_vm5 = vweird.f32 %v4528_v2  ;;  %vm3213_vm8 = vmor %vm3211_vm6, %vm3212_vm4  ;;  %vm3250_vm13 = vweird.f32 %v3244_v54 }
 0xb42   :  { %v3208_v63 = vsub.f32 1.0, %v3207_v51  ;;  %vm3232_vm9 = vmor %vm3230_vm7, %vm3231_vm5  ;;  %v3254_v10 = vand.u32 2147483647, %v3244_v54  ;;  %v3257_v25 = vor.u32 1.1754944e-38, %v3256_v15  ;;  %v6053_v51 = vld [vmem:[#allocation33_spill] sm:$0xff] }
 0xb43   :  { %v3227_v38 = vsub.f32 1.0, %v3226_v32  ;;  %v2124_v32 = vadd.f32 %v6053_v51, %v6028_v31 }
 0xb44   :  { %v3209_v47 = vmul.f32 %v4526_v26, %v3208_v63  ;;  %vm3255_vm15 = vcmp.eq.f32.partialorder %v3254_v10, 8.507059e+37 }
 0xb45   :  { %v3228_v28 = vmul.f32 %v4528_v2, %v3227_v38 }
 0xb46   :  { %v4530_v52 = vpop.eup %4529  ;;  %v3210_v3 = vadd.f32 %v4526_v26, %v3209_v47 }
 0xb47   :  { %v3229_v60 = vadd.f32 %v4528_v2, %v3228_v28  ;;  %v3246_v7 = vmul.f32 %v4530_v52, %v3244_v54  ;;  %v4532_v41 = vpop.eup %4531  ;;  %vm3251_vm12 = vweird.f32 %v4530_v52 }
 0xb48   :  { %v3214_v34 = vsel %vm3213_vm8, %v4526_v26, %v3210_v3  ;;  %vm3252_vm14 = vmor %vm3250_vm13, %vm3251_vm12 }
 0xb49   :  { %v3219_v13 = vsel %vm3216_vm10, %v3218_v44, %v3214_v34  ;;  %v3233_v35 = vsel %vm3232_vm9, %v4528_v2, %v3229_v60  ;;  %v3247_v6 = vsub.f32 1.0, %v3246_v7 }
 0xb4a   :  { %v3238_v11 = vsel %vm3235_vm11, %v3237_v19, %v3233_v35  ;;  %v3261_v30 = vmul.f32 %v4532_v41, %v3219_v13 }
 0xb4b   :  { %v3260_v1 = vmul.f32 %v3238_v11, %v5840_v14  ;;  %v3248_v9 = vmul.f32 %v4530_v52, %v3247_v6  ;;  %v6050_v14 = vld [vmem:[#allocation29_spill] sm:$0xff] }
 0xb4c   :  { %v2058_v55 = vadd.f32 %v6050_v14, %v5592_v27 }
 0xb4d   :  { %v5887_v8 = vadd.f32 %v3261_v30, %v3260_v1  ;;  %v3249_v61 = vadd.f32 %v4530_v52, %v3248_v9 }
 0xb4f   :  { %4533 = vtanh.f32 %v5887_v8  ;;  %v3253_v22 = vsel %vm3252_vm14, %v4530_v52, %v3249_v61 }
 0xb50   :  { %v3258_v58 = vsel %vm3255_vm15, %v3257_v25, %v3253_v22 }
 0xb55   :  { %v4534_v56 = vpop.eup %4533 }
 0xb56   :  { %v3264_v20 = vmul.f32 %v4534_v56, %v3258_v58 }
 0xb58   :  { %v3265_v40 = vpack.c.bf16 %v3264_v20, %v3264_v20 }
 0xb5a   :  { %4129 = vst [vmem:[%s5924_s4 + $0x18] sm:$0xf] %v3265_v40  ;;  %3279 = vmatmul.bf16.vlgmr.msra.gmra.mxu0 %v3265_v40  ;;  %3292 = vmatmul.bf16.vlgmr.msra.gmra.mxu1 %v3265_v40 }
 0xb5b   :  { %3305 = vmatmul.bf16.vlgmr.msra.gmra.mxu2 %v3265_v40  ;;  %3318 = vmatmul.bf16.vlgmr.msra.gmra.mxu3 %v3265_v40 }
 0xbd7   :  { %v3280_v36 = vpop.f32.mrf.mxu0  ;;  %v3293_v57 = vpop.f32.mrf.mxu1 }
 0xbd8   :  { %v3323_v29 = vadd.f32 %v3280_v36, %v2058_v55  ;;  %v3324_v37 = vadd.f32 %v3293_v57, %v2091_v33 }
 0xbda   :  { %v4130_v21 = vmul.f32 -1.442695, %v3323_v29  ;;  %v4131_v23 = vmul.f32 -1.442695, %v3324_v37 }
 0xbdc   :  { %4535 = vpow2.f32 %v4130_v21  ;;  %v6055_v21 = vld [vmem:[#allocation35_spill] sm:$0xff] }
 0xbdd   :  { %4537 = vpow2.f32 %v4131_v23  ;;  %v2094_v23 = vadd.f32 %v6055_v21, %v5594_v0 }
 0xbde   :  { %v3306_v39 = vpop.f32.mrf.mxu2  ;;  %v3319_v50 = vpop.f32.mrf.mxu3 }
 0xbdf   :  { %v3326_v18 = vadd.f32 %v3319_v50, %v2157_v42  ;;  %v3282_v5 = vpop.f32.mrf.mxu0  ;;  %v3295_v53 = vpop.f32.mrf.mxu1  ;;  %v3325_v24 = vadd.f32 %v3306_v39, %v2124_v32 }
 0xbe0   :  { %v6056_v53 = vld [vmem:[#allocation36_spill] sm:$0xff] }
 0xbe1   :  { %v4132_v59 = vmul.f32 -1.442695, %v3326_v18 }
 0xbe2   :  { %v4536_v48 = vpop.eup %4535 }
 0xbe3   :  { %v4538_v4 = vpop.eup %4537  ;;  %v3330_v62 = vadd.f32 1.0, %v4536_v48  ;;  %4539 = vpow2.f32 %v4132_v59  ;;  %v2160_v59 = vadd.f32 %v6056_v53, %v5598_v12 }
 0xbe4   :  { %v3349_v54 = vadd.f32 1.0, %v4538_v4 }
 0xbe5   :  { %4541 = vrcp.f32 %v3330_v62  ;;  %v3342_v52 = vand.u32 2147483648, %v3330_v62  ;;  %v3340_v60 = vand.u32 2147483647, %v3330_v62  ;;  %vm3336_vm2 = vweird.f32 %v3330_v62 }
 0xbe6   :  { %4543 = vrcp.f32 %v3349_v54  ;;  %v3308_v26 = vpop.f32.mrf.mxu2  ;;  %v3321_v43 = vpop.f32.mrf.mxu3  ;;  %v3361_v3 = vand.u32 2147483648, %v3349_v54  ;;  %v3359_v19 = vand.u32 2147483647, %v3349_v54  ;;  %vm3355_vm3 = vweird.f32 %v3349_v54 }
 0xbe7   :  { %v3343_v13 = vor.u32 1.1754944e-38, %v3342_v52  ;;  %vm3341_vm6 = vcmp.eq.f32.partialorder %v3340_v60, 8.507059e+37 }
 0xbe8   :  { %v3362_v11 = vor.u32 1.1754944e-38, %v3361_v3  ;;  %vm3360_vm7 = vcmp.eq.f32.partialorder %v3359_v19, 8.507059e+37 }
 0xbe9   :  { %v4540_v2 = vpop.eup %4539 }
 0xbea   :  { %v3369_v63 = vadd.f32 1.0, %v4540_v2 }
 0xbeb   :  { %v4542_v38 = vpop.eup %4541 }
 0xbec   :  { %v4544_v17 = vpop.eup %4543  ;;  %v3332_v47 = vmul.f32 %v4542_v38, %v3330_v62  ;;  %4545 = vrcp.f32 %v3369_v63  ;;  %vm3337_vm0 = vweird.f32 %v4542_v38  ;;  %v3381_v40 = vand.u32 2147483648, %v3369_v63 }
 0xbed   :  { %v3351_v49 = vmul.f32 %v4544_v17, %v3349_v54  ;;  %4547 = vtanh.f32 %v3325_v24  ;;  %vm3356_vm1 = vweird.f32 %v4544_v17  ;;  %vm3338_vm4 = vmor %vm3336_vm2, %vm3337_vm0  ;;  %vm3375_vm9 = vweird.f32 %v3369_v63  ;;  %v6057_v24 = vld [vmem:[#allocation37_spill] sm:$0xff] }
 0xbee   :  { %v3333_v28 = vsub.f32 1.0, %v3332_v47  ;;  %vm3357_vm5 = vmor %vm3355_vm3, %vm3356_vm1  ;;  %v3379_v14 = vand.u32 2147483647, %v3369_v63  ;;  %v3382_v16 = vor.u32 1.1754944e-38, %v3381_v40  ;;  %v2127_v12 = vadd.f32 %v6057_v24, %v6028_v31 }
 0xbef   :  { %v3352_v46 = vsub.f32 1.0, %v3351_v49 }
 0xbf0   :  { %v3334_v44 = vmul.f32 %v4542_v38, %v3333_v28  ;;  %vm3380_vm11 = vcmp.eq.f32.partialorder %v3379_v14, 8.507059e+37 }
 0xbf1   :  { %v3353_v7 = vmul.f32 %v4544_v17, %v3352_v46 }
 0xbf2   :  { %v4546_v34 = vpop.eup %4545  ;;  %v3335_v41 = vadd.f32 %v4542_v38, %v3334_v44 }
 0xbf3   :  { %v3354_v35 = vadd.f32 %v4544_v17, %v3353_v7  ;;  %v3371_v6 = vmul.f32 %v4546_v34, %v3369_v63  ;;  %v4548_v1 = vpop.eup %4547  ;;  %vm3376_vm8 = vweird.f32 %v4546_v34 }
 0xbf4   :  { %v3339_v30 = vsel %vm3338_vm4, %v4542_v38, %v3335_v41  ;;  %vm3377_vm10 = vmor %vm3375_vm9, %vm3376_vm8 }
 0xbf5   :  { %v3344_v9 = vsel %vm3341_vm6, %v3343_v13, %v3339_v30  ;;  %v3358_v61 = vsel %vm3357_vm5, %v4544_v17, %v3354_v35  ;;  %v3372_v15 = vsub.f32 1.0, %v3371_v6 }
 0xbf6   :  { %v3363_v10 = vsel %vm3360_vm7, %v3362_v11, %v3358_v61  ;;  %v3386_v22 = vmul.f32 %v4548_v1, %v3344_v9 }
 0xbf7   :  { %v3385_v25 = vmul.f32 %v3363_v10, %v5887_v8  ;;  %v3373_v56 = vmul.f32 %v4546_v34, %v3372_v15  ;;  %v6054_v8 = vld [vmem:[#allocation34_spill] sm:$0xff] }
 0xbf8   :  { %v2061_v37 = vadd.f32 %v6054_v8, %v5592_v27 }
 0xbf9   :  { %v5902_v58 = vadd.f32 %v3386_v22, %v3385_v25  ;;  %v3374_v20 = vadd.f32 %v4546_v34, %v3373_v56 }
 0xbfb   :  { %4549 = vtanh.f32 %v5902_v58  ;;  %v3378_v55 = vsel %vm3377_vm10, %v4546_v34, %v3374_v20 }
 0xbfc   :  { %v3383_v36 = vsel %vm3380_vm11, %v3382_v16, %v3378_v55 }
 0xc01   :  { %v4550_v33 = vpop.eup %4549 }
 0xc02   :  { %v3389_v57 = vmul.f32 %v4550_v33, %v3383_v36 }
 0xc04   :  { %v3390_v29 = vpack.c.bf16 %v3389_v57, %v3389_v57 }
 0xc06   :  { %4133 = vst [vmem:[%s5924_s4 + $0x1c] sm:$0xf] %v3390_v29  ;;  %3404 = vmatmul.bf16.vlgmr.msrb.gmra.mxu0 %v3390_v29  ;;  %3417 = vmatmul.bf16.vlgmr.msrb.gmra.mxu1 %v3390_v29 }
 0xc07   :  { %3430 = vmatmul.bf16.vlgmr.msrb.gmra.mxu2 %v3390_v29  ;;  %3443 = vmatmul.bf16.vlgmr.msrb.gmra.mxu3 %v3390_v29 }
 0xc83   :  { %v3405_v45 = vpop.f32.mrf.mxu0  ;;  %v3418_v42 = vpop.f32.mrf.mxu1 }
 0xc84   :  { %v3448_v39 = vadd.f32 %v3405_v45, %v2061_v37  ;;  %v3449_v50 = vadd.f32 %v3418_v42, %v2094_v23 }
 0xc86   :  { %v4134_v18 = vmul.f32 -1.442695, %v3448_v39  ;;  %v4135_v5 = vmul.f32 -1.442695, %v3449_v50 }
 0xc88   :  { %4551 = vpow2.f32 %v4134_v18 }
 0xc89   :  { %4553 = vpow2.f32 %v4135_v5 }
 0xc8a   :  { %v3431_v48 = vpop.f32.mrf.mxu2  ;;  %v3444_v4 = vpop.f32.mrf.mxu3 }
 0xc8b   :  { %v3451_v62 = vadd.f32 %v3444_v4, %v2160_v59  ;;  %v3407_v54 = vpop.f32.mrf.mxu0  ;;  %v3420_v26 = vpop.f32.mrf.mxu1  ;;  %v3450_v49 = vadd.f32 %v3431_v48, %v2127_v12 }
 0xc8d   :  { %v4136_v27 = vmul.f32 -1.442695, %v3451_v62 }
 0xc8e   :  { %v4552_v43 = vpop.eup %4551 }
 0xc8f   :  { %v4554_v2 = vpop.eup %4553  ;;  %v3455_v0 = vadd.f32 1.0, %v4552_v43  ;;  %4555 = vpow2.f32 %v4136_v27 }
 0xc90   :  { %v3474_v51 = vadd.f32 1.0, %v4554_v2 }
 0xc91   :  { %4557 = vrcp.f32 %v3455_v0  ;;  %v3467_v60 = vand.u32 2147483648, %v3455_v0  ;;  %v3465_v34 = vand.u32 2147483647, %v3455_v0  ;;  %vm3461_vm14 = vweird.f32 %v3455_v0 }
 0xc92   :  { %4559 = vrcp.f32 %v3474_v51  ;;  %v3433_v32 = vpop.f32.mrf.mxu2  ;;  %v3446_v63 = vpop.f32.mrf.mxu3  ;;  %v3486_v7 = vand.u32 2147483648, %v3474_v51  ;;  %v3484_v13 = vand.u32 2147483647, %v3474_v51  ;;  %vm3480_vm15 = vweird.f32 %v3474_v51 }
 0xc93   :  { %v3468_v6 = vor.u32 1.1754944e-38, %v3467_v60  ;;  %vm3466_vm2 = vcmp.eq.f32.partialorder %v3465_v34, 8.507059e+37 }
 0xc94   :  { %v3487_v1 = vor.u32 1.1754944e-38, %v3486_v7  ;;  %vm3485_vm3 = vcmp.eq.f32.partialorder %v3484_v13, 8.507059e+37 }
 0xc95   :  { %v4556_v38 = vpop.eup %4555 }
 0xc96   :  { %v3494_v17 = vadd.f32 1.0, %v4556_v38 }
 0xc97   :  { %v4558_v47 = vpop.eup %4557 }
 0xc98   :  { %v4560_v28 = vpop.eup %4559  ;;  %v3457_v46 = vmul.f32 %v4558_v47, %v3455_v0  ;;  %4561 = vrcp.f32 %v3494_v17  ;;  %vm3462_vm12 = vweird.f32 %v4558_v47  ;;  %v3506_v16 = vand.u32 2147483648, %v3494_v17 }
 0xc99   :  { %v3476_v52 = vmul.f32 %v4560_v28, %v3474_v51  ;;  %4563 = vtanh.f32 %v3450_v49  ;;  %vm3481_vm13 = vweird.f32 %v4560_v28  ;;  %vm3463_vm0 = vmor %vm3461_vm14, %vm3462_vm12  ;;  %vm3500_vm5 = vweird.f32 %v3494_v17 }
 0xc9a   :  { %v3458_v3 = vsub.f32 1.0, %v3457_v46  ;;  %vm3482_vm1 = vmor %vm3480_vm15, %vm3481_vm13  ;;  %v3504_v33 = vand.u32 2147483647, %v3494_v17  ;;  %v3507_v57 = vor.u32 1.1754944e-38, %v3506_v16 }
 0xc9b   :  { %v3477_v44 = vsub.f32 1.0, %v3476_v52 }
 0xc9c   :  { %v3459_v19 = vmul.f32 %v4558_v47, %v3458_v3  ;;  %vm3505_vm7 = vcmp.eq.f32.partialorder %v3504_v33, 8.507059e+37 }
 0xc9d   :  { %v3478_v41 = vmul.f32 %v4560_v28, %v3477_v44 }
 0xc9e   :  { %v4562_v35 = vpop.eup %4561  ;;  %v3460_v31 = vadd.f32 %v4558_v47, %v3459_v19 }
 0xc9f   :  { %v3479_v11 = vadd.f32 %v4560_v28, %v3478_v41  ;;  %v3496_v30 = vmul.f32 %v4562_v35, %v3494_v17  ;;  %v4564_v61 = vpop.eup %4563  ;;  %vm3501_vm4 = vweird.f32 %v4562_v35 }
 0xca0   :  { %v3464_v9 = vsel %vm3463_vm0, %v4558_v47, %v3460_v31  ;;  %vm3502_vm6 = vmor %vm3500_vm5, %vm3501_vm4 }
 0xca1   :  { %v3469_v15 = vsel %vm3466_vm2, %v3468_v6, %v3464_v9  ;;  %v3483_v10 = vsel %vm3482_vm1, %v4560_v28, %v3479_v11  ;;  %v3497_v22 = vsub.f32 1.0, %v3496_v30 }
 0xca2   :  { %v3488_v25 = vsel %vm3485_vm3, %v3487_v1, %v3483_v10  ;;  %v3511_v56 = vmul.f32 %v4564_v61, %v3469_v15 }
 0xca3   :  { %v3510_v20 = vmul.f32 %v3488_v25, %v5902_v58  ;;  %v3498_v40 = vmul.f32 %v4562_v35, %v3497_v22 }
 0xca5   :  { %v3512_v14 = vadd.f32 %v3511_v56, %v3510_v20  ;;  %v3499_v55 = vadd.f32 %v4562_v35, %v3498_v40 }
 0xca7   :  { %4565 = vtanh.f32 %v3512_v14  ;;  %v3503_v36 = vsel %vm3502_vm6, %v4562_v35, %v3499_v55 }
 0xca8   :  { %v3508_v8 = vsel %vm3505_vm7, %v3507_v57, %v3503_v36 }
 0xcad   :  { %v4566_v29 = vpop.eup %4565 }
 0xcae   :  { %v3514_v37 = vmul.f32 %v4566_v29, %v3508_v8 }
 0xcb0   :  { %v3515_v21 = vpack.c.bf16 %v3514_v37, %v3514_v37 }
 0xcb2   :  { %4137 = vst [vmem:[%s5924_s4 + $0x20] sm:$0xf] %v3515_v21 }
 0xcb3   :  { %3521 = vsyncpa [#allocation4], 1 }
 0xcb4   :  { %3522 = vsyncpa [#allocation6], 1 }

</bundles_post_ra>
